<compile_context>
chip_gen: v7x
topology: tpu7x:2x2x1
jax: 0.10.0
libtpu: 0.0.40
codegen_flags: <defaults>
</compile_context>

<pallas_src>
import functools
import math

import jax
import jax.numpy as jnp
from jax.experimental import pallas as pl
from jax.experimental.pallas import tpu as pltpu


def _round_up(x, m):
    return (x + m - 1) // m * m


# ----------------------------------------------------------------------------
# Fused kernel: conv1 -> conv2 -> conv3 -> max over points -> fc1 -> fc2 -> fc3
# ----------------------------------------------------------------------------

def _stnkd_kernel(x_ref,
                  w1_ref, b1_ref, w2_ref, b2_ref, w3_ref, b3_ref,
                  w4_ref, b4_ref, w5_ref, b5_ref, w6_ref, b6_ref,
                  o_ref, acc_ref):
    """One (batch, point-tile) grid step.

    x_ref   : (1, k_pad, tm) f32  -- original [B, k, N] layout (no HBM transpose)
    w1      : (k_pad, 64)    f32  (tiny; transposed-LHS matmul kept 32-bit)
    w2/w3   : bf16 conv weights,  w4/w5/w6 : bf16 fc weights (MXU-native)
    b*      : (1, C) f32          (b6 already has the +identity folded in)
    o_ref   : (1, 1, k*k)         -- written only on the last point tile
    acc_ref : (1, 1024) f32 VMEM scratch -- running max over point tiles
    """
    nt = pl.program_id(1)
    last = pl.num_programs(1) - 1

    x = x_ref[0]                                             # (k_pad, tm) f32

    # conv1: contract the channel axis of the (k_pad, tm) tile directly.
    # Transposed-LHS is kept in f32 (natively supported for 32-bit operands;
    # this layer is negligible FLOP-wise).
    h = jax.lax.dot_general(
        x, w1_ref[...],
        dimension_numbers=(((0,), (0,)), ((), ())),
        preferred_element_type=jnp.float32) + b1_ref[...]     # (tm, 64)
    h = jnp.maximum(h, 0.0)

    # conv2 / conv3: bf16 operands on the MXU, f32 accumulation.
    h = jnp.dot(h.astype(jnp.bfloat16), w2_ref[...],
                preferred_element_type=jnp.float32) + b2_ref[...]   # (tm, 128)
    h = jnp.maximum(h, 0.0)
    h = jnp.dot(h.astype(jnp.bfloat16), w3_ref[...],
                preferred_element_type=jnp.float32) + b3_ref[...]   # (tm, 1024)
    h = jnp.maximum(h, 0.0)

    # Max over this tile's points.  Padded points (if any) are edge-replicated
    # copies of a real point, so they can never change the max -> no masking.
    tile_max = jnp.max(h, axis=0, keepdims=True)                    # (1, 1024)

    @pl.when(nt == 0)
    def _():
        acc_ref[...] = tile_max

    @pl.when(nt != 0)
    def _():
        acc_ref[...] = jnp.maximum(acc_ref[...], tile_max)

    # FC head fused as an epilogue on the last point tile.
    @pl.when(nt == last)
    def _():
        g = acc_ref[...].astype(jnp.bfloat16)                       # (1, 1024)
        f = jnp.dot(g, w4_ref[...],
                    preferred_element_type=jnp.float32) + b4_ref[...]
        f = jnp.maximum(f, 0.0).astype(jnp.bfloat16)                # (1, 512)
        f = jnp.dot(f, w5_ref[...],
                    preferred_element_type=jnp.float32) + b5_ref[...]
        f = jnp.maximum(f, 0.0).astype(jnp.bfloat16)                # (1, 256)
        y = jnp.dot(f, w6_ref[...],
                    preferred_element_type=jnp.float32) + b6_ref[...]
        o_ref[0] = y.astype(o_ref.dtype)                            # (1, k*k)


# ----------------------------------------------------------------------------
# Wrapper
# ----------------------------------------------------------------------------

def pack_params(params, k):
    """One-time parameter prep for the kernel: bf16 MXU operands for the heavy
    layers, (1, C) f32 bias rows, '+ identity' folded into the fc3 bias, and
    zero-padded conv1 weight rows when k is not a multiple of 8."""
    w1, b1 = params["conv1"]
    w2, b2 = params["conv2"]
    w3, b3 = params["conv3"]
    w4, b4 = params["fc1"]
    w5, b5 = params["fc2"]
    w6, b6 = params["fc3"]

    k_pad = _round_up(k, 8)
    if k_pad != k:
        w1 = jnp.pad(w1, ((0, k_pad - k), (0, 0)))   # zero rows: no contribution

    b6 = b6 + jnp.eye(k, dtype=jnp.float32).reshape(k * k)

    f32, bf16 = jnp.float32, jnp.bfloat16
    row = lambda b: b.reshape(1, -1).astype(f32)
    return (
        w1.astype(f32), row(b1),
        w2.astype(bf16), row(b2),
        w3.astype(bf16), row(b3),
        w4.astype(bf16), row(b4),
        w5.astype(bf16), row(b5),
        w6.astype(bf16), row(b6),
    )


def stnkd_forward(x_bkn, packed, k):
    """STNKd forward.  x: [B, k, N] (PyTorch Conv1d layout)  ->  [B, k, k]."""
    B, kk, N = x_bkn.shape
    assert kk == k
    x = x_bkn.astype(jnp.float32)

    k_pad = _round_up(k, 8)
    # Pad the point axis to a lane-aligned multiple of 128 and pick the largest
    # power-of-two tile <= 1024 dividing it (review: fewer grid steps, longer
    # MXU runs).  Edge mode replicates a real point -> max is unaffected; the
    # extra channel rows (k_pad > k) meet zero rows of w1 -> no contribution.
    n_pad = _round_up(N, 128)
    tm = 1024
    while n_pad % tm != 0:
        tm //= 2
    if (k_pad != k) or (n_pad != N):
        x = jnp.pad(x, ((0, 0), (0, k_pad - k), (0, n_pad - N)), mode="edge")
    n_tiles = n_pad // tm

    (w1, b1, w2, b2, w3, b3, w4, b4, w5, b5, w6, b6) = packed

    const = lambda shape: pl.BlockSpec(shape, lambda b, t: (0, 0))

    out = pl.pallas_call(
        _stnkd_kernel,
        out_shape=jax.ShapeDtypeStruct((B, 1, k * k), jnp.float32),
        grid_spec=pltpu.PrefetchScalarGridSpec(
            num_scalar_prefetch=0,
            grid=(B, n_tiles),
            in_specs=[
                pl.BlockSpec((1, k_pad, tm), lambda b, t: (b, 0, t)),
                const((k_pad, 64)), const((1, 64)),
                const((64, 128)), const((1, 128)),
                const((128, 1024)), const((1, 1024)),
                const((1024, 512)), const((1, 512)),
                const((512, 256)), const((1, 256)),
                const((256, k * k)), const((1, k * k)),
            ],
            out_specs=pl.BlockSpec((1, 1, k * k), lambda b, t: (b, 0, 0)),
            scratch_shapes=[pltpu.VMEM((1, 1024), jnp.float32)],
        ),
        compiler_params=pltpu.CompilerParams(
            # Batch axis parallel (v7x: keep B >= 2 so both TensorCores work);
            # point-tile axis carries the running-max + epilogue dependence.
            dimension_semantics=("parallel", "arbitrary"),
            # Explicit headroom: v5e's scoped-VMEM default is only 16 MiB and
            # tm=1024 keeps a (tm,1024) f32 intermediate live.
            vmem_limit_bytes=48 * 1024 * 1024),
    )(x, w1, b1, w2, b2, w3, b3, w4, b4, w5, b5, w6, b6)

    return out.reshape(B, k, k)


# ----------------------------------------------------------------------------
# Parameters (deterministic synthetic init; BN folded into conv/linear)
# ----------------------------------------------------------------------------

_BN_EPS = 1e-5


def make_layer(key, cin, cout, bn=True):
    k1, k2, k3, k4, k5, k6 = jax.random.split(key, 6)
    w = jax.random.normal(k1, (cin, cout), jnp.float32) / math.sqrt(cin)
    b = 0.01 * jax.random.normal(k2, (cout,), jnp.float32)
    if bn:
        gamma = 1.0 + 0.1 * jax.random.normal(k3, (cout,), jnp.float32)
        beta = 0.1 * jax.random.normal(k4, (cout,), jnp.float32)
        mean = 0.1 * jax.random.normal(k5, (cout,), jnp.float32)
        var = 1.0 + 0.1 * jax.random.uniform(k6, (cout,), jnp.float32)
        scale = gamma / jnp.sqrt(var + _BN_EPS)
        w = w * scale[None, :]
        b = scale * (b - mean) + beta
    return w, b


def init_stn_params(key, k):
    keys = jax.random.split(key, 6)
    return dict(
        conv1=make_layer(keys[0], k, 64),
        conv2=make_layer(keys[1], 64, 128),
        conv3=make_layer(keys[2], 128, 1024),
        fc1=make_layer(keys[3], 1024, 512),
        fc2=make_layer(keys[4], 512, 256),
        fc3=make_layer(keys[5], 256, k * k, bn=False),
    )


# ----------------------------------------------------------------------------
# Pure-JAX reference with the SAME precision policy (bf16 operands / f32
# accumulation for the heavy layers) so it checks the kernel implementation.
# ----------------------------------------------------------------------------

def stnkd_reference(x_bkn, params, k):
    x = jnp.transpose(x_bkn, (0, 2, 1)).astype(jnp.float32)          # [B, N, k]

    def layer(h, wb, relu=True, bf16=True):
        w, b = wb
        if bf16:
            h_in, w_in = h.astype(jnp.bfloat16), w.astype(jnp.bfloat16)
        else:
            h_in, w_in = h, w
        y = jnp.dot(h_in, w_in, preferred_element_type=jnp.float32,
                    precision=jax.lax.Precision.HIGHEST) + b
        return jnp.maximum(y, 0.0) if relu else y

    h = layer(x, params["conv1"], bf16=False)
    h = layer(h, params["conv2"])
    h = layer(h, params["conv3"])
    g = jnp.max(h, axis=1)                                            # [B, 1024]
    g = layer(g, params["fc1"])
    g = layer(g, params["fc2"])
    g = layer(g, params["fc3"], relu=False)
    g = g + jnp.eye(k, dtype=g.dtype).reshape(1, k * k)
    return g.reshape(-1, k, k)


# ----------------------------------------------------------------------------

if __name__ == "__main__":
    key = jax.random.PRNGKey(0)

    ok = True
    # Case 1: k=3, ragged N (exercises edge-padding + multi-tile running max).
    # Case 2: k=64, lane-aligned N (single tile, big k path).
    for (k, B, N) in [(3, 2, 300), (64, 2, 128)]:
        kp, kx, key = jax.random.split(key, 3)
        params = init_stn_params(kp, k)
        packed = pack_params(params, k)
        # PyTorch Conv1d layout: [B, k, N]
        x = jax.random.normal(kx, (B, k, N), jnp.float32)

        fwd = jax.jit(functools.partial(stnkd_forward, k=k))
        out = fwd(x, packed)
        jax.block_until_ready(out)

        ref = stnkd_reference(x, params, k)
        assert out.shape == (B, k, k), out.shape
        if not jnp.allclose(out, ref, atol=1e-2, rtol=1e-2):
            ok = False
            print("MISMATCH k=%d  max abs err=%g" %
                  (k, float(jnp.max(jnp.abs(out - ref)))))

    if ok:
        print("KERNEL_OK")
</pallas_src>

<mosaic_0001>
module attributes {stable_mosaic.version = 11 : i64} {
  func.func @_stnkd_kernel(%arg0: i32, %arg1: i32, %arg2: memref<1x8x128xf32, #tpu.memory_space<vmem>>, %arg3: memref<8x64xf32, #tpu.memory_space<vmem>>, %arg4: memref<1x64xf32, #tpu.memory_space<vmem>>, %arg5: memref<64x128xbf16, #tpu.memory_space<vmem>>, %arg6: memref<1x128xf32, #tpu.memory_space<vmem>>, %arg7: memref<128x1024xbf16, #tpu.memory_space<vmem>>, %arg8: memref<1x1024xf32, #tpu.memory_space<vmem>>, %arg9: memref<1024x512xbf16, #tpu.memory_space<vmem>>, %arg10: memref<1x512xf32, #tpu.memory_space<vmem>>, %arg11: memref<512x256xbf16, #tpu.memory_space<vmem>>, %arg12: memref<1x256xf32, #tpu.memory_space<vmem>>, %arg13: memref<256x9xbf16, #tpu.memory_space<vmem>>, %arg14: memref<1x9xf32, #tpu.memory_space<vmem>>, %arg15: memref<1x1x9xf32, #tpu.memory_space<vmem>>, %arg16: memref<1x1024xf32, #tpu.memory_space<vmem>>) attributes {dimension_semantics = [#tpu.dimension_semantics<parallel>, #tpu.dimension_semantics<arbitrary>], iteration_bounds = array<i64: 2, 3>, scalar_prefetch = 0 : i64, scratch_operands = 1 : i64, tpu.core_type = #tpu.core_type<tc>, window_params = [{transform_indices = @transform_0, window_bounds = array<i64: 1, 8, 128>}, {pipeline_mode = #tpu.pipeline_mode<synchronous>, transform_indices = @transform_1, window_bounds = array<i64: 8, 64>}, {pipeline_mode = #tpu.pipeline_mode<synchronous>, transform_indices = @transform_2, window_bounds = array<i64: 1, 64>}, {pipeline_mode = #tpu.pipeline_mode<synchronous>, transform_indices = @transform_3, window_bounds = array<i64: 64, 128>}, {pipeline_mode = #tpu.pipeline_mode<synchronous>, transform_indices = @transform_4, window_bounds = array<i64: 1, 128>}, {pipeline_mode = #tpu.pipeline_mode<synchronous>, transform_indices = @transform_5, window_bounds = array<i64: 128, 1024>}, {pipeline_mode = #tpu.pipeline_mode<synchronous>, transform_indices = @transform_6, window_bounds = array<i64: 1, 1024>}, {pipeline_mode = #tpu.pipeline_mode<synchronous>, transform_indices = @transform_7, window_bounds = array<i64: 1024, 512>}, {pipeline_mode = #tpu.pipeline_mode<synchronous>, transform_indices = @transform_8, window_bounds = array<i64: 1, 512>}, {pipeline_mode = #tpu.pipeline_mode<synchronous>, transform_indices = @transform_9, window_bounds = array<i64: 512, 256>}, {pipeline_mode = #tpu.pipeline_mode<synchronous>, transform_indices = @transform_10, window_bounds = array<i64: 1, 256>}, {pipeline_mode = #tpu.pipeline_mode<synchronous>, transform_indices = @transform_11, window_bounds = array<i64: 256, 9>}, {pipeline_mode = #tpu.pipeline_mode<synchronous>, transform_indices = @transform_12, window_bounds = array<i64: 1, 9>}, {transform_indices = @transform_13, window_bounds = array<i64: 1, 1, 9>}]} {
    %c0 = arith.constant 0 : index
    %c0_0 = arith.constant 0 : index
    %c0_1 = arith.constant 0 : index
    %0 = vector.load %arg2[%c0, %c0_0, %c0_1] : memref<1x8x128xf32, #tpu.memory_space<vmem>>, vector<1x8x128xf32>
    %1 = vector.shape_cast %0 : vector<1x8x128xf32> to vector<8x128xf32>
    %c0_2 = arith.constant 0 : index
    %c0_3 = arith.constant 0 : index
    %2 = vector.load %arg3[%c0_2, %c0_3] : memref<8x64xf32, #tpu.memory_space<vmem>>, vector<8x64xf32>
    %cst = arith.constant dense<0.000000e+00> : vector<128x64xf32>
    %3 = tpu.matmul %1, %2, %cst {dimension_numbers = #tpu.dot_dimension_numbers<[0], [0], [1], [1], [0, 1, 1, 1], [], []>} : vector<8x128xf32>, vector<8x64xf32>, vector<128x64xf32> -> vector<128x64xf32>
    %c0_4 = arith.constant 0 : index
    %c0_5 = arith.constant 0 : index
    %4 = vector.load %arg4[%c0_4, %c0_5] : memref<1x64xf32, #tpu.memory_space<vmem>>, vector<1x64xf32>
    %5 = vector.broadcast %4 : vector<1x64xf32> to vector<128x64xf32>
    %6 = arith.addf %3, %5 : vector<128x64xf32>
    %cst_6 = arith.constant 0.000000e+00 : f32
    %7 = vector.broadcast %cst_6 : f32 to vector<128x64xf32>
    %8 = arith.maximumf %6, %7 : vector<128x64xf32>
    %9 = arith.truncf %8 : vector<128x64xf32> to vector<128x64xbf16>
    %c0_7 = arith.constant 0 : index
    %c0_8 = arith.constant 0 : index
    %10 = vector.load %arg5[%c0_7, %c0_8] : memref<64x128xbf16, #tpu.memory_space<vmem>>, vector<64x128xbf16>
    %cst_9 = arith.constant dense<0.000000e+00> : vector<128x128xf32>
    %11 = tpu.matmul %9, %10, %cst_9 {dimension_numbers = #tpu.dot_dimension_numbers<[1], [0], [0], [1], [0, 0, 1, 1], [], []>} : vector<128x64xbf16>, vector<64x128xbf16>, vector<128x128xf32> -> vector<128x128xf32>
    %c0_10 = arith.constant 0 : index
    %c0_11 = arith.constant 0 : index
    %12 = vector.load %arg6[%c0_10, %c0_11] : memref<1x128xf32, #tpu.memory_space<vmem>>, vector<1x128xf32>
    %13 = vector.broadcast %12 : vector<1x128xf32> to vector<128x128xf32>
    %14 = arith.addf %11, %13 : vector<128x128xf32>
    %cst_12 = arith.constant 0.000000e+00 : f32
    %15 = vector.broadcast %cst_12 : f32 to vector<128x128xf32>
    %16 = arith.maximumf %14, %15 : vector<128x128xf32>
    %17 = arith.truncf %16 : vector<128x128xf32> to vector<128x128xbf16>
    %c0_13 = arith.constant 0 : index
    %c0_14 = arith.constant 0 : index
    %18 = vector.load %arg7[%c0_13, %c0_14] : memref<128x1024xbf16, #tpu.memory_space<vmem>>, vector<128x1024xbf16>
    %cst_15 = arith.constant dense<0.000000e+00> : vector<128x1024xf32>
    %19 = tpu.matmul %17, %18, %cst_15 {dimension_numbers = #tpu.dot_dimension_numbers<[1], [0], [0], [1], [0, 0, 1, 1], [], []>} : vector<128x128xbf16>, vector<128x1024xbf16>, vector<128x1024xf32> -> vector<128x1024xf32>
    %c0_16 = arith.constant 0 : index
    %c0_17 = arith.constant 0 : index
    %20 = vector.load %arg8[%c0_16, %c0_17] : memref<1x1024xf32, #tpu.memory_space<vmem>>, vector<1x1024xf32>
    %21 = vector.broadcast %20 : vector<1x1024xf32> to vector<128x1024xf32>
    %22 = arith.addf %19, %21 : vector<128x1024xf32>
    %cst_18 = arith.constant 0.000000e+00 : f32
    %23 = vector.broadcast %cst_18 : f32 to vector<128x1024xf32>
    %24 = arith.maximumf %22, %23 : vector<128x1024xf32>
    %cst_19 = arith.constant dense<0xFF800000> : vector<1024xf32>
    %25 = vector.multi_reduction <maximumf>, %24, %cst_19 [0] : vector<128x1024xf32> to vector<1024xf32>
    %26 = vector.shape_cast %25 : vector<1024xf32> to vector<1x1024xf32>
    %c0_i32 = arith.constant 0 : i32
    %27 = arith.cmpi eq, %arg1, %c0_i32 : i32
    %28 = arith.extui %27 : i1 to i32
    %c0_i32_20 = arith.constant 0 : i32
    %29 = arith.cmpi ne, %28, %c0_i32_20 : i32
    scf.if %29 {
      %c0_24 = arith.constant 0 : index
      %c0_25 = arith.constant 0 : index
      %36 = vector.load %arg16[%c0_24, %c0_25] : memref<1x1024xf32, #tpu.memory_space<vmem>>, vector<1x1024xf32>
      tpu.vector_store %arg16[%c0_24, %c0_25], %26 {strides = array<i32>} : memref<1x1024xf32, #tpu.memory_space<vmem>>, vector<1x1024xf32>,
    } else {
    }
    %c0_i32_21 = arith.constant 0 : i32
    %30 = arith.cmpi ne, %arg1, %c0_i32_21 : i32
    %31 = arith.extui %30 : i1 to i32
    %c0_i32_22 = arith.constant 0 : i32
    %32 = arith.cmpi ne, %31, %c0_i32_22 : i32
    scf.if %32 {
      %c0_24 = arith.constant 0 : index
      %c0_25 = arith.constant 0 : index
      %36 = vector.load %arg16[%c0_24, %c0_25] : memref<1x1024xf32, #tpu.memory_space<vmem>>, vector<1x1024xf32>
      %37 = arith.maximumf %36, %26 : vector<1x1024xf32>
      %c0_26 = arith.constant 0 : index
      %c0_27 = arith.constant 0 : index
      %38 = vector.load %arg16[%c0_26, %c0_27] : memref<1x1024xf32, #tpu.memory_space<vmem>>, vector<1x1024xf32>
      tpu.vector_store %arg16[%c0_26, %c0_27], %37 {strides = array<i32>} : memref<1x1024xf32, #tpu.memory_space<vmem>>, vector<1x1024xf32>,
    } else {
    }
    %c2_i32 = arith.constant 2 : i32
    %33 = arith.cmpi eq, %arg1, %c2_i32 : i32
    %34 = arith.extui %33 : i1 to i32
    %c0_i32_23 = arith.constant 0 : i32
    %35 = arith.cmpi ne, %34, %c0_i32_23 : i32
    scf.if %35 {
      %c0_24 = arith.constant 0 : index
      %c0_25 = arith.constant 0 : index
      %36 = vector.load %arg16[%c0_24, %c0_25] : memref<1x1024xf32, #tpu.memory_space<vmem>>, vector<1x1024xf32>
      %37 = arith.truncf %36 : vector<1x1024xf32> to vector<1x1024xbf16>
      %c0_26 = arith.constant 0 : index
      %c0_27 = arith.constant 0 : index
      %38 = vector.load %arg9[%c0_26, %c0_27] : memref<1024x512xbf16, #tpu.memory_space<vmem>>, vector<1024x512xbf16>
      %cst_28 = arith.constant dense<0.000000e+00> : vector<1x512xf32>
      %39 = tpu.matmul %37, %38, %cst_28 {dimension_numbers = #tpu.dot_dimension_numbers<[1], [0], [0], [1], [0, 0, 1, 1], [], []>} : vector<1x1024xbf16>, vector<1024x512xbf16>, vector<1x512xf32> -> vector<1x512xf32>
      %c0_29 = arith.constant 0 : index
      %c0_30 = arith.constant 0 : index
      %40 = vector.load %arg10[%c0_29, %c0_30] : memref<1x512xf32, #tpu.memory_space<vmem>>, vector<1x512xf32>
      %41 = arith.addf %39, %40 : vector<1x512xf32>
      %cst_31 = arith.constant 0.000000e+00 : f32
      %42 = vector.broadcast %cst_31 : f32 to vector<1x512xf32>
      %43 = arith.maximumf %41, %42 : vector<1x512xf32>
      %44 = arith.truncf %43 : vector<1x512xf32> to vector<1x512xbf16>
      %c0_32 = arith.constant 0 : index
      %c0_33 = arith.constant 0 : index
      %45 = vector.load %arg11[%c0_32, %c0_33] : memref<512x256xbf16, #tpu.memory_space<vmem>>, vector<512x256xbf16>
      %cst_34 = arith.constant dense<0.000000e+00> : vector<1x256xf32>
      %46 = tpu.matmul %44, %45, %cst_34 {dimension_numbers = #tpu.dot_dimension_numbers<[1], [0], [0], [1], [0, 0, 1, 1], [], []>} : vector<1x512xbf16>, vector<512x256xbf16>, vector<1x256xf32> -> vector<1x256xf32>
      %c0_35 = arith.constant 0 : index
      %c0_36 = arith.constant 0 : index
      %47 = vector.load %arg12[%c0_35, %c0_36] : memref<1x256xf32, #tpu.memory_space<vmem>>, vector<1x256xf32>
      %48 = arith.addf %46, %47 : vector<1x256xf32>
      %cst_37 = arith.constant 0.000000e+00 : f32
      %49 = vector.broadcast %cst_37 : f32 to vector<1x256xf32>
      %50 = arith.maximumf %48, %49 : vector<1x256xf32>
      %51 = arith.truncf %50 : vector<1x256xf32> to vector<1x256xbf16>
      %c0_38 = arith.constant 0 : index
      %c0_39 = arith.constant 0 : index
      %52 = vector.load %arg13[%c0_38, %c0_39] : memref<256x9xbf16, #tpu.memory_space<vmem>>, vector<256x9xbf16>
      %cst_40 = arith.constant dense<0.000000e+00> : vector<1x9xf32>
      %53 = tpu.matmul %51, %52, %cst_40 {dimension_numbers = #tpu.dot_dimension_numbers<[1], [0], [0], [1], [0, 0, 1, 1], [], []>} : vector<1x256xbf16>, vector<256x9xbf16>, vector<1x9xf32> -> vector<1x9xf32>
      %c0_41 = arith.constant 0 : index
      %c0_42 = arith.constant 0 : index
      %54 = vector.load %arg14[%c0_41, %c0_42] : memref<1x9xf32, #tpu.memory_space<vmem>>, vector<1x9xf32>
      %55 = arith.addf %53, %54 : vector<1x9xf32>
      %c0_43 = arith.constant 0 : index
      %c0_44 = arith.constant 0 : index
      %c0_45 = arith.constant 0 : index
      %56 = vector.load %arg15[%c0_43, %c0_44, %c0_45] : memref<1x1x9xf32, #tpu.memory_space<vmem>>, vector<1x1x9xf32>
      %57 = vector.shape_cast %56 : vector<1x1x9xf32> to vector<1x9xf32>
      %58 = vector.shape_cast %55 : vector<1x9xf32> to vector<1x1x9xf32>
      tpu.vector_store %arg15[%c0_43, %c0_44, %c0_45], %58 {strides = array<i32>} : memref<1x1x9xf32, #tpu.memory_space<vmem>>, vector<1x1x9xf32>,
    } else {
    }
    return
  }
  func.func @transform_0(%arg0: i32, %arg1: i32) -> (i32, i32, i32) {
    %c0_i32 = arith.constant 0 : i32
    %c0_i32_0 = arith.constant 0 : i32
    return %arg0, %c0_i32, %arg1 : i32, i32, i32
  }
  func.func @transform_1(%arg0: i32, %arg1: i32) -> (i32, i32) {
    %c0_i32 = arith.constant 0 : i32
    %c0_i32_0 = arith.constant 0 : i32
    %c0_i32_1 = arith.constant 0 : i32
    return %c0_i32, %c0_i32_0 : i32, i32
  }
  func.func @transform_2(%arg0: i32, %arg1: i32) -> (i32, i32) {
    %c0_i32 = arith.constant 0 : i32
    %c0_i32_0 = arith.constant 0 : i32
    %c0_i32_1 = arith.constant 0 : i32
    return %c0_i32, %c0_i32_0 : i32, i32
  }
  func.func @transform_3(%arg0: i32, %arg1: i32) -> (i32, i32) {
    %c0_i32 = arith.constant 0 : i32
    %c0_i32_0 = arith.constant 0 : i32
    %c0_i32_1 = arith.constant 0 : i32
    return %c0_i32, %c0_i32_0 : i32, i32
  }
  func.func @transform_4(%arg0: i32, %arg1: i32) -> (i32, i32) {
    %c0_i32 = arith.constant 0 : i32
    %c0_i32_0 = arith.constant 0 : i32
    %c0_i32_1 = arith.constant 0 : i32
    return %c0_i32, %c0_i32_0 : i32, i32
  }
  func.func @transform_5(%arg0: i32, %arg1: i32) -> (i32, i32) {
    %c0_i32 = arith.constant 0 : i32
    %c0_i32_0 = arith.constant 0 : i32
    %c0_i32_1 = arith.constant 0 : i32
    return %c0_i32, %c0_i32_0 : i32, i32
  }
  func.func @transform_6(%arg0: i32, %arg1: i32) -> (i32, i32) {
    %c0_i32 = arith.constant 0 : i32
    %c0_i32_0 = arith.constant 0 : i32
    %c0_i32_1 = arith.constant 0 : i32
    return %c0_i32, %c0_i32_0 : i32, i32
  }
  func.func @transform_7(%arg0: i32, %arg1: i32) -> (i32, i32) {
    %c0_i32 = arith.constant 0 : i32
    %c0_i32_0 = arith.constant 0 : i32
    %c0_i32_1 = arith.constant 0 : i32
    return %c0_i32, %c0_i32_0 : i32, i32
  }
  func.func @transform_8(%arg0: i32, %arg1: i32) -> (i32, i32) {
    %c0_i32 = arith.constant 0 : i32
    %c0_i32_0 = arith.constant 0 : i32
    %c0_i32_1 = arith.constant 0 : i32
    return %c0_i32, %c0_i32_0 : i32, i32
  }
  func.func @transform_9(%arg0: i32, %arg1: i32) -> (i32, i32) {
    %c0_i32 = arith.constant 0 : i32
    %c0_i32_0 = arith.constant 0 : i32
    %c0_i32_1 = arith.constant 0 : i32
    return %c0_i32, %c0_i32_0 : i32, i32
  }
  func.func @transform_10(%arg0: i32, %arg1: i32) -> (i32, i32) {
    %c0_i32 = arith.constant 0 : i32
    %c0_i32_0 = arith.constant 0 : i32
    %c0_i32_1 = arith.constant 0 : i32
    return %c0_i32, %c0_i32_0 : i32, i32
  }
  func.func @transform_11(%arg0: i32, %arg1: i32) -> (i32, i32) {
    %c0_i32 = arith.constant 0 : i32
    %c0_i32_0 = arith.constant 0 : i32
    %c0_i32_1 = arith.constant 0 : i32
    return %c0_i32, %c0_i32_0 : i32, i32
  }
  func.func @transform_12(%arg0: i32, %arg1: i32) -> (i32, i32) {
    %c0_i32 = arith.constant 0 : i32
    %c0_i32_0 = arith.constant 0 : i32
    %c0_i32_1 = arith.constant 0 : i32
    return %c0_i32, %c0_i32_0 : i32, i32
  }
  func.func @transform_13(%arg0: i32, %arg1: i32) -> (i32, i32, i32) {
    %c0_i32 = arith.constant 0 : i32
    %c0_i32_0 = arith.constant 0 : i32
    %c0_i32_1 = arith.constant 0 : i32
    return %arg0, %c0_i32, %c0_i32_0 : i32, i32, i32
  }
}

</mosaic_0001>

<bundles_post_ra>
// kernel: stnkd_forward.1
= control target key start
LH: loop header
LB: loop body
LE: loop exit
PB: predicated region body
PF: predicated region fallthrough
CT: control target
= control target key end

     0   :  { %s6948_s0 = inlined_call_operand.vmem [shape: f32[2,8,384], index: 0, kind: input, shape index: {}]   ;;  %s6949_s1 = inlined_call_operand.vmem [shape: f32[8,64], index: 1, kind: input, shape index: {}]   ;;  %s6950_s2 = inlined_call_operand.vmem [shape: f32[1,64], index: 2, kind: input, shape index: {}]   ;;  %s6951_s3 = inlined_call_operand.vmem [shape: bf16[64,128], index: 3, kind: input, shape index: {}]   ;;  %s6952_s4 = inlined_call_operand.vmem [shape: f32[1,128], index: 4, kind: input, shape index: {}]   ;;  %s6953_s5 = inlined_call_operand.hbm [shape: bf16[128,1024], index: 5, kind: input, shape index: {}]   ;;  %s6954_s6 = inlined_call_operand.vmem [shape: f32[1,1024], index: 6, kind: input, shape index: {}]   ;;  %s6955_s7 = inlined_call_operand.hbm [shape: bf16[1024,512], index: 7, kind: input, shape index: {}]   ;;  %s6956_s8 = inlined_call_operand.vmem [shape: f32[1,512], index: 8, kind: input, shape index: {}]   ;;  %s6957_s9 = inlined_call_operand.hbm [shape: bf16[512,256], index: 9, kind: input, shape index: {}]   ;;  %s6958_s10 = inlined_call_operand.vmem [shape: f32[1,256], index: 10, kind: input, shape index: {}]   ;;  %s6959_s11 = inlined_call_operand.vmem [shape: bf16[256,9], index: 11, kind: input, shape index: {}]   ;;  %s6960_s12 = inlined_call_operand.vmem [shape: f32[1,9], index: 12, kind: input, shape index: {}]   ;;  %s6961_s13 = inlined_call_operand.vmem [shape: f32[2,1,9], index: 13, kind: output, shape index: {}]  }
   0x1   :  { %6967 = sst [smem:[#allocation11_spill]] %s6954_s6 }
   0x2   :  { %6968 = sst [smem:[#allocation12_spill]] %s6955_s7 }
   0x3   :  { %6969 = sst [smem:[#allocation13_spill]] %s6956_s8 }
   0x4   :  { %6970 = sst [smem:[#allocation14_spill]] %s6958_s10 }
   0x5   :  { %6971 = sst [smem:[#allocation15_spill]] %s6959_s11 }
   0x6   :  { %6972 = sst [smem:[#allocation16_spill]] %s6960_s12 }
   0x7   :  { %18 = vsyncpa [#allocation4], 0 }
   0x8   :  { %19 = vsyncpa [#allocation6], 0  ;;  %s6325_s25 = smov 0   ;;  %s6327_s26 = smov 0  }
   0x9   :  { %s6329_s27 = smov 0   ;;  %s6331_s28 = smov 0  }
   0xa   :  { %s6333_s29 = smov 0  }
   0xb LB: > { %6973 = sst [smem:[#allocation10_spill]] %s6241_s29  ;;  %s6243_s30 = smov [#allocation5]   ;;  %s6241_s29 = sphi %s6333_s29, %s25_s29   ;;  %s6237_s28 = sphi %s6331_s28, %s6991_s28   ;;  %s6233_s27 = sphi %s6329_s27, %s6990_s27   ;;  %s6229_s26 = sphi %s6327_s26, %s6989_s26   ;;  %s6225_s25 = sphi %s6325_s25, %s6988_s25  }
   0xc   : > { %s388_s14 = sshll.u32 %s6243_s30, 4  ;;  %s4948_s15 = sadd.s32 4294967295, %s6241_s29   ;;  %s389_s14 = int_to_ptr.vmem [resolvable:$true] %s388_s14 }
   0xd   : > { %p4950_p0 = scmp.ge.s32.totalorder %s6241_s29, 1  ;;  %p348_p1 = scmp.lt.s32.totalorder %s6241_s29, 7 }
   0xe   : > { %p6353_p2 = scmp.eq.s32.totalorder %s4948_s15, 0  ;;  %s6977_s7 = sld [smem:[#allocation12_spill]] }
   0xf   : > { %p6357_p3 = pnand %p4950_p0, %p348_p1 }
  0x10   : > { %s6974_s16 = scalar_select %p6353_p2, 1, 0 }
  0x11   : > { %s6975_s17 = scalar_select %p6357_p3, 1, 0 }
  0x12   : > { %p5541_p4 = pneg %p6357_p3 }
  0x14   : > { %p6365_p5 = pnand %p6353_p2, %p5541_p4  ;;  %s6111_s21 = scalar_lea.hbm %s6977_s7, 32768 }
  0x15   : > { %p6112_p6 = scmp.ne.s32.totalorder %s6977_s7, %s6111_s21  ;;  %p6118_p10 = scmp.lt.u32.totalorder %s6111_s21, %s6977_s7 }
  0x16   : > { %p6377_p7 = pneg %p6365_p5 }
  0x18   : > { %p6114_p8 = pnand %p6377_p7, %p6112_p6 }
  0x1a   : > { %p6115_p9 = pneg %p6114_p8 }
  0x1c   : > { %p6120_p11 = pnand %p6118_p10, %p6115_p9 }
  0x1e   : > { %6123 = shalt.err (!%p6120_p11)
}
  0x1f   : > { %s6124_s19 = scalar_lea.vmem %s389_s14, 32768  ;;  %p6132_p1 = scmp.lt.s32.totalorder %s389_s14, %s389_s14 }
  0x20   : > { %p6125_p12 = scmp.ne.s32.totalorder %s389_s14, %s6124_s19  ;;  %p6133_p4 = scmp.lt.s32.totalorder %s6124_s19, %s6124_s19 }
  0x22   : > { %p6127_p13 = pnand %p6125_p12, %p6377_p7  ;;  %p6134_p2 = por %p6133_p4, %p6132_p1 }
  0x24   : > { %p6128_p0 = pneg %p6127_p13 }
  0x26   : > { %p6135_p3 = pnand %p6134_p2, %p6128_p0 }
  0x28   : > { %6138 = shalt.err (!%p6135_p3)
}
  0x29   : > { %s6244_s20 = smov 256   ;;  %s6245_s21 = smov 16  }
  0x2a   : > { %5547 = dma.hbm_to_vmem [thread:$0]  (!%p6365_p5), %s6977_s7, 32768, %s389_s14, [#allocation6], %s6244_s20, %s6244_s20, %s6245_s21  }
  0x2b   : > { %s34_s30 = sadd.s32 1, %s6233_s27  ;;  %s37_s15 = sadd.s32 1, %s6237_s28 }
  0x2c   : > { %p35_p6 = scmp.ge.s32.totalorder %s34_s30, 3  ;;  %s6246_s29 = smov [#allocation3]  }
  0x2d   : > { %s372_s19 = sshll.u32 %s6246_s29, 4  ;;  %s6139_s11 = scalar_lea.hbm %s6953_s5, 8192  ;;  %s373_s19 = int_to_ptr.vmem [resolvable:$true] %s372_s19 }
  0x2e   : > { %s6993_s30 = smov (%p35_p6, %s34_s30), 0  ;;  %s6995_s15 = smov (!%p35_p6, %s37_s15), %s6237_s28 }
  0x2f   : > { %p6140_p3 = scmp.ne.s32.totalorder %s6953_s5, %s6139_s11  ;;  %p6146_p10 = scmp.lt.u32.totalorder %s6139_s11, %s6953_s5 }
  0x31   : > { %p6142_p8 = pnand %p6140_p3, %p6377_p7 }
  0x33   : > { %p6143_p9 = pneg %p6142_p8 }
  0x35   : > { %p6148_p11 = pnand %p6146_p10, %p6143_p9 }
  0x37   : > { %6151 = shalt.err (!%p6148_p11)
}
  0x38   : > { %s6152_s29 = scalar_lea.vmem %s373_s19, 8192  ;;  %p6160_p1 = scmp.lt.s32.totalorder %s373_s19, %s373_s19 }
  0x39   : > { %p6153_p12 = scmp.ne.s32.totalorder %s373_s19, %s6152_s29  ;;  %p6161_p4 = scmp.lt.s32.totalorder %s6152_s29, %s6152_s29 }
  0x3b   : > { %p6155_p13 = pnand %p6153_p12, %p6377_p7  ;;  %p6162_p6 = por %p6161_p4, %p6160_p1 }
  0x3d   : > { %p6156_p0 = pneg %p6155_p13 }
  0x3f   : > { %p6163_p2 = pnand %p6162_p6, %p6156_p0 }
  0x41   : > { %6166 = shalt.err (!%p6163_p2)
}
  0x42   : > { %s6247_s6 = smov 512   ;;  %s6248_s8 = smov 32  }
  0x43   : > { %5544 = dma.hbm_to_vmem [thread:$0]  (!%p6365_p5), %s6953_s5, 8192, %s373_s19, [#allocation4], %s6247_s6, %s6247_s6, %s6248_s8  }
  0x44   : > { %p6979_p3 = scmp.ge.s32.totalorder %s6995_s15, 2  ;;  %s6249_s12 = smov [#allocation7]  }
  0x45   : > { %s404_s21 = sshll.u32 %s6249_s12, 4  ;;  %s6167_s14 = scalar_lea.hbm %s6957_s9, 8192  ;;  %s405_s21 = int_to_ptr.vmem [resolvable:$true] %s404_s21 }
  0x46   : > { %s6997_s15 = smov (%p6979_p3, %s6995_s15), 0  ;;  %p6168_p2 = scmp.ne.s32.totalorder %s6957_s9, %s6167_s14 }
  0x47   : > { %p6174_p10 = scmp.lt.u32.totalorder %s6167_s14, %s6957_s9 }
  0x48   : > { %p6170_p8 = pnand %p6168_p2, %p6377_p7 }
  0x4a   : > { %p6171_p9 = pneg %p6170_p8 }
  0x4c   : > { %p6176_p11 = pnand %p6174_p10, %p6171_p9 }
  0x4e   : > { %6179 = shalt.err (!%p6176_p11)
}
  0x4f   : > { %s6180_s19 = scalar_lea.vmem %s405_s21, 8192  ;;  %p6188_p1 = scmp.lt.s32.totalorder %s405_s21, %s405_s21 }
  0x50   : > { %p6181_p12 = scmp.ne.s32.totalorder %s405_s21, %s6180_s19  ;;  %p6189_p4 = scmp.lt.s32.totalorder %s6180_s19, %s6180_s19 }
  0x52   : > { %p6183_p13 = pnand %p6181_p12, %p6377_p7  ;;  %p6190_p6 = por %p6189_p4, %p6188_p1 }
  0x54   : > { %p6184_p0 = pneg %p6183_p13 }
  0x56   : > { %p6191_p3 = pnand %p6190_p6, %p6184_p0 }
  0x58   : > { %6194 = shalt.err (!%p6191_p3)
}
  0x59   : > { %s6250_s6 = smov 128   ;;  %s6251_s8 = smov 8  }
  0x5a   : > { %5550 = dma.hbm_to_vmem [thread:$0]  (!%p6365_p5), %s6957_s9, 8192, %s405_s21, [#allocation6], %s6250_s6, %s6250_s6, %s6251_s8  }
  0x5b   : > { %p6980_p2 = scmp.ne.s32.totalorder %s6975_s17, 0 }
  0x5c   : > { %p6981_p8 = scmp.ne.s32.totalorder (!%p6980_p2), %s6974_s16, 0 }
  0x5d   : > { %440 = sbr.rel (%p6980_p2) target bundleno = 2057 (0x809), region = 72 }
  0x64   : > { %6216 = dma.done.wait (%p6981_p8), [#allocation4], 8192  }
  0x65   : > { %6218 = vsyncadd (%p6981_p8), [#allocation4], 4294959104 }
  0x66   : > { %6220 = dma.done.wait (%p6981_p8), [#allocation6], 40960  }
  0x67   : > { %6222 = vsyncadd (%p6981_p8), [#allocation6], 4294926336  ;;  %p493_p5 = scmp.lt.s32.totalorder %s6229_s26, 1  ;;  %p495_p7 = scmp.lt.s32.totalorder %s6225_s25, 2  ;;  %v506_v1 = vld [vmem:[%s6949_s1] sm:$0xff]  ;;  %vm546_vm0 = vcmask 64512  }
  0x68   : > { %5446 = vmatprep.subr.mxu0 %v506_v1  ;;  %v5610_v18 = vld [vmem:[%s6951_s3] sm:$0xff]   ;;  %v5611_v19 = vld [vmem:[%s6951_s3 + $0x8] sm:$0xff]   ;;  %v5612_v20 = vld [vmem:[%s6951_s3 + $0x10] sm:$0xff]   ;;  %vm803_vm1 = vcmask 523264   ;;  %s6982_s29 = sld [smem:[#allocation11_spill]]  ;;  %p5054_p9 = scmp.ne.s32.totalorder %s6225_s25, 0 }
  0x69   : > { %s6999_s26 = smov (!%p493_p5, %s6229_s26), 1  ;;  %5447 = vmatpush3.msra.mxu0 %v506_v1  ;;  %5472 = vmatprep.subr.bf16.mxu1 %v5610_v18  ;;  %v5613_v21 = vld [vmem:[%s6951_s3 + $0x18] sm:$0xff]   ;;  %v949_v22 = vld [vmem:[#allocation3] sm:$0xff]  ;;  %v6492_v24 = vld [vmem:[#allocation3 + $0x8] sm:$0xff] }
  0x6a   : > { %s496_s17 = scalar_select %p495_p7, %s6225_s25, 2  ;;  %5473 = vmatpush3.bf16.msra.mxu1 %v5610_v18  ;;  %v953_v23 = vld [vmem:[#allocation3 + $0x20] sm:$0xff]  ;;  %v954_v27 = vld [vmem:[#allocation3 + $0x28] sm:$0xff]  ;;  %v6499_v50 = vld [vmem:[%s6950_s2] ss:$0 sm:$0xff] }
  0x6b   : > { %s5528_s18 = smul.u32 3, %s6999_s26  ;;  %s503_s21 = scalar_lea.vmem %s6961_s13, %s6999_s26  ;;  %5474 = vmatprep.subr.bf16.mxu1 %v5611_v19  ;;  %v4990_v25 = vcombine.low %v949_v22, %v953_v23  ;;  %v4991_v26 = vcombine.high %v949_v22, %v953_v23  ;;  %v957_v28 = vld [vmem:[#allocation3 + $0x40] sm:$0xff]  ;;  %v4992_v30 = vcombine.low %v6492_v24, %v954_v27  ;;  %v4993_v31 = vcombine.high %v6492_v24, %v954_v27  ;;  %v958_v63 = vld [vmem:[#allocation3 + $0x48] sm:$0xff] }
  0x6c   : > { %v961_v29 = vld [vmem:[#allocation3 + $0x60] sm:$0xff] }
  0x6d   : > { %s498_s22 = sadd.s32 %s5528_s18, %s496_s17  ;;  %v4999_v32 = vcombine.high %v957_v28, %v961_v29  ;;  %v965_v33 = vld [vmem:[#allocation3 + $0x80] sm:$0xff]  ;;  %1375 = vmatprep.subr.bf16.mxu0 %v4991_v26  ;;  %v4998_v35 = vcombine.low %v957_v28, %v961_v29  ;;  %v990_v28 = vld [vmem:[#allocation3 + $0x148] sm:$0xff] }
  0x6e   : > { %s4959_s23 = sshll.u32 %s498_s22, 3  ;;  %5475 = vmatpush3.bf16.msra.mxu1 %v5611_v19  ;;  %v969_v34 = vld [vmem:[#allocation3 + $0xa0] sm:$0xff]  ;;  %v982_v19 = vld [vmem:[#allocation3 + $0x108] sm:$0xff] }
  0x6f   : > { %s500_s20 = scalar_lea.vmem %s6948_s0, %s4959_s23  ;;  %5476 = vmatprep.subr.bf16.mxu1 %v5612_v20  ;;  %v5007_v36 = vcombine.high %v965_v33, %v969_v34  ;;  %v973_v37 = vld [vmem:[#allocation3 + $0xc0] sm:$0xff]  ;;  %v5006_v39 = vcombine.low %v965_v33, %v969_v34  ;;  %v994_v29 = vld [vmem:[#allocation3 + $0x168] sm:$0xff] }
  0x70   : > { %v505_v0 = vld [vmem:[%s500_s20] sm:$0xff]  ;;  %v977_v38 = vld [vmem:[#allocation3 + $0xe0] sm:$0xff]  ;;  %v5033_v33 = vcombine.high %v990_v28, %v994_v29 }
  0x71   : > { %514 = vxpose.xlu0.b32.start.end [1/1] (short) %v505_v0, 128  ;;  %v5015_v40 = vcombine.high %v973_v37, %v977_v38  ;;  %v981_v41 = vld [vmem:[#allocation3 + $0x100] sm:$0xff]  ;;  %v5014_v43 = vcombine.low %v973_v37, %v977_v38  ;;  %v962_v0 = vld [vmem:[#allocation3 + $0x68] sm:$0xff]  ;;  %v5032_v37 = vcombine.low %v990_v28, %v994_v29 }
  0x72   : > { %5477 = vmatpush3.bf16.msra.mxu1 %v5612_v20  ;;  %v985_v42 = vld [vmem:[#allocation3 + $0x120] sm:$0xff]  ;;  %v986_v20 = vld [vmem:[#allocation3 + $0x128] sm:$0xff] }
  0x73   : > { %5478 = vmatprep.subr.bf16.mxu1 %v5613_v21  ;;  %v5023_v44 = vcombine.high %v981_v41, %v985_v42  ;;  %v989_v45 = vld [vmem:[#allocation3 + $0x140] sm:$0xff]  ;;  %v5022_v47 = vcombine.low %v981_v41, %v985_v42  ;;  %v5025_v26 = vcombine.high %v982_v19, %v986_v20 }
  0x74   : > { %v993_v46 = vld [vmem:[#allocation3 + $0x160] sm:$0xff] }
  0x75   : > { %v5031_v48 = vcombine.high %v989_v45, %v993_v46  ;;  %v5030_v49 = vcombine.low %v989_v45, %v993_v46 }
  0x76   : > { %5479 = vmatpush3.bf16.msra.mxu1 %v5613_v21 }
  0x77   : > { %1488 = vmatprep.subr.bf16.mxu1 %v4993_v31  ;;  %v5024_v31 = vcombine.low %v982_v19, %v986_v20 }
  0xf1   : > { %v530_v2 = vpop.trf.xlu0 }
  0xf2   : > { %5448 = vmatprep.mubr.msk.f32.mxu0 %vm546_vm0, %v530_v2 }
  0xf5   : > { %v531_v3 = vpop.trf.xlu0 }
  0xf6   : > { %5449 = vmatmul.mubr.msk.f32.vlgmr.msra.gmra.mrb[0].mxu0 %vm546_vm0, %v531_v3  ;;  %v5001_v3 = vcombine.high %v958_v63, %v962_v0 }
  0xf7   : > { %1376 = vmatpush1.bf16.msra.mxu0 %v4990_v25 }
  0xf8   : > { %1377 = vmatprep.subr.bf16.mxu0 %v4999_v32 }
  0xf9   : > { %v532_v4 = vpop.trf.xlu0 }
  0xfa   : > { %5451 = vmatprep.mubr.msk.f32.mxu0 %vm546_vm0, %v532_v4  ;;  %v966_v4 = vld [vmem:[#allocation3 + $0x88] sm:$0xff] }
  0xfb   : > { %1378 = vmatpush1.bf16.msra.mxu0 %v4998_v35 }
  0xfc   : > { %1379 = vmatprep.subr.bf16.mxu0 %v5007_v36 }
  0xfd   : > { %v533_v5 = vpop.trf.xlu0 }
  0xfe   : > { %5452 = vmatmul.mubr.msk.f32.gmra.mrb[2].mxu0 %vm546_vm0, %v533_v5  ;;  %v970_v5 = vld [vmem:[#allocation3 + $0xa8] sm:$0xff] }
  0xff   : > { %1380 = vmatpush1.bf16.msra.mxu0 %v5006_v39 }
 0x100   : > { %1381 = vmatprep.subr.bf16.mxu0 %v5015_v40 }
 0x101   : > { %v534_v6 = vpop.trf.xlu0 }
 0x102   : > { %5454 = vmatprep.mubr.msk.f32.mxu0 %vm546_vm0, %v534_v6 }
 0x103   : > { %1382 = vmatpush1.bf16.msra.mxu0 %v5014_v43 }
 0x104   : > { %1383 = vmatprep.subr.bf16.mxu0 %v5023_v44 }
 0x105   : > { %v535_v7 = vpop.trf.xlu0 }
 0x106   : > { %5455 = vmatmul.mubr.msk.f32.gmra.mrb[4].mxu0 %vm546_vm0, %v535_v7 }
 0x107   : > { %1384 = vmatpush1.bf16.msra.mxu0 %v5022_v47 }
 0x108   : > { %1385 = vmatprep.subr.bf16.mxu0 %v5031_v48 }
 0x109   : > { %v536_v8 = vpop.trf.xlu0 }
 0x10a   : > { %5457 = vmatprep.mubr.msk.f32.mxu0 %vm546_vm0, %v536_v8 }
 0x10b   : > { %1386 = vmatpush1.bf16.msra.mxu0 %v5030_v49 }
 0x10d   : > { %v537_v9 = vpop.trf.xlu0 }
 0x10e   : > { %5458 = vmatmul.mubr.msk.f32.gmra.mrb[6].mxu0 %vm546_vm0, %v537_v9  ;;  %v5000_v9 = vcombine.low %v958_v63, %v962_v0  ;;  %v997_v0 = vld [vmem:[#allocation3 + $0x180] sm:$0xff] }
 0x111   : > { %v538_v10 = vpop.trf.xlu0 }
 0x112   : > { %5460 = vmatprep.mubr.msk.f32.mxu0 %vm546_vm0, %v538_v10 }
 0x115   : > { %v539_v11 = vpop.trf.xlu0 }
 0x116   : > { %5461 = vmatmul.mubr.msk.f32.gmra.mrb[8].mxu0 %vm546_vm0, %v539_v11  ;;  %v5009_v11 = vcombine.high %v966_v4, %v970_v5 }
 0x119   : > { %v540_v12 = vpop.trf.xlu0 }
 0x11a   : > { %5463 = vmatprep.mubr.msk.f32.mxu0 %vm546_vm0, %v540_v12 }
 0x11d   : > { %v541_v13 = vpop.trf.xlu0 }
 0x11e   : > { %5464 = vmatmul.mubr.msk.f32.gmra.mrb[10].mxu0 %vm546_vm0, %v541_v13  ;;  %v974_v13 = vld [vmem:[#allocation3 + $0xc8] sm:$0xff] }
 0x121   : > { %v542_v14 = vpop.trf.xlu0 }
 0x122   : > { %5466 = vmatprep.mubr.msk.f32.mxu0 %vm546_vm0, %v542_v14  ;;  %v978_v14 = vld [vmem:[#allocation3 + $0xe8] sm:$0xff] }
 0x123   : > { %v5017_v18 = vcombine.high %v974_v13, %v978_v14  ;;  %v5016_v24 = vcombine.low %v974_v13, %v978_v14 }
 0x125   : > { %v543_v15 = vpop.trf.xlu0 }
 0x126   : > { %5467 = vmatmul.mubr.msk.f32.gmra.mrb[12].mxu0 %vm546_vm0, %v543_v15 }
 0x129   : > { %v544_v16 = vpop.trf.xlu0 }
 0x12a   : > { %5469 = vmatprep.mubr.msk.f32.mxu0 %vm546_vm0, %v544_v16  ;;  %v5008_v16 = vcombine.low %v966_v4, %v970_v5  ;;  %v1002_v4 = vld [vmem:[#allocation3 + $0x1a8] sm:$0xff] }
 0x12d   : > { %v545_v17 = vpop.trf.xlu0 }
 0x12e   : > { %5470 = vmatmul.mubr.msk.f32.gmra.mrb[14].mxu0 %vm546_vm0, %v545_v17 }
 0x1c9   : > { %v5450_v51 = vpop.f32.mrb[0].mxu0 }
 0x1ca   : > { %v667_v52 = vadd.f32 %v5450_v51, %v6499_v50  ;;  %v661_v53 = vpop.f32.mrb[1].mxu0 }
 0x1cb   : > { %v662_v54 = vadd.f32 %v6499_v50, %v661_v53 }
 0x1cc   : > { %v741_v55 = vmax.f32 %v667_v52, 0.0 }
 0x1cd   : > { %v740_v56 = vmax.f32 %v662_v54, 0.0 }
 0x1cf   : > { %v756_v57 = vpack.c.bf16 %v741_v55, %v740_v56 }
 0x1d1   : > { %v5453_v58 = vpop.f32.mrb[2].mxu0  ;;  %5480 = vmatprep.mubr.msk.bf16.mxu1 %vm803_vm1, %v756_v57 }
 0x1d2   : > { %v677_v59 = vadd.f32 %v5453_v58, %v6499_v50  ;;  %v671_v60 = vpop.f32.mrb[3].mxu0 }
 0x1d3   : > { %v672_v61 = vadd.f32 %v6499_v50, %v671_v60 }
 0x1d4   : > { %v743_v62 = vmax.f32 %v677_v59, 0.0 }
 0x1d5   : > { %v742_v1 = vmax.f32 %v672_v61, 0.0 }
 0x1d7   : > { %v757_v2 = vpack.c.bf16 %v743_v62, %v742_v1  ;;  %v1001_v1 = vld [vmem:[#allocation3 + $0x1a0] sm:$0xff] }
 0x1d8   : > { %v5038_v5 = vcombine.low %v997_v0, %v1001_v1 }
 0x1d9   : > { %v5456_v6 = vpop.f32.mrb[4].mxu0  ;;  %5481 = vmatmul.mubr.msk.bf16.vlgmr.msra.gmra.mrb[0].mxu1 %vm803_vm1, %v757_v2  ;;  %v998_v2 = vld [vmem:[#allocation3 + $0x188] sm:$0xff] }
 0x1da   : > { %v687_v7 = vadd.f32 %v5456_v6, %v6499_v50  ;;  %v681_v8 = vpop.f32.mrb[5].mxu0  ;;  %1489 = vmatpush1.bf16.msra.mxu1 %v4992_v30  ;;  %v5040_v6 = vcombine.low %v998_v2, %v1002_v4 }
 0x1db   : > { %v682_v10 = vadd.f32 %v6499_v50, %v681_v8  ;;  %1490 = vmatprep.subr.bf16.mxu1 %v5001_v3  ;;  %v5039_v3 = vcombine.high %v997_v0, %v1001_v1  ;;  %v1005_v8 = vld [vmem:[#allocation3 + $0x1c0] sm:$0xff]  ;;  %v983_v1 = vld [vmem:[#allocation3 + $0x110] sm:$0xff] }
 0x1dc   : > { %v745_v12 = vmax.f32 %v687_v7, 0.0  ;;  %v5041_v7 = vcombine.high %v998_v2, %v1002_v4  ;;  %v987_v4 = vld [vmem:[#allocation3 + $0x130] sm:$0xff] }
 0x1dd   : > { %v744_v15 = vmax.f32 %v682_v10, 0.0  ;;  %1387 = vmatprep.subr.bf16.mxu0 %v5039_v3  ;;  %v1006_v10 = vld [vmem:[#allocation3 + $0x1c8] sm:$0xff] }
 0x1de   : > { %1491 = vmatpush1.bf16.msra.mxu1 %v5000_v9  ;;  %1388 = vmatpush1.bf16.msra.mxu0 %v5038_v5  ;;  %v1009_v9 = vld [vmem:[#allocation3 + $0x1e0] sm:$0xff]  ;;  %v984_v5 = vld [vmem:[#allocation3 + $0x118] sm:$0xff] }
 0x1df   : > { %v758_v17 = vpack.c.bf16 %v745_v12, %v744_v15  ;;  %1492 = vmatprep.subr.bf16.mxu1 %v5009_v11  ;;  %v1010_v11 = vld [vmem:[#allocation3 + $0x1e8] sm:$0xff]  ;;  %v5046_v12 = vcombine.low %v1005_v8, %v1009_v9  ;;  %v951_v15 = vld [vmem:[#allocation3 + $0x10] sm:$0xff] }
 0x1e0   : > { %v5048_v13 = vcombine.low %v1006_v10, %v1010_v11  ;;  %v5049_v14 = vcombine.high %v1006_v10, %v1010_v11 }
 0x1e1   : > { %v5459_v21 = vpop.f32.mrb[6].mxu0  ;;  %5484 = vmatprep.mubr.msk.bf16.mxu1 %vm803_vm1, %v758_v17  ;;  %v952_v17 = vld [vmem:[#allocation3 + $0x18] sm:$0xff] }
 0x1e2   : > { %v697_v22 = vadd.f32 %v5459_v21, %v6499_v50  ;;  %v691_v23 = vpop.f32.mrb[7].mxu0  ;;  %1493 = vmatpush1.bf16.msra.mxu1 %v5008_v16  ;;  %v955_v16 = vld [vmem:[#allocation3 + $0x30] sm:$0xff]  ;;  %v956_v21 = vld [vmem:[#allocation3 + $0x38] sm:$0xff] }
 0x1e3   : > { %v692_v25 = vadd.f32 %v6499_v50, %v691_v23  ;;  %1494 = vmatprep.subr.bf16.mxu1 %v5017_v18  ;;  %v6252_v18 = vmov 0   ;;  %v4994_v19 = vcombine.low %v951_v15, %v955_v16  ;;  %v4995_v20 = vcombine.high %v951_v15, %v955_v16  ;;  %v991_v15 = vld [vmem:[#allocation3 + $0x150] sm:$0xff] }
 0x1e4   : > { %v747_v27 = vmax.f32 %v697_v22, 0.0  ;;  %1407 = vmatprep.mubr.bf16.mxu0 %v6252_v18  ;;  %v4996_v22 = vcombine.low %v952_v17, %v956_v21  ;;  %v4997_v23 = vcombine.high %v952_v17, %v956_v21  ;;  %v996_v21 = vld [vmem:[#allocation3 + $0x178] sm:$0xff] }
 0x1e5   : > { %v746_v30 = vmax.f32 %v692_v25, 0.0 }
 0x1e6   : > { %1495 = vmatpush1.bf16.msra.mxu1 %v5016_v24  ;;  %v6530_v24 = vld [vmem:[%s6952_s4] ss:$0 sm:$0xff] }
 0x1e7   : > { %v759_v32 = vpack.c.bf16 %v747_v27, %v746_v30  ;;  %1496 = vmatprep.subr.bf16.mxu1 %v5025_v26 }
 0x1e9   : > { %v5462_v34 = vpop.f32.mrb[8].mxu0  ;;  %5485 = vmatmul.mubr.msk.bf16.gmra.mrb[4].mxu1 %vm803_vm1, %v759_v32 }
 0x1ea   : > { %v707_v35 = vadd.f32 %v5462_v34, %v6499_v50  ;;  %v701_v36 = vpop.f32.mrb[9].mxu0  ;;  %1497 = vmatpush1.bf16.msra.mxu1 %v5024_v31 }
 0x1eb   : > { %v702_v38 = vadd.f32 %v6499_v50, %v701_v36  ;;  %1498 = vmatprep.subr.bf16.mxu1 %v5033_v33 }
 0x1ec   : > { %v749_v39 = vmax.f32 %v707_v35, 0.0  ;;  %v959_v35 = vld [vmem:[#allocation3 + $0x50] sm:$0xff] }
 0x1ed   : > { %v748_v40 = vmax.f32 %v702_v38, 0.0  ;;  %v963_v38 = vld [vmem:[#allocation3 + $0x70] sm:$0xff] }
 0x1ee   : > { %1499 = vmatpush1.bf16.msra.mxu1 %v5032_v37 }
 0x1ef   : > { %v760_v41 = vpack.c.bf16 %v749_v39, %v748_v40  ;;  %1500 = vmatprep.subr.bf16.mxu1 %v5041_v7  ;;  %v960_v39 = vld [vmem:[#allocation3 + $0x58] sm:$0xff] }
 0x1f0   : > { %v964_v40 = vld [vmem:[#allocation3 + $0x78] sm:$0xff] }
 0x1f1   : > { %v5465_v42 = vpop.f32.mrb[10].mxu0  ;;  %5488 = vmatprep.mubr.msk.bf16.mxu1 %vm803_vm1, %v760_v41 }
 0x1f2   : > { %v717_v43 = vadd.f32 %v5465_v42, %v6499_v50  ;;  %v711_v44 = vpop.f32.mrb[11].mxu0  ;;  %1501 = vmatpush1.bf16.msra.mxu1 %v5040_v6  ;;  %v988_v6 = vld [vmem:[#allocation3 + $0x138] sm:$0xff] }
 0x1f3   : > { %v712_v45 = vadd.f32 %v6499_v50, %v711_v44  ;;  %1502 = vmatprep.subr.bf16.mxu1 %v5049_v14  ;;  %v5003_v44 = vcombine.high %v959_v35, %v963_v38  ;;  %v5029_v14 = vcombine.high %v984_v5, %v988_v6 }
 0x1f4   : > { %v751_v46 = vmax.f32 %v717_v43, 0.0  ;;  %v967_v43 = vld [vmem:[#allocation3 + $0x90] sm:$0xff] }
 0x1f5   : > { %v750_v47 = vmax.f32 %v712_v45, 0.0  ;;  %v5005_v45 = vcombine.high %v960_v39, %v964_v40 }
 0x1f6   : > { %1503 = vmatpush1.bf16.msra.mxu1 %v5048_v13  ;;  %v5027_v13 = vcombine.high %v983_v1, %v987_v4 }
 0x1f7   : > { %v761_v48 = vpack.c.bf16 %v751_v46, %v750_v47  ;;  %1714 = vmatprep.subr.bf16.mxu1 %v4997_v23  ;;  %v971_v46 = vld [vmem:[#allocation3 + $0xb0] sm:$0xff]  ;;  %v968_v47 = vld [vmem:[#allocation3 + $0x98] sm:$0xff] }
 0x1f9   : > { %v5468_v49 = vpop.f32.mrb[12].mxu0  ;;  %5489 = vmatmul.mubr.msk.bf16.gmra.mrb[8].mxu1 %vm803_vm1, %v761_v48  ;;  %v972_v48 = vld [vmem:[#allocation3 + $0xb8] sm:$0xff] }
 0x1fa   : > { %v727_v51 = vadd.f32 %v5468_v49, %v6499_v50  ;;  %v721_v52 = vpop.f32.mrb[13].mxu0  ;;  %v5002_v49 = vcombine.low %v959_v35, %v963_v38  ;;  %v1011_v38 = vld [vmem:[#allocation3 + $0x1f0] sm:$0xff] }
 0x1fb   : > { %v722_v53 = vadd.f32 %v6499_v50, %v721_v52  ;;  %v5011_v52 = vcombine.high %v967_v43, %v971_v46 }
 0x1fc   : > { %v753_v54 = vmax.f32 %v727_v51, 0.0  ;;  %v5004_v51 = vcombine.low %v960_v39, %v964_v40  ;;  %v1008_v39 = vld [vmem:[#allocation3 + $0x1d8] sm:$0xff] }
 0x1fd   : > { %v752_v55 = vmax.f32 %v722_v53, 0.0  ;;  %v5013_v53 = vcombine.high %v968_v47, %v972_v48  ;;  %v1012_v40 = vld [vmem:[#allocation3 + $0x1f8] sm:$0xff] }
 0x1ff   : > { %v762_v56 = vpack.c.bf16 %v753_v54, %v752_v55  ;;  %v975_v54 = vld [vmem:[#allocation3 + $0xd0] sm:$0xff] }
 0x200   : > { %v979_v55 = vld [vmem:[#allocation3 + $0xf0] sm:$0xff] }
 0x201   : > { %v5471_v57 = vpop.f32.mrb[14].mxu0  ;;  %5492 = vmatprep.mubr.msk.bf16.mxu1 %vm803_vm1, %v762_v56  ;;  %v976_v56 = vld [vmem:[#allocation3 + $0xd8] sm:$0xff]  ;;  %v5018_v10 = vcombine.low %v975_v54, %v979_v55 }
 0x202   : > { %v737_v58 = vadd.f32 %v5471_v57, %v6499_v50  ;;  %v731_v59 = vpop.f32.mrb[15].mxu0  ;;  %v980_v57 = vld [vmem:[#allocation3 + $0xf8] sm:$0xff] }
 0x203   : > { %v732_v60 = vadd.f32 %v6499_v50, %v731_v59  ;;  %v5047_v50 = vcombine.high %v1005_v8, %v1009_v9  ;;  %v5010_v59 = vcombine.low %v967_v43, %v971_v46  ;;  %v5021_v0 = vcombine.high %v976_v56, %v980_v57 }
 0x204   : > { %v755_v61 = vmax.f32 %v737_v58, 0.0 }
 0x205   : > { %v754_v62 = vmax.f32 %v732_v60, 0.0  ;;  %1389 = vmatprep.subr.bf16.mxu0 %v5047_v50  ;;  %v5012_v60 = vcombine.low %v968_v47, %v972_v48  ;;  %v5020_v50 = vcombine.low %v976_v56, %v980_v57  ;;  %v5052_v57 = vcombine.low %v1008_v39, %v1012_v40 }
 0x206   : > { %1390 = vmatpush1.bf16.msra.mxu0 %v5046_v12 }
 0x207   : > { %v763_v63 = vpack.c.bf16 %v755_v61, %v754_v62  ;;  %1601 = vmatprep.subr.bf16.mxu0 %v4995_v20  ;;  %v992_v20 = vld [vmem:[#allocation3 + $0x158] sm:$0xff] }
 0x209   : > { %5493 = vmatmul.mubr.msk.bf16.gmra.mrb[12].mxu1 %vm803_vm1, %v763_v63  ;;  %v5019_v63 = vcombine.high %v975_v54, %v979_v55 }
 0x20a   : > { %1520 = vmatprep.mubr.bf16.mxu1 %v6252_v18 }
 0x2ac   : > { %v5482_v25 = vpop.f32.mrb[0].mxu1 }
 0x2ad   : > { %v871_v26 = vadd.f32 %v5482_v25, %v6530_v24  ;;  %v862_v27 = vpop.f32.mrb[1].mxu1  ;;  %v5026_v25 = vcombine.low %v983_v1, %v987_v4 }
 0x2ae   : > { %v863_v28 = vadd.f32 %v6530_v24, %v862_v27  ;;  %v5483_v29 = vpop.f32.mrb[2].mxu1 }
 0x2af   : > { %v874_v30 = vadd.f32 %v5483_v29, %v6530_v24  ;;  %v865_v31 = vpop.f32.mrb[3].mxu1  ;;  %v927_v33 = vmax.f32 %v871_v26, 0.0  ;;  %v5028_v26 = vcombine.low %v984_v5, %v988_v6  ;;  %v999_v29 = vld [vmem:[#allocation3 + $0x190] sm:$0xff] }
 0x2b0   : > { %v866_v32 = vadd.f32 %v6530_v24, %v865_v31  ;;  %v925_v36 = vmax.f32 %v863_v28, 0.0  ;;  %v5037_v28 = vcombine.high %v992_v20, %v996_v21  ;;  %v1000_v31 = vld [vmem:[#allocation3 + $0x198] sm:$0xff] }
 0x2b1   : > { %v928_v34 = vmax.f32 %v874_v30, 0.0  ;;  %v1003_v30 = vld [vmem:[#allocation3 + $0x1b0] sm:$0xff] }
 0x2b2   : > { %v926_v37 = vmax.f32 %v866_v32, 0.0  ;;  %v1004_v32 = vld [vmem:[#allocation3 + $0x1b8] sm:$0xff]  ;;  %v5043_v35 = vcombine.high %v999_v29, %v1003_v30 }
 0x2b3   : > { %v6536_v41 = vpack.c.bf16 %v928_v34, %v927_v33  ;;  %v5036_v34 = vcombine.low %v992_v20, %v996_v21 }
 0x2b4   : > { %v6538_v42 = vpack.c.bf16 %v926_v37, %v925_v36  ;;  %v5045_v36 = vcombine.high %v1000_v31, %v1004_v32  ;;  %v1007_v37 = vld [vmem:[#allocation3 + $0x1d0] sm:$0xff] }
 0x2b5   : > { %v5051_v48 = vcombine.high %v1007_v37, %v1011_v38  ;;  %v5050_v56 = vcombine.low %v1007_v37, %v1011_v38 }
 0x2b6   : > { %1408 = vmatmul.mubr.bf16.vlgmr.msra.gmra.mrb[16].mxu0 %v6538_v42  ;;  %1521 = vmatmul.mubr.bf16.vlgmr.msra.gmra.mrb[16].mxu1 %v6538_v42 }
 0x2b7   : > { %1602 = vmatpush1.bf16.msra.mxu0 %v4994_v19  ;;  %1715 = vmatpush1.bf16.msra.mxu1 %v4996_v22  ;;  %v995_v19 = vld [vmem:[#allocation3 + $0x170] sm:$0xff] }
 0x2b8   : > { %1417 = vmatprep.mubr.bf16.mxu0 %v6252_v18  ;;  %1530 = vmatprep.mubr.bf16.mxu1 %v6252_v18  ;;  %v5035_v27 = vcombine.high %v991_v15, %v995_v19  ;;  %v5034_v33 = vcombine.low %v991_v15, %v995_v19 }
 0x2b9   : > { %1603 = vmatprep.subr.bf16.mxu0 %v5003_v44  ;;  %1716 = vmatprep.subr.bf16.mxu1 %v5005_v45  ;;  %v5042_v44 = vcombine.low %v999_v29, %v1003_v30  ;;  %v5044_v45 = vcombine.low %v1000_v31, %v1004_v32 }
 0x2bb   : > { %1604 = vmatpush1.bf16.msra.mxu0 %v5002_v49  ;;  %1717 = vmatpush1.bf16.msra.mxu1 %v5004_v51  ;;  %v5053_v49 = vcombine.high %v1008_v39, %v1012_v40 }
 0x2bc   : > { %v5486_v58 = vpop.f32.mrb[4].mxu1  ;;  %1605 = vmatprep.subr.bf16.mxu0 %v5011_v52  ;;  %1718 = vmatprep.subr.bf16.mxu1 %v5013_v53 }
 0x2bd   : > { %v887_v61 = vadd.f32 %v5486_v58, %v6530_v24  ;;  %v878_v62 = vpop.f32.mrb[5].mxu1 }
 0x2be   : > { %v879_v2 = vadd.f32 %v6530_v24, %v878_v62  ;;  %v5487_v3 = vpop.f32.mrb[6].mxu1  ;;  %1418 = vmatmul.mubr.bf16.gmra.mrb[20].mxu0 %v6536_v41  ;;  %1531 = vmatmul.mubr.bf16.gmra.mrb[20].mxu1 %v6536_v41 }
 0x2bf   : > { %v890_v7 = vadd.f32 %v5487_v3, %v6530_v24  ;;  %v881_v8 = vpop.f32.mrb[7].mxu1  ;;  %1427 = vmatprep.mubr.bf16.mxu0 %v6252_v18  ;;  %1540 = vmatprep.mubr.bf16.mxu1 %v6252_v18  ;;  %v931_v11 = vmax.f32 %v887_v61, 0.0 }
 0x2c0   : > { %v882_v9 = vadd.f32 %v6530_v24, %v881_v8  ;;  %1606 = vmatpush1.bf16.msra.mxu0 %v5010_v59  ;;  %1719 = vmatpush1.bf16.msra.mxu1 %v5012_v60  ;;  %v929_v16 = vmax.f32 %v879_v2, 0.0 }
 0x2c1   : > { %v932_v12 = vmax.f32 %v890_v7, 0.0  ;;  %1607 = vmatprep.subr.bf16.mxu0 %v5019_v63  ;;  %1720 = vmatprep.subr.bf16.mxu1 %v5021_v0 }
 0x2c2   : > { %v930_v17 = vmax.f32 %v882_v9, 0.0 }
 0x2c3   : > { %v6552_v22 = vpack.c.bf16 %v932_v12, %v931_v11 }
 0x2c4   : > { %v6554_v23 = vpack.c.bf16 %v930_v17, %v929_v16  ;;  %1608 = vmatpush1.bf16.msra.mxu0 %v5018_v10  ;;  %1721 = vmatpush1.bf16.msra.mxu1 %v5020_v50 }
 0x2c5   : > { %1609 = vmatprep.subr.bf16.mxu0 %v5027_v13  ;;  %1722 = vmatprep.subr.bf16.mxu1 %v5029_v14  ;;  %v6613_v14 = vld [vmem:[%s6982_s29] sm:$0xff] }
 0x2c6   : > { %1428 = vmatmul.mubr.bf16.gmra.mrb[24].mxu0 %v6554_v23  ;;  %1541 = vmatmul.mubr.bf16.gmra.mrb[24].mxu1 %v6554_v23 }
 0x2c7   : > { %1437 = vmatprep.mubr.bf16.mxu0 %v6252_v18  ;;  %1550 = vmatprep.mubr.bf16.mxu1 %v6252_v18 }
 0x2c8   : > { %1610 = vmatpush1.bf16.msra.mxu0 %v5026_v25  ;;  %1723 = vmatpush1.bf16.msra.mxu1 %v5028_v26 }
 0x2c9   : > { %1611 = vmatprep.subr.bf16.mxu0 %v5035_v27  ;;  %1724 = vmatprep.subr.bf16.mxu1 %v5037_v28 }
 0x2cc   : > { %v5490_v43 = vpop.f32.mrb[8].mxu1  ;;  %1612 = vmatpush1.bf16.msra.mxu0 %v5034_v33  ;;  %1725 = vmatpush1.bf16.msra.mxu1 %v5036_v34 }
 0x2cd   : > { %v903_v46 = vadd.f32 %v5490_v43, %v6530_v24  ;;  %v894_v47 = vpop.f32.mrb[9].mxu1  ;;  %1613 = vmatprep.subr.bf16.mxu0 %v5043_v35  ;;  %1726 = vmatprep.subr.bf16.mxu1 %v5045_v36 }
 0x2ce   : > { %v895_v51 = vadd.f32 %v6530_v24, %v894_v47  ;;  %v5491_v52 = vpop.f32.mrb[10].mxu1  ;;  %1438 = vmatmul.mubr.bf16.gmra.mrb[28].mxu0 %v6552_v22  ;;  %1551 = vmatmul.mubr.bf16.gmra.mrb[28].mxu1 %v6552_v22 }
 0x2cf   : > { %v906_v53 = vadd.f32 %v5491_v52, %v6530_v24  ;;  %v897_v54 = vpop.f32.mrb[11].mxu1  ;;  %1447 = vmatprep.mubr.bf16.mxu0 %v6252_v18  ;;  %1560 = vmatprep.mubr.bf16.mxu1 %v6252_v18  ;;  %v935_v58 = vmax.f32 %v903_v46, 0.0 }
 0x2d0   : > { %v898_v55 = vadd.f32 %v6530_v24, %v897_v54  ;;  %1614 = vmatpush1.bf16.msra.mxu0 %v5042_v44  ;;  %1727 = vmatpush1.bf16.msra.mxu1 %v5044_v45  ;;  %v933_v60 = vmax.f32 %v895_v51, 0.0 }
 0x2d1   : > { %v936_v59 = vmax.f32 %v906_v53, 0.0  ;;  %1615 = vmatprep.subr.bf16.mxu0 %v5051_v48  ;;  %1728 = vmatprep.subr.bf16.mxu1 %v5053_v49 }
 0x2d2   : > { %v934_v61 = vmax.f32 %v898_v55, 0.0 }
 0x2d3   : > { %v946_v62 = vpack.c.bf16 %v936_v59, %v935_v58 }
 0x2d4   : > { %v945_v63 = vpack.c.bf16 %v934_v61, %v933_v60  ;;  %1616 = vmatpush1.bf16.msra.mxu0 %v5050_v56  ;;  %1729 = vmatpush1.bf16.msra.mxu1 %v5052_v57 }
 0x2d6   : > { %1448 = vmatmul.mubr.bf16.gmra.mrb[32].mxu0 %v945_v63  ;;  %1561 = vmatmul.mubr.bf16.gmra.mrb[32].mxu1 %v945_v63 }
 0x2d7   : > { %1457 = vmatprep.mubr.bf16.mxu0 %v6252_v18  ;;  %1570 = vmatprep.mubr.bf16.mxu1 %v6252_v18 }
 0x2dc   : > { %v5494_v0 = vpop.f32.mrb[12].mxu1 }
 0x2dd   : > { %v919_v1 = vadd.f32 %v5494_v0, %v6530_v24  ;;  %v910_v2 = vpop.f32.mrb[13].mxu1 }
 0x2de   : > { %v911_v3 = vadd.f32 %v6530_v24, %v910_v2  ;;  %v5495_v4 = vpop.f32.mrb[14].mxu1  ;;  %1458 = vmatmul.mubr.bf16.gmra.mrb[36].mxu0 %v946_v62  ;;  %1571 = vmatmul.mubr.bf16.gmra.mrb[36].mxu1 %v946_v62 }
 0x2df   : > { %v922_v5 = vadd.f32 %v5495_v4, %v6530_v24  ;;  %v913_v6 = vpop.f32.mrb[15].mxu1  ;;  %1467 = vmatprep.mubr.bf16.mxu0 %v6252_v18  ;;  %1580 = vmatprep.mubr.bf16.mxu1 %v6252_v18  ;;  %v939_v8 = vmax.f32 %v919_v1, 0.0 }
 0x2e0   : > { %v914_v7 = vadd.f32 %v6530_v24, %v913_v6  ;;  %v937_v10 = vmax.f32 %v911_v3, 0.0  ;;  %v1015_v24 = vlaneseq }
 0x2e1   : > { %v940_v9 = vmax.f32 %v922_v5, 0.0 }
 0x2e2   : > { %v938_v50 = vmax.f32 %v914_v7, 0.0 }
 0x2e3   : > { %v948_v11 = vpack.c.bf16 %v940_v9, %v939_v8 }
 0x2e4   : > { %v947_v12 = vpack.c.bf16 %v938_v50, %v937_v10 }
 0x2e6   : > { %1468 = vmatmul.mubr.bf16.gmra.mrb[40].mxu0 %v947_v12  ;;  %1581 = vmatmul.mubr.bf16.gmra.mrb[40].mxu1 %v947_v12 }
 0x2e7   : > { %1477 = vmatprep.mubr.bf16.mxu0 %v6252_v18  ;;  %1590 = vmatprep.mubr.bf16.mxu1 %v6252_v18 }
 0x2ee   : > { %1478 = vmatmul.mubr.bf16.gmra.mrb[44].mxu0 %v948_v11  ;;  %1591 = vmatmul.mubr.bf16.gmra.mrb[44].mxu1 %v948_v11 }
 0x2ef   : > { %1633 = vmatprep.mubr.bf16.mxu0 %v6252_v18  ;;  %1746 = vmatprep.mubr.bf16.mxu1 %v6252_v18 }
 0x2f6   : > { %1634 = vmatmul.mubr.bf16.vlgmr.msra.gmra.mrb[48].mxu0 %v6538_v42  ;;  %1747 = vmatmul.mubr.bf16.vlgmr.msra.gmra.mrb[48].mxu1 %v6538_v42 }
 0x2f7   : > { %1643 = vmatprep.mubr.bf16.mxu0 %v6252_v18  ;;  %1756 = vmatprep.mubr.bf16.mxu1 %v6252_v18 }
 0x2fe   : > { %1644 = vmatmul.mubr.bf16.gmra.mrb[52].mxu0 %v6536_v41  ;;  %1757 = vmatmul.mubr.bf16.gmra.mrb[52].mxu1 %v6536_v41  ;;  %v6602_v41 = vshrl.u32 %v1015_v24, 7 }
 0x2ff   : > { %1653 = vmatprep.mubr.bf16.mxu0 %v6252_v18  ;;  %1766 = vmatprep.mubr.bf16.mxu1 %v6252_v18 }
 0x300   : > { %v6605_v42 = vsub.s32 0, %v6602_v41  ;;  %v6608_v13 = vsub.s32 2, %v6602_v41  ;;  %v6616_v15 = vsub.s32 1, %v6602_v41 }
 0x302   : > { %v6623_v16 = vrot.slane %v6613_v14, %v6605_v42  ;;  %v6627_v17 = vrot.slane %v6613_v14, %v6608_v13  ;;  %v6631_v19 = vrot.slane %v6613_v14, %v6616_v15 }
 0x306   : > { %1654 = vmatmul.mubr.bf16.gmra.mrb[56].mxu0 %v6554_v23  ;;  %1767 = vmatmul.mubr.bf16.gmra.mrb[56].mxu1 %v6554_v23 }
 0x307   : > { %1663 = vmatprep.mubr.bf16.mxu0 %v6252_v18  ;;  %1776 = vmatprep.mubr.bf16.mxu1 %v6252_v18 }
 0x30e   : > { %1664 = vmatmul.mubr.bf16.gmra.mrb[60].mxu0 %v6552_v22  ;;  %1777 = vmatmul.mubr.bf16.gmra.mrb[60].mxu1 %v6552_v22 }
 0x30f   : > { %1673 = vmatprep.mubr.bf16.mxu0 %v6252_v18  ;;  %1786 = vmatprep.mubr.bf16.mxu1 %v6252_v18 }
 0x316   : > { %1674 = vmatmul.mubr.bf16.gmra.mrb[64].mxu0 %v945_v63  ;;  %1787 = vmatmul.mubr.bf16.gmra.mrb[64].mxu1 %v945_v63 }
 0x317   : > { %1683 = vmatprep.mubr.bf16.mxu0 %v6252_v18  ;;  %1796 = vmatprep.mubr.bf16.mxu1 %v6252_v18 }
 0x31e   : > { %1684 = vmatmul.mubr.bf16.gmra.mrb[68].mxu0 %v946_v62  ;;  %1797 = vmatmul.mubr.bf16.gmra.mrb[68].mxu1 %v946_v62 }
 0x31f   : > { %1693 = vmatprep.mubr.bf16.mxu0 %v6252_v18  ;;  %1806 = vmatprep.mubr.bf16.mxu1 %v6252_v18 }
 0x326   : > { %1694 = vmatmul.mubr.bf16.gmra.mrb[72].mxu0 %v947_v12  ;;  %1807 = vmatmul.mubr.bf16.gmra.mrb[72].mxu1 %v947_v12 }
 0x327   : > { %1703 = vmatprep.mubr.bf16.mxu0 %v6252_v18  ;;  %1816 = vmatprep.mubr.bf16.mxu1 %v6252_v18  ;;  %v6619_v18 = vsub.s32 3, %v6602_v41 }
 0x329   : > { %v6635_v20 = vrot.slane %v6613_v14, %v6619_v18 }
 0x32e   : > { %1704 = vmatmul.mubr.bf16.gmra.mrb[76].mxu0 %v948_v11  ;;  %1817 = vmatmul.mubr.bf16.gmra.mrb[76].mxu1 %v948_v11 }
 0x389   : > { %v1409_v21 = vpop.f32.mrb[16].mxu0  ;;  %v1522_v22 = vpop.f32.mrb[16].mxu1 }
 0x38a   : > { %v1410_v23 = vadd.f32 %v1409_v21, %v6623_v16  ;;  %v1523_v25 = vadd.f32 %v1522_v22, %v6627_v17  ;;  %v1411_v26 = vpop.f32.mrb[17].mxu0  ;;  %v1524_v27 = vpop.f32.mrb[17].mxu1 }
 0x38b   : > { %v1412_v28 = vadd.f32 %v1411_v26, %v6631_v19  ;;  %v1525_v29 = vadd.f32 %v1524_v27, %v6635_v20  ;;  %v1413_v30 = vpop.f32.mrb[18].mxu0  ;;  %v1526_v31 = vpop.f32.mrb[18].mxu1 }
 0x38c   : > { %v1414_v32 = vadd.f32 %v1413_v30, %v6623_v16  ;;  %v1527_v33 = vadd.f32 %v1526_v31, %v6627_v17  ;;  %v1415_v34 = vpop.f32.mrb[19].mxu0  ;;  %v1528_v35 = vpop.f32.mrb[19].mxu1  ;;  %v1827_v38 = vmax.f32 %v1410_v23, 0.0  ;;  %v1829_v39 = vmax.f32 %v1523_v25, 0.0 }
 0x38d   : > { %v1416_v36 = vadd.f32 %v1415_v34, %v6631_v19  ;;  %v1529_v37 = vadd.f32 %v1528_v35, %v6635_v20  ;;  %v1828_v44 = vmax.f32 %v1412_v28, 0.0  ;;  %v1830_v45 = vmax.f32 %v1525_v29, 0.0 }
 0x38e   : > { %v1835_v40 = vmax.f32 %v1414_v32, 0.0  ;;  %v1837_v43 = vmax.f32 %v1527_v33, 0.0 }
 0x38f   : > { %v1836_v46 = vmax.f32 %v1416_v36, 0.0  ;;  %v1838_v47 = vmax.f32 %v1529_v37, 0.0 }
 0x390   : > { %v1955_v48 = vmax.f32 %v1827_v38, %v1835_v40  ;;  %v1997_v49 = vmax.f32 %v1829_v39, %v1837_v43 }
 0x391   : > { %v1976_v51 = vmax.f32 %v1828_v44, %v1836_v46  ;;  %v2018_v52 = vmax.f32 %v1830_v45, %v1838_v47  ;;  %v1419_v53 = vpop.f32.mrb[20].mxu0  ;;  %v1532_v54 = vpop.f32.mrb[20].mxu1 }
 0x392   : > { %v1420_v55 = vadd.f32 %v1419_v53, %v6623_v16  ;;  %v1533_v56 = vadd.f32 %v1532_v54, %v6627_v17  ;;  %v1421_v57 = vpop.f32.mrb[21].mxu0  ;;  %v1534_v58 = vpop.f32.mrb[21].mxu1 }
 0x393   : > { %v1422_v59 = vadd.f32 %v1421_v57, %v6631_v19  ;;  %v1535_v60 = vadd.f32 %v1534_v58, %v6635_v20  ;;  %v1423_v61 = vpop.f32.mrb[22].mxu0  ;;  %v1536_v62 = vpop.f32.mrb[22].mxu1 }
 0x394   : > { %v1843_v63 = vmax.f32 %v1420_v55, 0.0  ;;  %v1845_v0 = vmax.f32 %v1533_v56, 0.0  ;;  %v1424_v1 = vadd.f32 %v1423_v61, %v6623_v16  ;;  %v1537_v2 = vadd.f32 %v1536_v62, %v6627_v17  ;;  %v1425_v3 = vpop.f32.mrb[23].mxu0  ;;  %v1538_v4 = vpop.f32.mrb[23].mxu1 }
 0x395   : > { %v1844_v5 = vmax.f32 %v1422_v59, 0.0  ;;  %v1846_v6 = vmax.f32 %v1535_v60, 0.0  ;;  %v1426_v7 = vadd.f32 %v1425_v3, %v6631_v19  ;;  %v1539_v8 = vadd.f32 %v1538_v4, %v6635_v20 }
 0x396   : > { %v1956_v9 = vmax.f32 %v1955_v48, %v1843_v63  ;;  %v1998_v10 = vmax.f32 %v1997_v49, %v1845_v0  ;;  %v1851_v50 = vmax.f32 %v1424_v1, 0.0  ;;  %v1853_v11 = vmax.f32 %v1537_v2, 0.0 }
 0x397   : > { %v1977_v12 = vmax.f32 %v1976_v51, %v1844_v5  ;;  %v2019_v24 = vmax.f32 %v2018_v52, %v1846_v6  ;;  %v1852_v21 = vmax.f32 %v1426_v7, 0.0  ;;  %v1854_v22 = vmax.f32 %v1539_v8, 0.0 }
 0x398   : > { %v1957_v23 = vmax.f32 %v1956_v9, %v1851_v50  ;;  %v1999_v25 = vmax.f32 %v1998_v10, %v1853_v11 }
 0x399   : > { %v1978_v26 = vmax.f32 %v1977_v12, %v1852_v21  ;;  %v2020_v27 = vmax.f32 %v2019_v24, %v1854_v22  ;;  %v1429_v28 = vpop.f32.mrb[24].mxu0  ;;  %v1542_v29 = vpop.f32.mrb[24].mxu1 }
 0x39a   : > { %v1430_v30 = vadd.f32 %v1429_v28, %v6623_v16  ;;  %v1543_v31 = vadd.f32 %v1542_v29, %v6627_v17  ;;  %v1431_v32 = vpop.f32.mrb[25].mxu0  ;;  %v1544_v33 = vpop.f32.mrb[25].mxu1 }
 0x39b   : > { %v1432_v34 = vadd.f32 %v1431_v32, %v6631_v19  ;;  %v1545_v35 = vadd.f32 %v1544_v33, %v6635_v20  ;;  %v1433_v36 = vpop.f32.mrb[26].mxu0  ;;  %v1546_v37 = vpop.f32.mrb[26].mxu1 }
 0x39c   : > { %v1859_v38 = vmax.f32 %v1430_v30, 0.0  ;;  %v1861_v39 = vmax.f32 %v1543_v31, 0.0  ;;  %v1434_v40 = vadd.f32 %v1433_v36, %v6623_v16  ;;  %v1547_v43 = vadd.f32 %v1546_v37, %v6627_v17  ;;  %v1435_v44 = vpop.f32.mrb[27].mxu0  ;;  %v1548_v45 = vpop.f32.mrb[27].mxu1 }
 0x39d   : > { %v1860_v46 = vmax.f32 %v1432_v34, 0.0  ;;  %v1862_v47 = vmax.f32 %v1545_v35, 0.0  ;;  %v1436_v48 = vadd.f32 %v1435_v44, %v6631_v19  ;;  %v1549_v49 = vadd.f32 %v1548_v45, %v6635_v20 }
 0x39e   : > { %v1958_v51 = vmax.f32 %v1957_v23, %v1859_v38  ;;  %v2000_v52 = vmax.f32 %v1999_v25, %v1861_v39  ;;  %v1867_v53 = vmax.f32 %v1434_v40, 0.0  ;;  %v1869_v54 = vmax.f32 %v1547_v43, 0.0 }
 0x39f   : > { %v1979_v55 = vmax.f32 %v1978_v26, %v1860_v46  ;;  %v2021_v56 = vmax.f32 %v2020_v27, %v1862_v47  ;;  %v1868_v57 = vmax.f32 %v1436_v48, 0.0  ;;  %v1870_v58 = vmax.f32 %v1549_v49, 0.0 }
 0x3a0   : > { %v1959_v59 = vmax.f32 %v1958_v51, %v1867_v53  ;;  %v2001_v60 = vmax.f32 %v2000_v52, %v1869_v54 }
 0x3a1   : > { %v1980_v61 = vmax.f32 %v1979_v55, %v1868_v57  ;;  %v2022_v62 = vmax.f32 %v2021_v56, %v1870_v58  ;;  %v1439_v63 = vpop.f32.mrb[28].mxu0  ;;  %v1552_v0 = vpop.f32.mrb[28].mxu1 }
 0x3a2   : > { %v1440_v1 = vadd.f32 %v1439_v63, %v6623_v16  ;;  %v1553_v2 = vadd.f32 %v1552_v0, %v6627_v17  ;;  %v1441_v3 = vpop.f32.mrb[29].mxu0  ;;  %v1554_v4 = vpop.f32.mrb[29].mxu1 }
 0x3a3   : > { %v1442_v5 = vadd.f32 %v1441_v3, %v6631_v19  ;;  %v1555_v6 = vadd.f32 %v1554_v4, %v6635_v20  ;;  %v1443_v7 = vpop.f32.mrb[30].mxu0  ;;  %v1556_v8 = vpop.f32.mrb[30].mxu1 }
 0x3a4   : > { %v1875_v9 = vmax.f32 %v1440_v1, 0.0  ;;  %v1877_v10 = vmax.f32 %v1553_v2, 0.0  ;;  %v1444_v50 = vadd.f32 %v1443_v7, %v6623_v16  ;;  %v1557_v11 = vadd.f32 %v1556_v8, %v6627_v17  ;;  %v1445_v12 = vpop.f32.mrb[31].mxu0  ;;  %v1558_v24 = vpop.f32.mrb[31].mxu1 }
 0x3a5   : > { %v1876_v21 = vmax.f32 %v1442_v5, 0.0  ;;  %v1878_v22 = vmax.f32 %v1555_v6, 0.0  ;;  %v1446_v23 = vadd.f32 %v1445_v12, %v6631_v19  ;;  %v1559_v25 = vadd.f32 %v1558_v24, %v6635_v20 }
 0x3a6   : > { %v1960_v26 = vmax.f32 %v1959_v59, %v1875_v9  ;;  %v2002_v27 = vmax.f32 %v2001_v60, %v1877_v10  ;;  %v1883_v28 = vmax.f32 %v1444_v50, 0.0  ;;  %v1885_v29 = vmax.f32 %v1557_v11, 0.0 }
 0x3a7   : > { %v1981_v30 = vmax.f32 %v1980_v61, %v1876_v21  ;;  %v2023_v31 = vmax.f32 %v2022_v62, %v1878_v22  ;;  %v1884_v32 = vmax.f32 %v1446_v23, 0.0  ;;  %v1886_v33 = vmax.f32 %v1559_v25, 0.0 }
 0x3a8   : > { %v1961_v34 = vmax.f32 %v1960_v26, %v1883_v28  ;;  %v2003_v35 = vmax.f32 %v2002_v27, %v1885_v29 }
 0x3a9   : > { %v1982_v36 = vmax.f32 %v1981_v30, %v1884_v32  ;;  %v2024_v37 = vmax.f32 %v2023_v31, %v1886_v33  ;;  %v1449_v38 = vpop.f32.mrb[32].mxu0  ;;  %v1562_v39 = vpop.f32.mrb[32].mxu1 }
 0x3aa   : > { %v1450_v40 = vadd.f32 %v1449_v38, %v6623_v16  ;;  %v1563_v43 = vadd.f32 %v1562_v39, %v6627_v17  ;;  %v1451_v44 = vpop.f32.mrb[33].mxu0  ;;  %v1564_v45 = vpop.f32.mrb[33].mxu1 }
 0x3ab   : > { %v1452_v46 = vadd.f32 %v1451_v44, %v6631_v19  ;;  %v1565_v47 = vadd.f32 %v1564_v45, %v6635_v20  ;;  %v1453_v48 = vpop.f32.mrb[34].mxu0  ;;  %v1566_v49 = vpop.f32.mrb[34].mxu1 }
 0x3ac   : > { %v1891_v51 = vmax.f32 %v1450_v40, 0.0  ;;  %v1893_v52 = vmax.f32 %v1563_v43, 0.0  ;;  %v1454_v53 = vadd.f32 %v1453_v48, %v6623_v16  ;;  %v1567_v54 = vadd.f32 %v1566_v49, %v6627_v17  ;;  %v1455_v55 = vpop.f32.mrb[35].mxu0  ;;  %v1568_v56 = vpop.f32.mrb[35].mxu1 }
 0x3ad   : > { %v1892_v57 = vmax.f32 %v1452_v46, 0.0  ;;  %v1894_v58 = vmax.f32 %v1565_v47, 0.0  ;;  %v1456_v59 = vadd.f32 %v1455_v55, %v6631_v19  ;;  %v1569_v60 = vadd.f32 %v1568_v56, %v6635_v20 }
 0x3ae   : > { %v1962_v61 = vmax.f32 %v1961_v34, %v1891_v51  ;;  %v2004_v62 = vmax.f32 %v2003_v35, %v1893_v52  ;;  %v1899_v63 = vmax.f32 %v1454_v53, 0.0  ;;  %v1901_v0 = vmax.f32 %v1567_v54, 0.0 }
 0x3af   : > { %v1983_v1 = vmax.f32 %v1982_v36, %v1892_v57  ;;  %v2025_v2 = vmax.f32 %v2024_v37, %v1894_v58  ;;  %v1900_v3 = vmax.f32 %v1456_v59, 0.0  ;;  %v1902_v4 = vmax.f32 %v1569_v60, 0.0 }
 0x3b0   : > { %v1963_v5 = vmax.f32 %v1962_v61, %v1899_v63  ;;  %v2005_v6 = vmax.f32 %v2004_v62, %v1901_v0  ;;  %v1033_v57 = vsub.s32 4, %v6602_v41  ;;  %v1041_v58 = vsub.s32 6, %v6602_v41 }
 0x3b1   : > { %v1984_v7 = vmax.f32 %v1983_v1, %v1900_v3  ;;  %v2026_v8 = vmax.f32 %v2025_v2, %v1902_v4  ;;  %v1459_v9 = vpop.f32.mrb[36].mxu0  ;;  %v1572_v10 = vpop.f32.mrb[36].mxu1  ;;  %v1037_v63 = vsub.s32 5, %v6602_v41  ;;  %v1045_v0 = vsub.s32 7, %v6602_v41 }
 0x3b2   : > { %v1460_v50 = vadd.f32 %v1459_v9, %v6623_v16  ;;  %v1573_v11 = vadd.f32 %v1572_v10, %v6627_v17  ;;  %v1461_v12 = vpop.f32.mrb[37].mxu0  ;;  %v1574_v24 = vpop.f32.mrb[37].mxu1 }
 0x3b3   : > { %v1462_v21 = vadd.f32 %v1461_v12, %v6631_v19  ;;  %v1575_v22 = vadd.f32 %v1574_v24, %v6635_v20  ;;  %v1463_v23 = vpop.f32.mrb[38].mxu0  ;;  %v1576_v25 = vpop.f32.mrb[38].mxu1 }
 0x3b4   : > { %v1907_v26 = vmax.f32 %v1460_v50, 0.0  ;;  %v1909_v27 = vmax.f32 %v1573_v11, 0.0  ;;  %v1464_v28 = vadd.f32 %v1463_v23, %v6623_v16  ;;  %v1577_v29 = vadd.f32 %v1576_v25, %v6627_v17  ;;  %v1465_v30 = vpop.f32.mrb[39].mxu0  ;;  %v1578_v31 = vpop.f32.mrb[39].mxu1 }
 0x3b5   : > { %v1908_v32 = vmax.f32 %v1462_v21, 0.0  ;;  %v1910_v33 = vmax.f32 %v1575_v22, 0.0  ;;  %v1466_v34 = vadd.f32 %v1465_v30, %v6631_v19  ;;  %v1579_v35 = vadd.f32 %v1578_v31, %v6635_v20 }
 0x3b6   : > { %v1964_v36 = vmax.f32 %v1963_v5, %v1907_v26  ;;  %v2006_v37 = vmax.f32 %v2005_v6, %v1909_v27  ;;  %v1915_v38 = vmax.f32 %v1464_v28, 0.0  ;;  %v1917_v39 = vmax.f32 %v1577_v29, 0.0 }
 0x3b7   : > { %v1985_v40 = vmax.f32 %v1984_v7, %v1908_v32  ;;  %v2027_v43 = vmax.f32 %v2026_v8, %v1910_v33  ;;  %v1916_v44 = vmax.f32 %v1466_v34, 0.0  ;;  %v1918_v45 = vmax.f32 %v1579_v35, 0.0 }
 0x3b8   : > { %v1965_v46 = vmax.f32 %v1964_v36, %v1915_v38  ;;  %v2007_v47 = vmax.f32 %v2006_v37, %v1917_v39  ;;  %v6702_v36 = vrot.slane %v6613_v14, %v1033_v57  ;;  %v6707_v37 = vrot.slane %v6613_v14, %v1041_v58 }
 0x3b9   : > { %v1986_v48 = vmax.f32 %v1985_v40, %v1916_v44  ;;  %v2028_v49 = vmax.f32 %v2027_v43, %v1918_v45  ;;  %v1469_v51 = vpop.f32.mrb[40].mxu0  ;;  %v1582_v52 = vpop.f32.mrb[40].mxu1  ;;  %v6714_v44 = vrot.slane %v6613_v14, %v1037_v63  ;;  %v6719_v45 = vrot.slane %v6613_v14, %v1045_v0 }
 0x3ba   : > { %v1470_v53 = vadd.f32 %v1469_v51, %v6623_v16  ;;  %v1583_v54 = vadd.f32 %v1582_v52, %v6627_v17  ;;  %v1471_v55 = vpop.f32.mrb[41].mxu0  ;;  %v1584_v56 = vpop.f32.mrb[41].mxu1 }
 0x3bb   : > { %v1472_v59 = vadd.f32 %v1471_v55, %v6631_v19  ;;  %v1585_v60 = vadd.f32 %v1584_v56, %v6635_v20  ;;  %v1473_v61 = vpop.f32.mrb[42].mxu0  ;;  %v1586_v62 = vpop.f32.mrb[42].mxu1 }
 0x3bc   : > { %v1923_v1 = vmax.f32 %v1470_v53, 0.0  ;;  %v1925_v2 = vmax.f32 %v1583_v54, 0.0  ;;  %v1474_v3 = vadd.f32 %v1473_v61, %v6623_v16  ;;  %v1587_v4 = vadd.f32 %v1586_v62, %v6627_v17  ;;  %v1475_v5 = vpop.f32.mrb[43].mxu0  ;;  %v1588_v6 = vpop.f32.mrb[43].mxu1 }
 0x3bd   : > { %v1924_v7 = vmax.f32 %v1472_v59, 0.0  ;;  %v1926_v8 = vmax.f32 %v1585_v60, 0.0  ;;  %v1476_v9 = vadd.f32 %v1475_v5, %v6631_v19  ;;  %v1589_v10 = vadd.f32 %v1588_v6, %v6635_v20 }
 0x3be   : > { %v1966_v50 = vmax.f32 %v1965_v46, %v1923_v1  ;;  %v2008_v11 = vmax.f32 %v2007_v47, %v1925_v2  ;;  %v1931_v12 = vmax.f32 %v1474_v3, 0.0  ;;  %v1933_v24 = vmax.f32 %v1587_v4, 0.0 }
 0x3bf   : > { %v1987_v21 = vmax.f32 %v1986_v48, %v1924_v7  ;;  %v2029_v22 = vmax.f32 %v2028_v49, %v1926_v8  ;;  %v1932_v23 = vmax.f32 %v1476_v9, 0.0  ;;  %v1934_v25 = vmax.f32 %v1589_v10, 0.0 }
 0x3c0   : > { %v1967_v26 = vmax.f32 %v1966_v50, %v1931_v12  ;;  %v2009_v27 = vmax.f32 %v2008_v11, %v1933_v24 }
 0x3c1   : > { %v1988_v28 = vmax.f32 %v1987_v21, %v1932_v23  ;;  %v2030_v29 = vmax.f32 %v2029_v22, %v1934_v25  ;;  %v1479_v30 = vpop.f32.mrb[44].mxu0  ;;  %v1592_v31 = vpop.f32.mrb[44].mxu1 }
 0x3c2   : > { %v1480_v32 = vadd.f32 %v1479_v30, %v6623_v16  ;;  %v1593_v33 = vadd.f32 %v1592_v31, %v6627_v17  ;;  %v1481_v34 = vpop.f32.mrb[45].mxu0  ;;  %v1594_v35 = vpop.f32.mrb[45].mxu1 }
 0x3c3   : > { %v1482_v38 = vadd.f32 %v1481_v34, %v6631_v19  ;;  %v1595_v39 = vadd.f32 %v1594_v35, %v6635_v20  ;;  %v1483_v40 = vpop.f32.mrb[46].mxu0  ;;  %v1596_v43 = vpop.f32.mrb[46].mxu1 }
 0x3c4   : > { %v1939_v46 = vmax.f32 %v1480_v32, 0.0  ;;  %v1941_v47 = vmax.f32 %v1593_v33, 0.0  ;;  %v1484_v48 = vadd.f32 %v1483_v40, %v6623_v16  ;;  %v1597_v49 = vadd.f32 %v1596_v43, %v6627_v17  ;;  %v1485_v51 = vpop.f32.mrb[47].mxu0  ;;  %v1598_v52 = vpop.f32.mrb[47].mxu1 }
 0x3c5   : > { %v1940_v53 = vmax.f32 %v1482_v38, 0.0  ;;  %v1942_v54 = vmax.f32 %v1595_v39, 0.0  ;;  %v1486_v55 = vadd.f32 %v1485_v51, %v6631_v19  ;;  %v1599_v56 = vadd.f32 %v1598_v52, %v6635_v20 }
 0x3c6   : > { %v1968_v59 = vmax.f32 %v1967_v26, %v1939_v46  ;;  %v2010_v60 = vmax.f32 %v2009_v27, %v1941_v47  ;;  %v1947_v61 = vmax.f32 %v1484_v48, 0.0  ;;  %v1949_v62 = vmax.f32 %v1597_v49, 0.0 }
 0x3c7   : > { %v1989_v14 = vmax.f32 %v1988_v28, %v1940_v53  ;;  %v2031_v1 = vmax.f32 %v2030_v29, %v1942_v54  ;;  %v1948_v2 = vmax.f32 %v1486_v55, 0.0  ;;  %v1950_v3 = vmax.f32 %v1599_v56, 0.0 }
 0x3c8   : > { %v1969_v4 = vmax.f32 %v1968_v59, %v1947_v61  ;;  %v2011_v16 = vmax.f32 %v2010_v60, %v1949_v62 }
 0x3c9   : > { %v1990_v5 = vmax.f32 %v1989_v14, %v1948_v2  ;;  %v2032_v17 = vmax.f32 %v2031_v1, %v1950_v3  ;;  %v1635_v6 = vpop.f32.mrb[48].mxu0  ;;  %v1748_v7 = vpop.f32.mrb[48].mxu1 }
 0x3ca   : > { %v1970_v8 = vrot.slane %v1969_v4, 4  ;;  %v2012_v9 = vrot.slane %v2011_v16, 4  ;;  %v1636_v19 = vadd.f32 %v1635_v6, %v6702_v36  ;;  %v1749_v20 = vadd.f32 %v1748_v7, %v6707_v37  ;;  %v1637_v10 = vpop.f32.mrb[49].mxu0  ;;  %v1750_v50 = vpop.f32.mrb[49].mxu1 }
 0x3cb   : > { %v1991_v11 = vrot.slane %v1990_v5, 4  ;;  %v2033_v12 = vrot.slane %v2032_v17, 4  ;;  %v1638_v24 = vadd.f32 %v1637_v10, %v6714_v44  ;;  %v1751_v21 = vadd.f32 %v1750_v50, %v6719_v45  ;;  %v1639_v22 = vpop.f32.mrb[50].mxu0  ;;  %v1752_v23 = vpop.f32.mrb[50].mxu1 }
 0x3cc   : > { %v1971_v25 = vmax.f32 %v1969_v4, %v1970_v8  ;;  %v2013_v26 = vmax.f32 %v2011_v16, %v2012_v9  ;;  %v1831_v27 = vmax.f32 %v1636_v19, 0.0  ;;  %v1833_v28 = vmax.f32 %v1749_v20, 0.0  ;;  %v1641_v29 = vpop.f32.mrb[51].mxu0  ;;  %v1754_v30 = vpop.f32.mrb[51].mxu1 }
 0x3cd   : > { %v1992_v31 = vmax.f32 %v1990_v5, %v1991_v11  ;;  %v2034_v32 = vmax.f32 %v2032_v17, %v2033_v12  ;;  %v1832_v33 = vmax.f32 %v1638_v24, 0.0  ;;  %v1834_v34 = vmax.f32 %v1751_v21, 0.0 }
 0x3ce   : > { %v1972_v35 = vrot.slane %v1971_v25, 2  ;;  %v2014_v38 = vrot.slane %v2013_v26, 2  ;;  %v1640_v39 = vadd.f32 %v1639_v22, %v6702_v36  ;;  %v1753_v40 = vadd.f32 %v1752_v23, %v6707_v37 }
 0x3cf   : > { %v1993_v43 = vrot.slane %v1992_v31, 2  ;;  %v2035_v46 = vrot.slane %v2034_v32, 2  ;;  %v1642_v47 = vadd.f32 %v1641_v29, %v6714_v44  ;;  %v1755_v48 = vadd.f32 %v1754_v30, %v6719_v45 }
 0x3d0   : > { %v1973_v49 = vmax.f32 %v1971_v25, %v1972_v35  ;;  %v2015_v51 = vmax.f32 %v2013_v26, %v2014_v38  ;;  %v1839_v52 = vmax.f32 %v1640_v39, 0.0  ;;  %v1841_v53 = vmax.f32 %v1753_v40, 0.0 }
 0x3d1   : > { %v1994_v54 = vmax.f32 %v1992_v31, %v1993_v43  ;;  %v2036_v55 = vmax.f32 %v2034_v32, %v2035_v46  ;;  %v1840_v56 = vmax.f32 %v1642_v47, 0.0  ;;  %v1842_v59 = vmax.f32 %v1755_v48, 0.0  ;;  %v1645_v60 = vpop.f32.mrb[52].mxu0  ;;  %v1758_v61 = vpop.f32.mrb[52].mxu1 }
 0x3d2   : > { %v1974_v62 = vrot.slane %v1973_v49, 1  ;;  %v2016_v14 = vrot.slane %v2015_v51, 1  ;;  %v2039_v1 = vmax.f32 %v1831_v27, %v1839_v52  ;;  %v2081_v2 = vmax.f32 %v1833_v28, %v1841_v53  ;;  %v1647_v3 = vpop.f32.mrb[53].mxu0  ;;  %v1760_v4 = vpop.f32.mrb[53].mxu1 }
 0x3d3   : > { %v1995_v16 = vrot.slane %v1994_v54, 1  ;;  %v2037_v5 = vrot.slane %v2036_v55, 1  ;;  %v2060_v17 = vmax.f32 %v1832_v33, %v1840_v56  ;;  %v2102_v6 = vmax.f32 %v1834_v34, %v1842_v59  ;;  %v1649_v7 = vpop.f32.mrb[54].mxu0  ;;  %v1762_v8 = vpop.f32.mrb[54].mxu1 }
 0x3d4   : > { %v6733_v9 = vmax.f32 %v1973_v49, %v1974_v62  ;;  %v6735_v19 = vmax.f32 %v2015_v51, %v2016_v14  ;;  %v1646_v20 = vadd.f32 %v1645_v60, %v6702_v36  ;;  %v1759_v10 = vadd.f32 %v1758_v61, %v6707_v37  ;;  %v1651_v50 = vpop.f32.mrb[55].mxu0  ;;  %v1764_v11 = vpop.f32.mrb[55].mxu1 }
 0x3d5   : > { %v6739_v12 = vmax.f32 %v1994_v54, %v1995_v16  ;;  %v6741_v24 = vmax.f32 %v2036_v55, %v2037_v5  ;;  %v1648_v21 = vadd.f32 %v1647_v3, %v6714_v44  ;;  %v1761_v22 = vadd.f32 %v1760_v4, %v6719_v45 }
 0x3d6   : > { %v1847_v23 = vmax.f32 %v1646_v20, 0.0  ;;  %v1849_v25 = vmax.f32 %v1759_v10, 0.0  ;;  %v1650_v26 = vadd.f32 %v1649_v7, %v6702_v36  ;;  %v1763_v27 = vadd.f32 %v1762_v8, %v6707_v37 }
 0x3d7   : > { %v1848_v28 = vmax.f32 %v1648_v21, 0.0  ;;  %v1850_v29 = vmax.f32 %v1761_v22, 0.0  ;;  %v1652_v30 = vadd.f32 %v1651_v50, %v6714_v44  ;;  %v1765_v31 = vadd.f32 %v1764_v11, %v6719_v45 }
 0x3d8   : > { %v2040_v32 = vmax.f32 %v2039_v1, %v1847_v23  ;;  %v2082_v33 = vmax.f32 %v2081_v2, %v1849_v25  ;;  %v1855_v34 = vmax.f32 %v1650_v26, 0.0  ;;  %v1857_v35 = vmax.f32 %v1763_v27, 0.0 }
 0x3d9   : > { %v2061_v38 = vmax.f32 %v2060_v17, %v1848_v28  ;;  %v2103_v39 = vmax.f32 %v2102_v6, %v1850_v29  ;;  %v1856_v40 = vmax.f32 %v1652_v30, 0.0  ;;  %v1858_v43 = vmax.f32 %v1765_v31, 0.0  ;;  %v1655_v46 = vpop.f32.mrb[56].mxu0  ;;  %v1768_v47 = vpop.f32.mrb[56].mxu1 }
 0x3da   : > { %v2041_v48 = vmax.f32 %v2040_v32, %v1855_v34  ;;  %v2083_v49 = vmax.f32 %v2082_v33, %v1857_v35  ;;  %v1656_v51 = vadd.f32 %v1655_v46, %v6702_v36  ;;  %v1769_v52 = vadd.f32 %v1768_v47, %v6707_v37  ;;  %v1657_v53 = vpop.f32.mrb[57].mxu0  ;;  %v1770_v54 = vpop.f32.mrb[57].mxu1 }
 0x3db   : > { %v2062_v55 = vmax.f32 %v2061_v38, %v1856_v40  ;;  %v2104_v56 = vmax.f32 %v2103_v39, %v1858_v43  ;;  %v1658_v59 = vadd.f32 %v1657_v53, %v6714_v44  ;;  %v1771_v60 = vadd.f32 %v1770_v54, %v6719_v45  ;;  %v1659_v61 = vpop.f32.mrb[58].mxu0  ;;  %v1772_v62 = vpop.f32.mrb[58].mxu1 }
 0x3dc   : > { %v1863_v14 = vmax.f32 %v1656_v51, 0.0  ;;  %v1865_v1 = vmax.f32 %v1769_v52, 0.0  ;;  %v1660_v2 = vadd.f32 %v1659_v61, %v6702_v36  ;;  %v1773_v3 = vadd.f32 %v1772_v62, %v6707_v37  ;;  %v1661_v4 = vpop.f32.mrb[59].mxu0  ;;  %v1774_v16 = vpop.f32.mrb[59].mxu1 }
 0x3dd   : > { %v1864_v5 = vmax.f32 %v1658_v59, 0.0  ;;  %v1866_v17 = vmax.f32 %v1771_v60, 0.0  ;;  %v1662_v6 = vadd.f32 %v1661_v4, %v6714_v44  ;;  %v1775_v7 = vadd.f32 %v1774_v16, %v6719_v45 }
 0x3de   : > { %v2042_v8 = vmax.f32 %v2041_v48, %v1863_v14  ;;  %v2084_v20 = vmax.f32 %v2083_v49, %v1865_v1  ;;  %v1871_v10 = vmax.f32 %v1660_v2, 0.0  ;;  %v1873_v50 = vmax.f32 %v1773_v3, 0.0 }
 0x3df   : > { %v2063_v11 = vmax.f32 %v2062_v55, %v1864_v5  ;;  %v2105_v21 = vmax.f32 %v2104_v56, %v1866_v17  ;;  %v1872_v22 = vmax.f32 %v1662_v6, 0.0  ;;  %v1874_v23 = vmax.f32 %v1775_v7, 0.0 }
 0x3e0   : > { %v2043_v25 = vmax.f32 %v2042_v8, %v1871_v10  ;;  %v2085_v26 = vmax.f32 %v2084_v20, %v1873_v50 }
 0x3e1   : > { %v2064_v27 = vmax.f32 %v2063_v11, %v1872_v22  ;;  %v2106_v28 = vmax.f32 %v2105_v21, %v1874_v23  ;;  %v1665_v29 = vpop.f32.mrb[60].mxu0  ;;  %v1778_v30 = vpop.f32.mrb[60].mxu1 }
 0x3e2   : > { %v1666_v31 = vadd.f32 %v1665_v29, %v6702_v36  ;;  %v1779_v32 = vadd.f32 %v1778_v30, %v6707_v37  ;;  %v1667_v33 = vpop.f32.mrb[61].mxu0  ;;  %v1780_v34 = vpop.f32.mrb[61].mxu1 }
 0x3e3   : > { %v1668_v35 = vadd.f32 %v1667_v33, %v6714_v44  ;;  %v1781_v38 = vadd.f32 %v1780_v34, %v6719_v45  ;;  %v1669_v39 = vpop.f32.mrb[62].mxu0  ;;  %v1782_v40 = vpop.f32.mrb[62].mxu1 }
 0x3e4   : > { %v1879_v43 = vmax.f32 %v1666_v31, 0.0  ;;  %v1881_v46 = vmax.f32 %v1779_v32, 0.0  ;;  %v1670_v47 = vadd.f32 %v1669_v39, %v6702_v36  ;;  %v1783_v48 = vadd.f32 %v1782_v40, %v6707_v37  ;;  %v1671_v49 = vpop.f32.mrb[63].mxu0  ;;  %v1784_v51 = vpop.f32.mrb[63].mxu1 }
 0x3e5   : > { %v1880_v52 = vmax.f32 %v1668_v35, 0.0  ;;  %v1882_v53 = vmax.f32 %v1781_v38, 0.0  ;;  %v1672_v54 = vadd.f32 %v1671_v49, %v6714_v44  ;;  %v1785_v55 = vadd.f32 %v1784_v51, %v6719_v45 }
 0x3e6   : > { %v2044_v56 = vmax.f32 %v2043_v25, %v1879_v43  ;;  %v2086_v59 = vmax.f32 %v2085_v26, %v1881_v46  ;;  %v1887_v60 = vmax.f32 %v1670_v47, 0.0  ;;  %v1889_v61 = vmax.f32 %v1783_v48, 0.0 }
 0x3e7   : > { %v2065_v62 = vmax.f32 %v2064_v27, %v1880_v52  ;;  %v2107_v14 = vmax.f32 %v2106_v28, %v1882_v53  ;;  %v1888_v1 = vmax.f32 %v1672_v54, 0.0  ;;  %v1890_v2 = vmax.f32 %v1785_v55, 0.0 }
 0x3e8   : > { %v2045_v3 = vmax.f32 %v2044_v56, %v1887_v60  ;;  %v2087_v4 = vmax.f32 %v2086_v59, %v1889_v61 }
 0x3e9   : > { %v2066_v16 = vmax.f32 %v2065_v62, %v1888_v1  ;;  %v2108_v5 = vmax.f32 %v2107_v14, %v1890_v2  ;;  %v1675_v17 = vpop.f32.mrb[64].mxu0  ;;  %v1788_v6 = vpop.f32.mrb[64].mxu1 }
 0x3ea   : > { %v1676_v7 = vadd.f32 %v1675_v17, %v6702_v36  ;;  %v1789_v8 = vadd.f32 %v1788_v6, %v6707_v37  ;;  %v1677_v20 = vpop.f32.mrb[65].mxu0  ;;  %v1790_v10 = vpop.f32.mrb[65].mxu1 }
 0x3eb   : > { %v1678_v50 = vadd.f32 %v1677_v20, %v6714_v44  ;;  %v1791_v11 = vadd.f32 %v1790_v10, %v6719_v45  ;;  %v1679_v21 = vpop.f32.mrb[66].mxu0  ;;  %v1792_v22 = vpop.f32.mrb[66].mxu1 }
 0x3ec   : > { %v1895_v23 = vmax.f32 %v1676_v7, 0.0  ;;  %v1897_v25 = vmax.f32 %v1789_v8, 0.0  ;;  %v1680_v26 = vadd.f32 %v1679_v21, %v6702_v36  ;;  %v1793_v27 = vadd.f32 %v1792_v22, %v6707_v37  ;;  %v1681_v28 = vpop.f32.mrb[67].mxu0  ;;  %v1794_v29 = vpop.f32.mrb[67].mxu1 }
 0x3ed   : > { %v1896_v30 = vmax.f32 %v1678_v50, 0.0  ;;  %v1898_v31 = vmax.f32 %v1791_v11, 0.0  ;;  %v1682_v32 = vadd.f32 %v1681_v28, %v6714_v44  ;;  %v1795_v33 = vadd.f32 %v1794_v29, %v6719_v45 }
 0x3ee   : > { %v2046_v34 = vmax.f32 %v2045_v3, %v1895_v23  ;;  %v2088_v35 = vmax.f32 %v2087_v4, %v1897_v25  ;;  %v1903_v38 = vmax.f32 %v1680_v26, 0.0  ;;  %v1905_v39 = vmax.f32 %v1793_v27, 0.0 }
 0x3ef   : > { %v2067_v40 = vmax.f32 %v2066_v16, %v1896_v30  ;;  %v2109_v43 = vmax.f32 %v2108_v5, %v1898_v31  ;;  %v1904_v46 = vmax.f32 %v1682_v32, 0.0  ;;  %v1906_v47 = vmax.f32 %v1795_v33, 0.0 }
 0x3f0   : > { %v2047_v48 = vmax.f32 %v2046_v34, %v1903_v38  ;;  %v2089_v49 = vmax.f32 %v2088_v35, %v1905_v39 }
 0x3f1   : > { %v2068_v51 = vmax.f32 %v2067_v40, %v1904_v46  ;;  %v2110_v52 = vmax.f32 %v2109_v43, %v1906_v47  ;;  %v1685_v53 = vpop.f32.mrb[68].mxu0  ;;  %v1798_v54 = vpop.f32.mrb[68].mxu1 }
 0x3f2   : > { %v1686_v55 = vadd.f32 %v1685_v53, %v6702_v36  ;;  %v1799_v56 = vadd.f32 %v1798_v54, %v6707_v37  ;;  %v1687_v59 = vpop.f32.mrb[69].mxu0  ;;  %v1800_v60 = vpop.f32.mrb[69].mxu1 }
 0x3f3   : > { %v1688_v61 = vadd.f32 %v1687_v59, %v6714_v44  ;;  %v1801_v62 = vadd.f32 %v1800_v60, %v6719_v45  ;;  %v1689_v14 = vpop.f32.mrb[70].mxu0  ;;  %v1802_v1 = vpop.f32.mrb[70].mxu1 }
 0x3f4   : > { %v1911_v2 = vmax.f32 %v1686_v55, 0.0  ;;  %v1913_v3 = vmax.f32 %v1799_v56, 0.0  ;;  %v1690_v4 = vadd.f32 %v1689_v14, %v6702_v36  ;;  %v1803_v16 = vadd.f32 %v1802_v1, %v6707_v37  ;;  %v1691_v5 = vpop.f32.mrb[71].mxu0  ;;  %v1804_v17 = vpop.f32.mrb[71].mxu1 }
 0x3f5   : > { %v1912_v6 = vmax.f32 %v1688_v61, 0.0  ;;  %v1914_v7 = vmax.f32 %v1801_v62, 0.0  ;;  %v1692_v8 = vadd.f32 %v1691_v5, %v6714_v44  ;;  %v1805_v20 = vadd.f32 %v1804_v17, %v6719_v45 }
 0x3f6   : > { %v2048_v10 = vmax.f32 %v2047_v48, %v1911_v2  ;;  %v2090_v50 = vmax.f32 %v2089_v49, %v1913_v3  ;;  %v1919_v11 = vmax.f32 %v1690_v4, 0.0  ;;  %v1921_v21 = vmax.f32 %v1803_v16, 0.0 }
 0x3f7   : > { %v2069_v22 = vmax.f32 %v2068_v51, %v1912_v6  ;;  %v2111_v23 = vmax.f32 %v2110_v52, %v1914_v7  ;;  %v1920_v25 = vmax.f32 %v1692_v8, 0.0  ;;  %v1922_v26 = vmax.f32 %v1805_v20, 0.0 }
 0x3f8   : > { %v2049_v27 = vmax.f32 %v2048_v10, %v1919_v11  ;;  %v2091_v28 = vmax.f32 %v2090_v50, %v1921_v21 }
 0x3f9   : > { %v2070_v29 = vmax.f32 %v2069_v22, %v1920_v25  ;;  %v2112_v30 = vmax.f32 %v2111_v23, %v1922_v26  ;;  %v1695_v31 = vpop.f32.mrb[72].mxu0  ;;  %v1808_v32 = vpop.f32.mrb[72].mxu1 }
 0x3fa   : > { %v1696_v33 = vadd.f32 %v1695_v31, %v6702_v36  ;;  %v1809_v34 = vadd.f32 %v1808_v32, %v6707_v37  ;;  %v1697_v35 = vpop.f32.mrb[73].mxu0  ;;  %v1810_v38 = vpop.f32.mrb[73].mxu1 }
 0x3fb   : > { %v1698_v39 = vadd.f32 %v1697_v35, %v6714_v44  ;;  %v1811_v40 = vadd.f32 %v1810_v38, %v6719_v45  ;;  %v1699_v43 = vpop.f32.mrb[74].mxu0  ;;  %v1812_v46 = vpop.f32.mrb[74].mxu1 }
 0x3fc   : > { %v1927_v47 = vmax.f32 %v1696_v33, 0.0  ;;  %v1929_v48 = vmax.f32 %v1809_v34, 0.0  ;;  %v1700_v49 = vadd.f32 %v1699_v43, %v6702_v36  ;;  %v1813_v51 = vadd.f32 %v1812_v46, %v6707_v37  ;;  %v1701_v52 = vpop.f32.mrb[75].mxu0  ;;  %v1814_v53 = vpop.f32.mrb[75].mxu1 }
 0x3fd   : > { %v1928_v54 = vmax.f32 %v1698_v39, 0.0  ;;  %v1930_v55 = vmax.f32 %v1811_v40, 0.0  ;;  %v1702_v56 = vadd.f32 %v1701_v52, %v6714_v44  ;;  %v1815_v59 = vadd.f32 %v1814_v53, %v6719_v45 }
 0x3fe   : > { %v2050_v60 = vmax.f32 %v2049_v27, %v1927_v47  ;;  %v2092_v61 = vmax.f32 %v2091_v28, %v1929_v48  ;;  %v1935_v62 = vmax.f32 %v1700_v49, 0.0  ;;  %v1937_v14 = vmax.f32 %v1813_v51, 0.0 }
 0x3ff   : > { %v2071_v1 = vmax.f32 %v2070_v29, %v1928_v54  ;;  %v2113_v2 = vmax.f32 %v2112_v30, %v1930_v55  ;;  %v1936_v3 = vmax.f32 %v1702_v56, 0.0  ;;  %v1938_v4 = vmax.f32 %v1815_v59, 0.0 }
 0x400   : > { %v2051_v16 = vmax.f32 %v2050_v60, %v1935_v62  ;;  %v2093_v5 = vmax.f32 %v2092_v61, %v1937_v14 }
 0x401   : > { %v2072_v17 = vmax.f32 %v2071_v1, %v1936_v3  ;;  %v2114_v6 = vmax.f32 %v2113_v2, %v1938_v4  ;;  %v1705_v7 = vpop.f32.mrb[76].mxu0  ;;  %v1818_v8 = vpop.f32.mrb[76].mxu1 }
 0x402   : > { %v1706_v20 = vadd.f32 %v1705_v7, %v6702_v36  ;;  %v1819_v10 = vadd.f32 %v1818_v8, %v6707_v37  ;;  %v1707_v50 = vpop.f32.mrb[77].mxu0  ;;  %v1820_v11 = vpop.f32.mrb[77].mxu1 }
 0x403   : > { %v1708_v21 = vadd.f32 %v1707_v50, %v6714_v44  ;;  %v1821_v22 = vadd.f32 %v1820_v11, %v6719_v45  ;;  %v1709_v23 = vpop.f32.mrb[78].mxu0  ;;  %v1822_v25 = vpop.f32.mrb[78].mxu1  ;;  %v6253_v11 = vmov (!%p5054_p9), 1966171168  }
 0x404   : > { %v1943_v26 = vmax.f32 %v1706_v20, 0.0  ;;  %v1945_v27 = vmax.f32 %v1819_v10, 0.0  ;;  %v1710_v28 = vadd.f32 %v1709_v23, %v6702_v36  ;;  %v1823_v29 = vadd.f32 %v1822_v25, %v6707_v37  ;;  %v1711_v30 = vpop.f32.mrb[79].mxu0  ;;  %v1824_v31 = vpop.f32.mrb[79].mxu1 }
 0x405   : > { %v1944_v32 = vmax.f32 %v1708_v21, 0.0  ;;  %v1946_v33 = vmax.f32 %v1821_v22, 0.0  ;;  %v1712_v34 = vadd.f32 %v1711_v30, %v6714_v44  ;;  %v1825_v35 = vadd.f32 %v1824_v31, %v6719_v45 }
 0x406   : > { %v2052_v38 = vmax.f32 %v2051_v16, %v1943_v26  ;;  %v2094_v39 = vmax.f32 %v2093_v5, %v1945_v27  ;;  %v1951_v40 = vmax.f32 %v1710_v28, 0.0  ;;  %v1953_v43 = vmax.f32 %v1823_v29, 0.0 }
 0x407   : > { %v2073_v46 = vmax.f32 %v2072_v17, %v1944_v32  ;;  %v2115_v47 = vmax.f32 %v2114_v6, %v1946_v33  ;;  %v1952_v48 = vmax.f32 %v1712_v34, 0.0  ;;  %v1954_v49 = vmax.f32 %v1825_v35, 0.0 }
 0x408   : > { %v2053_v51 = vmax.f32 %v2052_v38, %v1951_v40  ;;  %v2095_v36 = vmax.f32 %v2094_v39, %v1953_v43  ;;  %v2140_v21 = vunpack.c.l.s4 (!%p5054_p9), %v6253_v11  ;;  %v2135_v22 = vcombine.low (!%p5054_p9), %v6733_v9, %v6739_v12 }
 0x409   : > { %v2074_v52 = vmax.f32 %v2073_v46, %v1952_v48  ;;  %v2116_v37 = vmax.f32 %v2115_v47, %v1954_v49  ;;  %v2136_v23 = vcombine.low (!%p5054_p9), %v6735_v19, %v6741_v24 }
 0x40a   : > { %v2054_v53 = vrot.slane %v2053_v51, 4  ;;  %v2096_v54 = vrot.slane %v2095_v36, 4  ;;  %v2141_v27 = vunpack.c.0.s8 (!%p5054_p9), %v2140_v21 }
 0x40b   : > { %v2075_v55 = vrot.slane %v2074_v52, 4  ;;  %v2117_v56 = vrot.slane %v2116_v37, 4 }
 0x40c   : > { %v2055_v59 = vmax.f32 %v2053_v51, %v2054_v53  ;;  %v2097_v44 = vmax.f32 %v2095_v36, %v2096_v54  ;;  %v2144_v28 = vsub.s32 (!%p5054_p9), %v2141_v27, %v6602_v41 }
 0x40d   : > { %v2076_v60 = vmax.f32 %v2074_v52, %v2075_v55  ;;  %v2118_v45 = vmax.f32 %v2116_v37, %v2117_v56 }
 0x40e   : > { %v2056_v61 = vrot.slane %v2055_v59, 2  ;;  %v2098_v62 = vrot.slane %v2097_v44, 2  ;;  %v2145_v29 = vrot.slane (!%p5054_p9), %v2135_v22, %v2144_v28  ;;  %v2152_v30 = vrot.slane (!%p5054_p9), %v2136_v23, %v2144_v28 }
 0x40f   : > { %v2077_v14 = vrot.slane %v2076_v60, 2  ;;  %v2119_v1 = vrot.slane %v2118_v45, 2  ;;  %2126 = sbr.rel (%p5054_p9) target bundleno = 1058 (0x422), region = 88 }
 0x410   : > { %v2057_v2 = vmax.f32 %v2055_v59, %v2056_v61  ;;  %v2099_v3 = vmax.f32 %v2097_v44, %v2098_v62  ;;  %v2167_v33 = vcombine.low (!%p5054_p9), %v2145_v29, %v2152_v30 }
 0x411   : > { %v2078_v4 = vmax.f32 %v2076_v60, %v2077_v14  ;;  %v2120_v16 = vmax.f32 %v2118_v45, %v2119_v1 }
 0x412   : > { %v2058_v5 = vrot.slane %v2057_v2, 1  ;;  %v2100_v17 = vrot.slane %v2099_v3, 1  ;;  %v2175_v35 = vrot.slane (!%p5054_p9), %v2167_v33, %v2144_v28 }
 0x413   : > { %v2079_v6 = vrot.slane %v2078_v4, 1  ;;  %v2121_v7 = vrot.slane %v2120_v16, 1 }
 0x414   : > { %v2059_v8 = vmax.f32 %v2057_v2, %v2058_v5  ;;  %v2101_v20 = vmax.f32 %v2099_v3, %v2100_v17 }
 0x415   : > { %v2080_v10 = vmax.f32 %v2078_v4, %v2079_v6  ;;  %v2122_v50 = vmax.f32 %v2120_v16, %v2121_v7 }
 0x417   : > { %v2137_v25 = vcombine.low %v2059_v8, %v2080_v10  ;;  %v2138_v26 = vcombine.low %v2101_v20, %v2122_v50 }
 0x419   : > { %v2159_v31 = vrot.slane %v2137_v25, %v2144_v28  ;;  %v2166_v32 = vrot.slane %v2138_v26, %v2144_v28 }
 0x41b   : > { %v2168_v34 = vcombine.low %v2159_v31, %v2166_v32 }
 0x41d   : > { %v2182_v38 = vrot.slane %v2168_v34, %v2144_v28 }
 0x41f   : > { %v2183_v39 = vcombine.low %v2175_v35, %v2182_v38 }
 0x421   : > { %2185 = vst [vmem:[#allocation2] sm:$0xff] %v2183_v39 }
 0x422 PF: > { %p5055_p10 = scmp.eq.s32.totalorder %s6225_s25, 0 }
 0x423   : > { %v6254_v40 = vmov (!%p5055_p10), 1966171168   ;;  %v2199_v46 = vcombine.low (!%p5055_p10), %v6733_v9, %v6739_v12  ;;  %v2200_v47 = vcombine.low (!%p5055_p10), %v6735_v19, %v6741_v24  ;;  %v2201_v48 = vcombine.low (!%p5055_p10), %v2059_v8, %v2080_v10 }
 0x424   : > { %2189 = sbr.rel (%p5055_p10) target bundleno = 1077 (0x435), region = 92  ;;  %v2204_v43 = vunpack.c.l.s4 (!%p5055_p10), %v6254_v40  ;;  %v2202_v49 = vcombine.low (!%p5055_p10), %v2101_v20, %v2122_v50 }
 0x426   : > { %v2205_v51 = vunpack.c.0.s8 (!%p5055_p10), %v2204_v43 }
 0x428   : > { %v2208_v36 = vsub.s32 (!%p5055_p10), %v2205_v51, %v6602_v41  ;;  %v2190_v60 = vld [vmem:[#allocation2] sm:$0xff] (!%p5055_p10) }
 0x42a   : > { %v2209_v52 = vrot.slane (!%p5055_p10), %v2199_v46, %v2208_v36  ;;  %v2216_v37 = vrot.slane (!%p5055_p10), %v2200_v47, %v2208_v36  ;;  %v2223_v53 = vrot.slane (!%p5055_p10), %v2201_v48, %v2208_v36  ;;  %v2230_v54 = vrot.slane (!%p5055_p10), %v2202_v49, %v2208_v36 }
 0x42c   : > { %v2231_v55 = vcombine.low %v2209_v52, %v2216_v37  ;;  %v2232_v56 = vcombine.low %v2223_v53, %v2230_v54 }
 0x42e   : > { %v2239_v59 = vrot.slane %v2231_v55, %v2208_v36  ;;  %v2246_v44 = vrot.slane %v2232_v56, %v2208_v36 }
 0x430   : > { %v2247_v45 = vcombine.low %v2239_v59, %v2246_v44 }
 0x432   : > { %v2249_v61 = vmax.f32 %v2190_v60, %v2247_v45 }
 0x434   : > { %2250 = vst [vmem:[#allocation2] sm:$0xff] %v2249_v61 }
 0x435 PF: > { %p5056_p11 = scmp.ne.s32.totalorder %s6225_s25, 2 }
 0x436   : > { %v5614_v9 = vld [vmem:[#allocation5 + $0x4] ss:$16 sps:$4 sm:$0xff] (!%p5056_p11)   ;;  %v5618_v12 = vld [vmem:[#allocation5] ss:$16 sps:$4 sm:$0xff] (!%p5056_p11)   ;;  %s6983_s19 = sld [smem:[#allocation13_spill]] (!%p5056_p11)  ;;  %s6984_s11 = sld [smem:[#allocation15_spill]] (!%p5056_p11) }
 0x437   : > { %2254 = sbr.rel (%p5056_p11) target bundleno = 2057 (0x809), region = 96  ;;  %v5616_v19 = vld [vmem:[#allocation5 + $0x204] ss:$16 sps:$4 sm:$0xff] (!%p5056_p11)   ;;  %3863 = vmatprep.subr.bf16.mxu1 (!%p5056_p11), %v5614_v9  ;;  %v5619_v24 = vld [vmem:[#allocation5 + $0x200] ss:$16 sps:$4 sm:$0xff] (!%p5056_p11)   ;;  %s6985_s7 = sld [smem:[#allocation14_spill]] (!%p5056_p11) }
 0x438   : > { %3904 = vmatprep.subr.bf16.mxu0 (!%p5056_p11), %v5616_v19  ;;  %v5620_v62 = vld [vmem:[#allocation5 + $0x24] ss:$16 sps:$4 sm:$0xff] (!%p5056_p11)   ;;  %3864 = vmatpush1.bf16.msra.mxu1 (!%p5056_p11), %v5618_v12  ;;  %v5624_v1 = vld [vmem:[#allocation5 + $0x20] ss:$16 sps:$4 sm:$0xff] (!%p5056_p11)   ;;  %s6986_s24 = sld [smem:[#allocation16_spill]] (!%p5056_p11)  ;;  %vm4850_vm2 = vcmask (!%p5056_p11), 65536  }
 0x439   : > { %3905 = vmatpush1.bf16.msra.mxu0 (!%p5056_p11), %v5619_v24  ;;  %v5622_v14 = vld [vmem:[#allocation5 + $0x224] ss:$16 sps:$4 sm:$0xff] (!%p5056_p11)   ;;  %3865 = vmatprep.subr.bf16.mxu1 (!%p5056_p11), %v5620_v62  ;;  %v5625_v2 = vld [vmem:[#allocation5 + $0x220] ss:$16 sps:$4 sm:$0xff] (!%p5056_p11)  }
 0x43a   : > { %3906 = vmatprep.subr.bf16.mxu0 (!%p5056_p11), %v5622_v14  ;;  %v5626_v3 = vld [vmem:[#allocation5 + $0x44] ss:$16 sps:$4 sm:$0xff] (!%p5056_p11)   ;;  %v5630_v16 = vld [vmem:[#allocation5 + $0x40] ss:$16 sps:$4 sm:$0xff] (!%p5056_p11)  }
 0x43b   : > { %v5628_v4 = vld [vmem:[#allocation5 + $0x244] ss:$16 sps:$4 sm:$0xff] (!%p5056_p11)   ;;  %v5631_v5 = vld [vmem:[#allocation5 + $0x240] ss:$16 sps:$4 sm:$0xff] (!%p5056_p11)   ;;  %v6810_v53 = vld [vmem:[#allocation2] sm:$0xff] (!%p5056_p11) }
 0x43c   : > { %3866 = vmatpush1.bf16.msra.mxu1 (!%p5056_p11), %v5624_v1  ;;  %v5632_v17 = vld [vmem:[#allocation5 + $0x64] ss:$16 sps:$4 sm:$0xff] (!%p5056_p11)   ;;  %v5636_v7 = vld [vmem:[#allocation5 + $0x60] ss:$16 sps:$4 sm:$0xff] (!%p5056_p11)   ;;  %v2264_v55 = vrot.slane (!%p5056_p11), %v6810_v53, %v6616_v15  ;;  %v2272_v56 = vrot.slane (!%p5056_p11), %v6810_v53, %v6619_v18 }
 0x43d   : > { %3907 = vmatpush1.bf16.msra.mxu0 (!%p5056_p11), %v5625_v2  ;;  %3867 = vmatprep.subr.bf16.mxu1 (!%p5056_p11), %v5626_v3  ;;  %v5634_v6 = vld [vmem:[#allocation5 + $0x264] ss:$16 sps:$4 sm:$0xff] (!%p5056_p11)   ;;  %v5637_v8 = vld [vmem:[#allocation5 + $0x260] ss:$16 sps:$4 sm:$0xff] (!%p5056_p11)  }
 0x43e   : > { %3908 = vmatprep.subr.bf16.mxu0 %v5628_v4  ;;  %v5638_v20 = vld [vmem:[#allocation5 + $0x84] ss:$16 sps:$4 sm:$0xff]   ;;  %v5642_v50 = vld [vmem:[#allocation5 + $0x80] ss:$16 sps:$4 sm:$0xff]   ;;  %v2298_v45 = vpack.c.bf16 %v2264_v55, %v2264_v55  ;;  %v6816_v61 = vpack.c.bf16 %v2272_v56, %v2272_v56  ;;  %v5757_v56 = vld [vmem:[#allocation5 + $0xec] ss:$16 sps:$4 sm:$0xff]  }
 0x43f   : > { %v5640_v10 = vld [vmem:[#allocation5 + $0x284] ss:$16 sps:$4 sm:$0xff]   ;;  %v5643_v11 = vld [vmem:[#allocation5 + $0x280] ss:$16 sps:$4 sm:$0xff]  }
 0x440   : > { %3868 = vmatpush1.bf16.msra.mxu1 %v5630_v16  ;;  %v5644_v21 = vld [vmem:[#allocation5 + $0xa4] ss:$16 sps:$4 sm:$0xff]   ;;  %v5648_v23 = vld [vmem:[#allocation5 + $0xa0] ss:$16 sps:$4 sm:$0xff]   ;;  %3895 = vmatprep.mubr.bf16.mxu1 %v2298_v45 }
 0x441   : > { %3909 = vmatpush1.bf16.msra.mxu0 %v5631_v5  ;;  %3869 = vmatprep.subr.bf16.mxu1 %v5632_v17  ;;  %v5646_v22 = vld [vmem:[#allocation5 + $0x2a4] ss:$16 sps:$4 sm:$0xff]   ;;  %v5649_v25 = vld [vmem:[#allocation5 + $0x2a0] ss:$16 sps:$4 sm:$0xff]  }
 0x442   : > { %3910 = vmatprep.subr.bf16.mxu0 %v5634_v6  ;;  %v5650_v26 = vld [vmem:[#allocation5 + $0xc4] ss:$16 sps:$4 sm:$0xff]   ;;  %v5654_v28 = vld [vmem:[#allocation5 + $0xc0] ss:$16 sps:$4 sm:$0xff]   ;;  %3936 = vmatprep.mubr.bf16.mxu0 %v6816_v61  ;;  %v2260_v6 = vrot.slane %v6810_v53, %v6605_v42 }
 0x443   : > { %v5652_v27 = vld [vmem:[#allocation5 + $0x2c4] ss:$16 sps:$4 sm:$0xff]   ;;  %v5655_v29 = vld [vmem:[#allocation5 + $0x2c0] ss:$16 sps:$4 sm:$0xff]  }
 0x444   : > { %3870 = vmatpush1.bf16.msra.mxu1 %v5636_v7  ;;  %v5656_v30 = vld [vmem:[#allocation5 + $0xe4] ss:$16 sps:$4 sm:$0xff]   ;;  %v5660_v32 = vld [vmem:[#allocation5 + $0xe0] ss:$16 sps:$4 sm:$0xff]   ;;  %v2268_v7 = vrot.slane %v6810_v53, %v6608_v13 }
 0x445   : > { %3911 = vmatpush1.bf16.msra.mxu0 %v5637_v8  ;;  %3871 = vmatprep.subr.bf16.mxu1 %v5638_v20  ;;  %v5658_v31 = vld [vmem:[#allocation5 + $0x2e4] ss:$16 sps:$4 sm:$0xff]   ;;  %v5661_v33 = vld [vmem:[#allocation5 + $0x2e0] ss:$16 sps:$4 sm:$0xff]  }
 0x446   : > { %3912 = vmatprep.subr.bf16.mxu0 %v5640_v10  ;;  %v5662_v34 = vld [vmem:[#allocation5 + $0x104] ss:$16 sps:$4 sm:$0xff]   ;;  %v5666_v38 = vld [vmem:[#allocation5 + $0x100] ss:$16 sps:$4 sm:$0xff]   ;;  %v5715_v10 = vld [vmem:[#allocation5 + $0xc] ss:$16 sps:$4 sm:$0xff]  }
 0x447   : > { %v5664_v35 = vld [vmem:[#allocation5 + $0x304] ss:$16 sps:$4 sm:$0xff]   ;;  %v5667_v39 = vld [vmem:[#allocation5 + $0x300] ss:$16 sps:$4 sm:$0xff]  }
 0x448   : > { %3872 = vmatpush1.bf16.msra.mxu1 %v5642_v50  ;;  %v5668_v40 = vld [vmem:[#allocation5 + $0x124] ss:$16 sps:$4 sm:$0xff]   ;;  %v5672_v46 = vld [vmem:[#allocation5 + $0x120] ss:$16 sps:$4 sm:$0xff]   ;;  %v2280_v50 = vrot.slane %v6810_v53, %v1037_v63  ;;  %v5719_v63 = vld [vmem:[#allocation5 + $0x28] ss:$16 sps:$4 sm:$0xff]  }
 0x449   : > { %3913 = vmatpush1.bf16.msra.mxu0 %v5643_v11  ;;  %3873 = vmatprep.subr.bf16.mxu1 %v5644_v21  ;;  %v5670_v43 = vld [vmem:[#allocation5 + $0x324] ss:$16 sps:$4 sm:$0xff]   ;;  %v5673_v47 = vld [vmem:[#allocation5 + $0x320] ss:$16 sps:$4 sm:$0xff]   ;;  %v6826_v11 = vpack.c.bf16 %v2260_v6, %v2260_v6  ;;  %v5779_v6 = vld [vmem:[#allocation5 + $0x168] ss:$16 sps:$4 sm:$0xff]  }
 0x44a   : > { %3914 = vmatprep.subr.bf16.mxu0 %v5646_v22  ;;  %v5674_v48 = vld [vmem:[#allocation5 + $0x144] ss:$16 sps:$4 sm:$0xff]   ;;  %v5678_v51 = vld [vmem:[#allocation5 + $0x140] ss:$16 sps:$4 sm:$0xff]   ;;  %v6828_v22 = vpack.c.bf16 %v2268_v7, %v2268_v7 }
 0x44b   : > { %v5676_v49 = vld [vmem:[#allocation5 + $0x344] ss:$16 sps:$4 sm:$0xff]   ;;  %v5679_v36 = vld [vmem:[#allocation5 + $0x340] ss:$16 sps:$4 sm:$0xff]  }
 0x44c   : > { %3874 = vmatpush1.bf16.msra.mxu1 %v5648_v23  ;;  %v5680_v52 = vld [vmem:[#allocation5 + $0x164] ss:$16 sps:$4 sm:$0xff]   ;;  %v5684_v54 = vld [vmem:[#allocation5 + $0x160] ss:$16 sps:$4 sm:$0xff]   ;;  %v5713_v23 = vld [vmem:[#allocation5 + $0x8] ss:$16 sps:$4 sm:$0xff]  }
 0x44d   : > { %3915 = vmatpush1.bf16.msra.mxu0 %v5649_v25  ;;  %3875 = vmatprep.subr.bf16.mxu1 %v5650_v26  ;;  %v5682_v37 = vld [vmem:[#allocation5 + $0x364] ss:$16 sps:$4 sm:$0xff]   ;;  %v5685_v59 = vld [vmem:[#allocation5 + $0x360] ss:$16 sps:$4 sm:$0xff]   ;;  %v5721_v26 = vld [vmem:[#allocation5 + $0x2c] ss:$16 sps:$4 sm:$0xff]  }
 0x44e   : > { %3916 = vmatprep.subr.bf16.mxu0 %v5652_v27  ;;  %v5686_v44 = vld [vmem:[#allocation5 + $0x184] ss:$16 sps:$4 sm:$0xff]   ;;  %v5690_v9 = vld [vmem:[#allocation5 + $0x180] ss:$16 sps:$4 sm:$0xff]   ;;  %v6830_v27 = vpack.c.bf16 %v2280_v50, %v2280_v50 }
 0x44f   : > { %v5688_v60 = vld [vmem:[#allocation5 + $0x384] ss:$16 sps:$4 sm:$0xff]   ;;  %v5691_v19 = vld [vmem:[#allocation5 + $0x380] ss:$16 sps:$4 sm:$0xff]  }
 0x450   : > { %3876 = vmatpush1.bf16.msra.mxu1 %v5654_v28  ;;  %v5692_v12 = vld [vmem:[#allocation5 + $0x1a4] ss:$16 sps:$4 sm:$0xff]   ;;  %v5696_v62 = vld [vmem:[#allocation5 + $0x1a0] ss:$16 sps:$4 sm:$0xff]  }
 0x451   : > { %3917 = vmatpush1.bf16.msra.mxu0 %v5655_v29  ;;  %3877 = vmatprep.subr.bf16.mxu1 %v5656_v30  ;;  %v5694_v24 = vld [vmem:[#allocation5 + $0x3a4] ss:$16 sps:$4 sm:$0xff]   ;;  %v5697_v14 = vld [vmem:[#allocation5 + $0x3a0] ss:$16 sps:$4 sm:$0xff]   ;;  %v5727_v30 = vld [vmem:[#allocation5 + $0x4c] ss:$16 sps:$4 sm:$0xff]  }
 0x452   : > { %3918 = vmatprep.subr.bf16.mxu0 %v5658_v31  ;;  %v5698_v1 = vld [vmem:[#allocation5 + $0x1c4] ss:$16 sps:$4 sm:$0xff]   ;;  %v5702_v3 = vld [vmem:[#allocation5 + $0x1c0] ss:$16 sps:$4 sm:$0xff]  }
 0x453   : > { %v5700_v2 = vld [vmem:[#allocation5 + $0x3c4] ss:$16 sps:$4 sm:$0xff]   ;;  %v5703_v4 = vld [vmem:[#allocation5 + $0x3c0] ss:$16 sps:$4 sm:$0xff]  }
 0x454   : > { %3878 = vmatpush1.bf16.msra.mxu1 %v5660_v32  ;;  %v5704_v16 = vld [vmem:[#allocation5 + $0x1e4] ss:$16 sps:$4 sm:$0xff]   ;;  %v5708_v17 = vld [vmem:[#allocation5 + $0x1e0] ss:$16 sps:$4 sm:$0xff]   ;;  %v5725_v32 = vld [vmem:[#allocation5 + $0x48] ss:$16 sps:$4 sm:$0xff]  }
 0x455   : > { %3919 = vmatpush1.bf16.msra.mxu0 %v5661_v33  ;;  %3879 = vmatprep.subr.bf16.mxu1 %v5662_v34  ;;  %v5706_v5 = vld [vmem:[#allocation5 + $0x3e4] ss:$16 sps:$4 sm:$0xff]   ;;  %v5709_v8 = vld [vmem:[#allocation5 + $0x3e0] ss:$16 sps:$4 sm:$0xff]   ;;  %v5733_v34 = vld [vmem:[#allocation5 + $0x6c] ss:$16 sps:$4 sm:$0xff]  }
 0x456   : > { %3920 = vmatprep.subr.bf16.mxu0 %v5664_v35  ;;  %v5712_v20 = vld [vmem:[#allocation5 + $0x404] ss:$16 sps:$4 sm:$0xff]   ;;  %v5710_v21 = vld [vmem:[#allocation5 + $0x400] ss:$16 sps:$4 sm:$0xff]  }
 0x457   : > { %v5718_v25 = vld [vmem:[#allocation5 + $0x424] ss:$16 sps:$4 sm:$0xff]   ;;  %v5716_v28 = vld [vmem:[#allocation5 + $0x420] ss:$16 sps:$4 sm:$0xff]  }
 0x458   : > { %3880 = vmatpush1.bf16.msra.mxu1 %v5666_v38  ;;  %v5724_v29 = vld [vmem:[#allocation5 + $0x444] ss:$16 sps:$4 sm:$0xff]   ;;  %v5722_v31 = vld [vmem:[#allocation5 + $0x440] ss:$16 sps:$4 sm:$0xff]   ;;  %v5731_v38 = vld [vmem:[#allocation5 + $0x68] ss:$16 sps:$4 sm:$0xff]  }
 0x459   : > { %3921 = vmatpush1.bf16.msra.mxu0 %v5667_v39  ;;  %3881 = vmatprep.subr.bf16.mxu1 %v5668_v40  ;;  %v5730_v33 = vld [vmem:[#allocation5 + $0x464] ss:$16 sps:$4 sm:$0xff]   ;;  %v5728_v35 = vld [vmem:[#allocation5 + $0x460] ss:$16 sps:$4 sm:$0xff]   ;;  %v5739_v40 = vld [vmem:[#allocation5 + $0x8c] ss:$16 sps:$4 sm:$0xff]  }
 0x45a   : > { %3922 = vmatprep.subr.bf16.mxu0 %v5670_v43  ;;  %v5736_v39 = vld [vmem:[#allocation5 + $0x484] ss:$16 sps:$4 sm:$0xff]   ;;  %v5734_v43 = vld [vmem:[#allocation5 + $0x480] ss:$16 sps:$4 sm:$0xff]  }
 0x45b   : > { %v5754_v55 = vld [vmem:[#allocation5 + $0x4e4] ss:$16 sps:$4 sm:$0xff]  }
 0x45c   : > { %3882 = vmatpush1.bf16.msra.mxu1 %v5672_v46  ;;  %v5737_v46 = vld [vmem:[#allocation5 + $0x88] ss:$16 sps:$4 sm:$0xff]   ;;  %v5784_v7 = vld [vmem:[#allocation5 + $0x584] ss:$16 sps:$4 sm:$0xff]  }
 0x45d   : > { %3923 = vmatpush1.bf16.msra.mxu0 %v5673_v47  ;;  %3883 = vmatprep.subr.bf16.mxu1 %v5674_v48  ;;  %v5742_v47 = vld [vmem:[#allocation5 + $0x4a4] ss:$16 sps:$4 sm:$0xff]   ;;  %v5745_v48 = vld [vmem:[#allocation5 + $0xac] ss:$16 sps:$4 sm:$0xff]  }
 0x45e   : > { %3924 = vmatprep.subr.bf16.mxu0 %v5676_v49  ;;  %v5740_v49 = vld [vmem:[#allocation5 + $0x4a0] ss:$16 sps:$4 sm:$0xff]   ;;  %v5790_v50 = vld [vmem:[#allocation5 + $0x5a4] ss:$16 sps:$4 sm:$0xff]  }
 0x45f   : > { %v6000_v41 = vld [vmem:[#allocation7 + $0x4] ss:$8 sps:$4 sm:$0xff]  }
 0x460   : > { %3884 = vmatpush1.bf16.msra.mxu1 %v5678_v51  ;;  %v5743_v51 = vld [vmem:[#allocation5 + $0xa8] ss:$16 sps:$4 sm:$0xff]  }
 0x461   : > { %3925 = vmatpush1.bf16.msra.mxu0 %v5679_v36  ;;  %3885 = vmatprep.subr.bf16.mxu1 %v5680_v52  ;;  %v5748_v36 = vld [vmem:[#allocation5 + $0x4c4] ss:$16 sps:$4 sm:$0xff]   ;;  %v5751_v52 = vld [vmem:[#allocation5 + $0xcc] ss:$16 sps:$4 sm:$0xff]  }
 0x462   : > { %3926 = vmatprep.subr.bf16.mxu0 %v5682_v37  ;;  %v5746_v37 = vld [vmem:[#allocation5 + $0x4c0] ss:$16 sps:$4 sm:$0xff]  }
 0x464   : > { %3886 = vmatpush1.bf16.msra.mxu1 %v5684_v54  ;;  %v5749_v54 = vld [vmem:[#allocation5 + $0xc8] ss:$16 sps:$4 sm:$0xff]  }
 0x465   : > { %3927 = vmatpush1.bf16.msra.mxu0 %v5685_v59  ;;  %3887 = vmatprep.subr.bf16.mxu1 %v5686_v44  ;;  %v5752_v59 = vld [vmem:[#allocation5 + $0x4e0] ss:$16 sps:$4 sm:$0xff]   ;;  %v5755_v44 = vld [vmem:[#allocation5 + $0xe8] ss:$16 sps:$4 sm:$0xff]  }
 0x466   : > { %3928 = vmatprep.subr.bf16.mxu0 %v5688_v60  ;;  %v5760_v60 = vld [vmem:[#allocation5 + $0x504] ss:$16 sps:$4 sm:$0xff]  }
 0x468   : > { %3888 = vmatpush1.bf16.msra.mxu1 %v5690_v9  ;;  %v5758_v9 = vld [vmem:[#allocation5 + $0x500] ss:$16 sps:$4 sm:$0xff]  }
 0x469   : > { %3929 = vmatpush1.bf16.msra.mxu0 %v5691_v19  ;;  %3889 = vmatprep.subr.bf16.mxu1 %v5692_v12  ;;  %v5761_v19 = vld [vmem:[#allocation5 + $0x108] ss:$16 sps:$4 sm:$0xff]   ;;  %v5766_v12 = vld [vmem:[#allocation5 + $0x524] ss:$16 sps:$4 sm:$0xff]  }
 0x46a   : > { %3930 = vmatprep.subr.bf16.mxu0 %v5694_v24  ;;  %v5769_v24 = vld [vmem:[#allocation5 + $0x12c] ss:$16 sps:$4 sm:$0xff]  }
 0x46c   : > { %3890 = vmatpush1.bf16.msra.mxu1 %v5696_v62  ;;  %v5764_v62 = vld [vmem:[#allocation5 + $0x520] ss:$16 sps:$4 sm:$0xff]  }
 0x46d   : > { %3931 = vmatpush1.bf16.msra.mxu0 %v5697_v14  ;;  %3891 = vmatprep.subr.bf16.mxu1 %v5698_v1  ;;  %v5767_v14 = vld [vmem:[#allocation5 + $0x128] ss:$16 sps:$4 sm:$0xff]   ;;  %v5772_v1 = vld [vmem:[#allocation5 + $0x544] ss:$16 sps:$4 sm:$0xff]  }
 0x46e   : > { %3932 = vmatprep.subr.bf16.mxu0 %v5700_v2  ;;  %v5775_v2 = vld [vmem:[#allocation5 + $0x14c] ss:$16 sps:$4 sm:$0xff]  }
 0x470   : > { %3892 = vmatpush1.bf16.msra.mxu1 %v5702_v3  ;;  %v5770_v3 = vld [vmem:[#allocation5 + $0x540] ss:$16 sps:$4 sm:$0xff]  }
 0x471   : > { %3933 = vmatpush1.bf16.msra.mxu0 %v5703_v4  ;;  %3893 = vmatprep.subr.bf16.mxu1 %v5704_v16  ;;  %v5773_v4 = vld [vmem:[#allocation5 + $0x148] ss:$16 sps:$4 sm:$0xff]   ;;  %v5778_v16 = vld [vmem:[#allocation5 + $0x564] ss:$16 sps:$4 sm:$0xff]  }
 0x472   : > { %3934 = vmatprep.subr.bf16.mxu0 %v5706_v5  ;;  %v5781_v5 = vld [vmem:[#allocation5 + $0x16c] ss:$16 sps:$4 sm:$0xff]  }
 0x474   : > { %3894 = vmatpush1.bf16.msra.mxu1 %v5708_v17  ;;  %v5776_v17 = vld [vmem:[#allocation5 + $0x560] ss:$16 sps:$4 sm:$0xff]  }
 0x475   : > { %3935 = vmatpush1.bf16.msra.mxu0 %v5709_v8  ;;  %4027 = vmatprep.subr.bf16.mxu1 %v5715_v10  ;;  %v5787_v8 = vld [vmem:[#allocation5 + $0x18c] ss:$16 sps:$4 sm:$0xff]   ;;  %v5785_v10 = vld [vmem:[#allocation5 + $0x188] ss:$16 sps:$4 sm:$0xff]  }
 0x476   : > { %3945 = vmatprep.subr.bf16.mxu0 %v5712_v20  ;;  %v5782_v20 = vld [vmem:[#allocation5 + $0x580] ss:$16 sps:$4 sm:$0xff]  }
 0x477   : > { %3896 = vmatmul.mubr.bf16.vlgmr.msra.gmra.mrb[0].mxu1 %v6826_v11 }
 0x478   : > { %3937 = vmatmul.mubr.bf16.vlgmr.msra.gmra.mrb[0].mxu0 %v6828_v22  ;;  %4028 = vmatpush1.bf16.msra.mxu1 %v5713_v23  ;;  %v5788_v23 = vld [vmem:[#allocation5 + $0x5a0] ss:$16 sps:$4 sm:$0xff]  }
 0x479   : > { %3946 = vmatpush1.bf16.msra.mxu0 %v5710_v21  ;;  %4029 = vmatprep.subr.bf16.mxu1 %v5721_v26  ;;  %v5793_v21 = vld [vmem:[#allocation5 + $0x1ac] ss:$16 sps:$4 sm:$0xff]   ;;  %v5796_v26 = vld [vmem:[#allocation5 + $0x5c4] ss:$16 sps:$4 sm:$0xff]  }
 0x47a   : > { %3947 = vmatprep.subr.bf16.mxu0 %v5718_v25  ;;  %3977 = vmatprep.mubr.bf16.mxu0 %v6830_v27  ;;  %v5791_v25 = vld [vmem:[#allocation5 + $0x1a8] ss:$16 sps:$4 sm:$0xff]  }
 0x47b   : > { %4059 = vmatprep.mubr.bf16.mxu1 %v2298_v45  ;;  %v5763_v45 = vld [vmem:[#allocation5 + $0x10c] ss:$16 sps:$4 sm:$0xff]  }
 0x47c   : > { %4030 = vmatpush1.bf16.msra.mxu1 %v5719_v63  ;;  %v5794_v63 = vld [vmem:[#allocation5 + $0x5c0] ss:$16 sps:$4 sm:$0xff]  }
 0x47d   : > { %3948 = vmatpush1.bf16.msra.mxu0 %v5716_v28  ;;  %4031 = vmatprep.subr.bf16.mxu1 %v5727_v30  ;;  %v5799_v28 = vld [vmem:[#allocation5 + $0x1cc] ss:$16 sps:$4 sm:$0xff]   ;;  %v5802_v30 = vld [vmem:[#allocation5 + $0x5e4] ss:$16 sps:$4 sm:$0xff]  }
 0x47e   : > { %3949 = vmatprep.subr.bf16.mxu0 %v5724_v29  ;;  %v5797_v29 = vld [vmem:[#allocation5 + $0x1c8] ss:$16 sps:$4 sm:$0xff]  }
 0x480   : > { %4032 = vmatpush1.bf16.msra.mxu1 %v5725_v32  ;;  %v5800_v32 = vld [vmem:[#allocation5 + $0x5e0] ss:$16 sps:$4 sm:$0xff]  }
 0x481   : > { %3950 = vmatpush1.bf16.msra.mxu0 %v5722_v31  ;;  %4033 = vmatprep.subr.bf16.mxu1 %v5733_v34  ;;  %v5805_v31 = vld [vmem:[#allocation5 + $0x1ec] ss:$16 sps:$4 sm:$0xff]   ;;  %v5803_v34 = vld [vmem:[#allocation5 + $0x1e8] ss:$16 sps:$4 sm:$0xff]  }
 0x482   : > { %3951 = vmatprep.subr.bf16.mxu0 %v5730_v33  ;;  %v2276_v33 = vrot.slane %v6810_v53, %v1033_v57  ;;  %v5814_v57 = vld [vmem:[#allocation5 + $0x624] ss:$16 sps:$4 sm:$0xff]  }
 0x484   : > { %4034 = vmatpush1.bf16.msra.mxu1 %v5731_v38  ;;  %v5811_v38 = vld [vmem:[#allocation5 + $0x20c] ss:$16 sps:$4 sm:$0xff]  }
 0x485   : > { %3952 = vmatpush1.bf16.msra.mxu0 %v5728_v35  ;;  %4035 = vmatprep.subr.bf16.mxu1 %v5739_v40  ;;  %v5808_v35 = vld [vmem:[#allocation5 + $0x604] ss:$16 sps:$4 sm:$0xff]   ;;  %v5806_v40 = vld [vmem:[#allocation5 + $0x600] ss:$16 sps:$4 sm:$0xff]  }
 0x486   : > { %3953 = vmatprep.subr.bf16.mxu0 %v5736_v39  ;;  %v2288_v39 = vrot.slane %v6810_v53, %v1045_v0  ;;  %v5815_v0 = vld [vmem:[#allocation5 + $0x228] ss:$16 sps:$4 sm:$0xff]   ;;  %v5820_v53 = vld [vmem:[#allocation5 + $0x644] ss:$16 sps:$4 sm:$0xff]  }
 0x488   : > { %4036 = vmatpush1.bf16.msra.mxu1 %v5737_v46  ;;  %v5809_v46 = vld [vmem:[#allocation5 + $0x208] ss:$16 sps:$4 sm:$0xff]  }
 0x489   : > { %3954 = vmatpush1.bf16.msra.mxu0 %v5734_v43  ;;  %4037 = vmatprep.subr.bf16.mxu1 %v5745_v48  ;;  %v6841_v43 = vpack.c.bf16 %v2276_v33, %v2276_v33  ;;  %v6843_v48 = vpack.c.bf16 %v2288_v39, %v2288_v39  ;;  %v5881_v33 = vld [vmem:[#allocation5 + $0x388] ss:$16 sps:$4 sm:$0xff]  }
 0x48a   : > { %3955 = vmatprep.subr.bf16.mxu0 %v5742_v47  ;;  %v5817_v47 = vld [vmem:[#allocation5 + $0x22c] ss:$16 sps:$4 sm:$0xff]   ;;  %v5887_v39 = vld [vmem:[#allocation5 + $0x3a8] ss:$16 sps:$4 sm:$0xff]  }
 0x48c   : > { %4038 = vmatpush1.bf16.msra.mxu1 %v5743_v51  ;;  %v5823_v51 = vld [vmem:[#allocation5 + $0x24c] ss:$16 sps:$4 sm:$0xff]  }
 0x48d   : > { %3956 = vmatpush1.bf16.msra.mxu0 %v5740_v49  ;;  %4039 = vmatprep.subr.bf16.mxu1 %v5751_v52  ;;  %v5812_v49 = vld [vmem:[#allocation5 + $0x620] ss:$16 sps:$4 sm:$0xff]   ;;  %v5821_v52 = vld [vmem:[#allocation5 + $0x248] ss:$16 sps:$4 sm:$0xff]  }
 0x48e   : > { %3957 = vmatprep.subr.bf16.mxu0 %v5748_v36  ;;  %v5818_v36 = vld [vmem:[#allocation5 + $0x640] ss:$16 sps:$4 sm:$0xff]  }
 0x490   : > { %4040 = vmatpush1.bf16.msra.mxu1 %v5749_v54  ;;  %v5824_v54 = vld [vmem:[#allocation5 + $0x660] ss:$16 sps:$4 sm:$0xff]  }
 0x491   : > { %3958 = vmatpush1.bf16.msra.mxu0 %v5746_v37  ;;  %4041 = vmatprep.subr.bf16.mxu1 %v5757_v56  ;;  %v5826_v37 = vld [vmem:[#allocation5 + $0x664] ss:$16 sps:$4 sm:$0xff]  }
 0x492   : > { %3959 = vmatprep.subr.bf16.mxu0 %v5754_v55  ;;  %v5827_v55 = vld [vmem:[#allocation5 + $0x268] ss:$16 sps:$4 sm:$0xff]   ;;  %v5832_v56 = vld [vmem:[#allocation5 + $0x684] ss:$16 sps:$4 sm:$0xff]  }
 0x494   : > { %4042 = vmatpush1.bf16.msra.mxu1 %v5755_v44  ;;  %v5830_v44 = vld [vmem:[#allocation5 + $0x680] ss:$16 sps:$4 sm:$0xff]  }
 0x495   : > { %3960 = vmatpush1.bf16.msra.mxu0 %v5752_v59  ;;  %4043 = vmatprep.subr.bf16.mxu1 %v5763_v45  ;;  %v5835_v59 = vld [vmem:[#allocation5 + $0x28c] ss:$16 sps:$4 sm:$0xff]  }
 0x496   : > { %3961 = vmatprep.subr.bf16.mxu0 %v5760_v60  ;;  %v5838_v60 = vld [vmem:[#allocation5 + $0x6a4] ss:$16 sps:$4 sm:$0xff]   ;;  %v5841_v45 = vld [vmem:[#allocation5 + $0x2ac] ss:$16 sps:$4 sm:$0xff]  }
 0x498   : > { %4044 = vmatpush1.bf16.msra.mxu1 %v5761_v19  ;;  %v5839_v19 = vld [vmem:[#allocation5 + $0x2a8] ss:$16 sps:$4 sm:$0xff]  }
 0x499   : > { %3962 = vmatpush1.bf16.msra.mxu0 %v5758_v9  ;;  %4045 = vmatprep.subr.bf16.mxu1 %v5769_v24  ;;  %v5836_v9 = vld [vmem:[#allocation5 + $0x6a0] ss:$16 sps:$4 sm:$0xff]   ;;  %v5847_v24 = vld [vmem:[#allocation5 + $0x2cc] ss:$16 sps:$4 sm:$0xff]  }
 0x49a   : > { %3963 = vmatprep.subr.bf16.mxu0 %v5766_v12  ;;  %v5844_v12 = vld [vmem:[#allocation5 + $0x6c4] ss:$16 sps:$4 sm:$0xff]  }
 0x49c   : > { %4046 = vmatpush1.bf16.msra.mxu1 %v5767_v14  ;;  %v5845_v14 = vld [vmem:[#allocation5 + $0x2c8] ss:$16 sps:$4 sm:$0xff]  }
 0x49d   : > { %3964 = vmatpush1.bf16.msra.mxu0 %v5764_v62  ;;  %4047 = vmatprep.subr.bf16.mxu1 %v5775_v2  ;;  %v5842_v62 = vld [vmem:[#allocation5 + $0x6c0] ss:$16 sps:$4 sm:$0xff]   ;;  %v5853_v2 = vld [vmem:[#allocation5 + $0x2ec] ss:$16 sps:$4 sm:$0xff]  }
 0x49e   : > { %3965 = vmatprep.subr.bf16.mxu0 %v5772_v1  ;;  %v5850_v1 = vld [vmem:[#allocation5 + $0x6e4] ss:$16 sps:$4 sm:$0xff]  }
 0x4a0   : > { %4048 = vmatpush1.bf16.msra.mxu1 %v5773_v4  ;;  %v5851_v4 = vld [vmem:[#allocation5 + $0x2e8] ss:$16 sps:$4 sm:$0xff]  }
 0x4a1   : > { %3966 = vmatpush1.bf16.msra.mxu0 %v5770_v3  ;;  %4049 = vmatprep.subr.bf16.mxu1 %v5781_v5  ;;  %v5848_v3 = vld [vmem:[#allocation5 + $0x6e0] ss:$16 sps:$4 sm:$0xff]   ;;  %v5859_v5 = vld [vmem:[#allocation5 + $0x30c] ss:$16 sps:$4 sm:$0xff]  }
 0x4a2   : > { %3967 = vmatprep.subr.bf16.mxu0 %v5778_v16  ;;  %v5856_v16 = vld [vmem:[#allocation5 + $0x704] ss:$16 sps:$4 sm:$0xff]  }
 0x4a4   : > { %4050 = vmatpush1.bf16.msra.mxu1 %v5779_v6  ;;  %v5857_v6 = vld [vmem:[#allocation5 + $0x308] ss:$16 sps:$4 sm:$0xff]  }
 0x4a5   : > { %3968 = vmatpush1.bf16.msra.mxu0 %v5776_v17  ;;  %4051 = vmatprep.subr.bf16.mxu1 %v5787_v8  ;;  %v5854_v17 = vld [vmem:[#allocation5 + $0x700] ss:$16 sps:$4 sm:$0xff]   ;;  %v5865_v8 = vld [vmem:[#allocation5 + $0x32c] ss:$16 sps:$4 sm:$0xff]  }
 0x4a6   : > { %3969 = vmatprep.subr.bf16.mxu0 %v5784_v7  ;;  %v5862_v7 = vld [vmem:[#allocation5 + $0x724] ss:$16 sps:$4 sm:$0xff]  }
 0x4a8   : > { %4052 = vmatpush1.bf16.msra.mxu1 %v5785_v10  ;;  %v5863_v10 = vld [vmem:[#allocation5 + $0x328] ss:$16 sps:$4 sm:$0xff]  }
 0x4a9   : > { %3970 = vmatpush1.bf16.msra.mxu0 %v5782_v20  ;;  %4053 = vmatprep.subr.bf16.mxu1 %v5793_v21  ;;  %v5860_v20 = vld [vmem:[#allocation5 + $0x720] ss:$16 sps:$4 sm:$0xff]   ;;  %v5871_v21 = vld [vmem:[#allocation5 + $0x34c] ss:$16 sps:$4 sm:$0xff]  }
 0x4aa   : > { %3971 = vmatprep.subr.bf16.mxu0 %v5790_v50  ;;  %v5868_v50 = vld [vmem:[#allocation5 + $0x744] ss:$16 sps:$4 sm:$0xff]  }
 0x4ac   : > { %4054 = vmatpush1.bf16.msra.mxu1 %v5791_v25  ;;  %v5869_v25 = vld [vmem:[#allocation5 + $0x348] ss:$16 sps:$4 sm:$0xff]  }
 0x4ad   : > { %3972 = vmatpush1.bf16.msra.mxu0 %v5788_v23  ;;  %4055 = vmatprep.subr.bf16.mxu1 %v5799_v28  ;;  %v5866_v23 = vld [vmem:[#allocation5 + $0x740] ss:$16 sps:$4 sm:$0xff]   ;;  %v5877_v28 = vld [vmem:[#allocation5 + $0x36c] ss:$16 sps:$4 sm:$0xff]  }
 0x4ae   : > { %3973 = vmatprep.subr.bf16.mxu0 %v5796_v26  ;;  %v5874_v26 = vld [vmem:[#allocation5 + $0x764] ss:$16 sps:$4 sm:$0xff]  }
 0x4b0   : > { %4056 = vmatpush1.bf16.msra.mxu1 %v5797_v29  ;;  %v5875_v29 = vld [vmem:[#allocation5 + $0x368] ss:$16 sps:$4 sm:$0xff]  }
 0x4b1   : > { %3974 = vmatpush1.bf16.msra.mxu0 %v5794_v63  ;;  %4057 = vmatprep.subr.bf16.mxu1 %v5805_v31  ;;  %v5872_v63 = vld [vmem:[#allocation5 + $0x760] ss:$16 sps:$4 sm:$0xff]   ;;  %v5883_v31 = vld [vmem:[#allocation5 + $0x38c] ss:$16 sps:$4 sm:$0xff]  }
 0x4b2   : > { %3975 = vmatprep.subr.bf16.mxu0 %v5802_v30  ;;  %v5880_v30 = vld [vmem:[#allocation5 + $0x784] ss:$16 sps:$4 sm:$0xff]  }
 0x4b4   : > { %4058 = vmatpush1.bf16.msra.mxu1 %v5803_v34  ;;  %v5886_v34 = vld [vmem:[#allocation5 + $0x7a4] ss:$16 sps:$4 sm:$0xff]  }
 0x4b5   : > { %3976 = vmatpush1.bf16.msra.mxu0 %v5800_v32  ;;  %4068 = vmatprep.subr.bf16.mxu1 %v5811_v38  ;;  %v5878_v32 = vld [vmem:[#allocation5 + $0x780] ss:$16 sps:$4 sm:$0xff]  }
 0x4b6   : > { %3986 = vmatprep.subr.bf16.mxu0 %v5808_v35  ;;  %v5889_v35 = vld [vmem:[#allocation5 + $0x3ac] ss:$16 sps:$4 sm:$0xff]   ;;  %v5884_v38 = vld [vmem:[#allocation5 + $0x7a0] ss:$16 sps:$4 sm:$0xff]  }
 0x4b7   : > { %4060 = vmatmul.mubr.bf16.vlgmr.msra.gmra.mrb[4].mxu1 %v6826_v11  ;;  %v5829_v11 = vld [vmem:[#allocation5 + $0x26c] ss:$16 sps:$4 sm:$0xff]  }
 0x4b8   : > { %3978 = vmatmul.mubr.bf16.vlgmr.msra.gmra.mrb[0].mxu0 %v6841_v43  ;;  %4069 = vmatpush1.bf16.msra.mxu1 %v5809_v46  ;;  %v5895_v46 = vld [vmem:[#allocation5 + $0x3cc] ss:$16 sps:$4 sm:$0xff]  }
 0x4b9   : > { %3987 = vmatpush1.bf16.msra.mxu0 %v5806_v40  ;;  %4070 = vmatprep.subr.bf16.mxu1 %v5817_v47  ;;  %v5892_v40 = vld [vmem:[#allocation5 + $0x7c4] ss:$16 sps:$4 sm:$0xff]   ;;  %v5893_v47 = vld [vmem:[#allocation5 + $0x3c8] ss:$16 sps:$4 sm:$0xff]  }
 0x4ba   : > { %3988 = vmatprep.subr.bf16.mxu0 %v5814_v57  ;;  %4018 = vmatprep.mubr.bf16.mxu0 %v6843_v48  ;;  %v5890_v57 = vld [vmem:[#allocation5 + $0x7c0] ss:$16 sps:$4 sm:$0xff]  }
 0x4bb   : > { %4100 = vmatprep.mubr.bf16.mxu1 %v6816_v61  ;;  %v5833_v61 = vld [vmem:[#allocation5 + $0x288] ss:$16 sps:$4 sm:$0xff]  }
 0x4bc   : > { %4071 = vmatpush1.bf16.msra.mxu1 %v5815_v0  ;;  %v5901_v0 = vld [vmem:[#allocation5 + $0x3ec] ss:$16 sps:$4 sm:$0xff]  }
 0x4bd   : > { %3989 = vmatpush1.bf16.msra.mxu0 %v5812_v49  ;;  %4072 = vmatprep.subr.bf16.mxu1 %v5823_v51  ;;  %v5898_v49 = vld [vmem:[#allocation5 + $0x7e4] ss:$16 sps:$4 sm:$0xff]   ;;  %v6110_v51 = vld [vmem:[#allocation2] sm:$0xff] }
 0x4be   : > { %3990 = vmatprep.subr.bf16.mxu0 %v5820_v53  ;;  %v5896_v53 = vld [vmem:[#allocation5 + $0x7e0] ss:$16 sps:$4 sm:$0xff]  }
 0x4c0   : > { %4073 = vmatpush1.bf16.msra.mxu1 %v5821_v52  ;;  %v5899_v52 = vld [vmem:[#allocation5 + $0x3e8] ss:$16 sps:$4 sm:$0xff]  }
 0x4c1   : > { %3991 = vmatpush1.bf16.msra.mxu0 %v5818_v36  ;;  %4074 = vmatprep.subr.bf16.mxu1 %v5829_v11  ;;  %v2284_v36 = vrot.slane %v6110_v51, %v1041_v58  ;;  %v5902_v11 = vld [vmem:[#allocation5 + $0x408] ss:$16 sps:$4 sm:$0xff]  }
 0x4c2   : > { %3992 = vmatprep.subr.bf16.mxu0 %v5826_v37  ;;  %v5904_v37 = vld [vmem:[#allocation5 + $0x40c] ss:$16 sps:$4 sm:$0xff]   ;;  %v5905_v58 = vld [vmem:[#allocation5 + $0x428] ss:$16 sps:$4 sm:$0xff]  }
 0x4c3   : > { %v5941_v51 = vld [vmem:[#allocation5 + $0x5a8] ss:$16 sps:$4 sm:$0xff]  }
 0x4c4   : > { %4075 = vmatpush1.bf16.msra.mxu1 %v5827_v55  ;;  %v5907_v55 = vld [vmem:[#allocation5 + $0x42c] ss:$16 sps:$4 sm:$0xff]  }
 0x4c5   : > { %3993 = vmatpush1.bf16.msra.mxu0 %v5824_v54  ;;  %4076 = vmatprep.subr.bf16.mxu1 %v5835_v59  ;;  %v6851_v54 = vpack.c.bf16 %v2284_v36, %v2284_v36  ;;  %v6003_v59 = vld [vmem:[#allocation7 + $0x14] ss:$8 sps:$4 sm:$0xff]  }
 0x4c6   : > { %3994 = vmatprep.subr.bf16.mxu0 %v5832_v56  ;;  %v5998_v56 = vld [vmem:[#allocation7] ss:$8 sps:$4 sm:$0xff]   ;;  %v5946_v36 = vld [vmem:[#allocation5 + $0x5cc] ss:$16 sps:$4 sm:$0xff]  }
 0x4c8   : > { %4077 = vmatpush1.bf16.msra.mxu1 %v5833_v61  ;;  %v6001_v61 = vld [vmem:[#allocation7 + $0x10] ss:$8 sps:$4 sm:$0xff]  }
 0x4c9   : > { %3995 = vmatpush1.bf16.msra.mxu0 %v5830_v44  ;;  %4078 = vmatprep.subr.bf16.mxu1 %v5841_v45  ;;  %v5910_v44 = vld [vmem:[#allocation5 + $0x44c] ss:$16 sps:$4 sm:$0xff]   ;;  %v5908_v45 = vld [vmem:[#allocation5 + $0x448] ss:$16 sps:$4 sm:$0xff]  }
 0x4ca   : > { %3996 = vmatprep.subr.bf16.mxu0 %v5838_v60  ;;  %v6006_v60 = vld [vmem:[#allocation7 + $0x24] ss:$8 sps:$4 sm:$0xff]  }
 0x4cc   : > { %4079 = vmatpush1.bf16.msra.mxu1 %v5839_v19  ;;  %v5911_v19 = vld [vmem:[#allocation5 + $0x468] ss:$16 sps:$4 sm:$0xff]  }
 0x4cd   : > { %3997 = vmatpush1.bf16.msra.mxu0 %v5836_v9  ;;  %4080 = vmatprep.subr.bf16.mxu1 %v5847_v24  ;;  %v5913_v9 = vld [vmem:[#allocation5 + $0x46c] ss:$16 sps:$4 sm:$0xff]  }
 0x4ce   : > { %3998 = vmatprep.subr.bf16.mxu0 %v5844_v12  ;;  %v5916_v12 = vld [vmem:[#allocation5 + $0x48c] ss:$16 sps:$4 sm:$0xff]  }
 0x4cf   : > { %v6009_v24 = vld [vmem:[#allocation7 + $0x34] ss:$8 sps:$4 sm:$0xff]  }
 0x4d0   : > { %4081 = vmatpush1.bf16.msra.mxu1 %v5845_v14  ;;  %v5914_v14 = vld [vmem:[#allocation5 + $0x488] ss:$16 sps:$4 sm:$0xff]  }
 0x4d1   : > { %3999 = vmatpush1.bf16.msra.mxu0 %v5842_v62  ;;  %4082 = vmatprep.subr.bf16.mxu1 %v5853_v2  ;;  %v6012_v62 = vld [vmem:[#allocation7 + $0x44] ss:$8 sps:$4 sm:$0xff]   ;;  %v6010_v2 = vld [vmem:[#allocation7 + $0x40] ss:$8 sps:$4 sm:$0xff]  }
 0x4d2   : > { %4000 = vmatprep.subr.bf16.mxu0 %v5850_v1  ;;  %v5919_v1 = vld [vmem:[#allocation5 + $0x4ac] ss:$16 sps:$4 sm:$0xff]  }
 0x4d4   : > { %4083 = vmatpush1.bf16.msra.mxu1 %v5851_v4  ;;  %v5917_v4 = vld [vmem:[#allocation5 + $0x4a8] ss:$16 sps:$4 sm:$0xff]  }
 0x4d5   : > { %4001 = vmatpush1.bf16.msra.mxu0 %v5848_v3  ;;  %4084 = vmatprep.subr.bf16.mxu1 %v5859_v5  ;;  %v6015_v3 = vld [vmem:[#allocation7 + $0x54] ss:$8 sps:$4 sm:$0xff]   ;;  %v6013_v5 = vld [vmem:[#allocation7 + $0x50] ss:$8 sps:$4 sm:$0xff]  }
 0x4d6   : > { %4002 = vmatprep.subr.bf16.mxu0 %v5856_v16  ;;  %v5922_v16 = vld [vmem:[#allocation5 + $0x4cc] ss:$16 sps:$4 sm:$0xff]  }
 0x4d8   : > { %4085 = vmatpush1.bf16.msra.mxu1 %v5857_v6  ;;  %v5920_v6 = vld [vmem:[#allocation5 + $0x4c8] ss:$16 sps:$4 sm:$0xff]  }
 0x4d9   : > { %4003 = vmatpush1.bf16.msra.mxu0 %v5854_v17  ;;  %4086 = vmatprep.subr.bf16.mxu1 %v5865_v8  ;;  %v6018_v17 = vld [vmem:[#allocation7 + $0x64] ss:$8 sps:$4 sm:$0xff]   ;;  %v6016_v8 = vld [vmem:[#allocation7 + $0x60] ss:$8 sps:$4 sm:$0xff]  }
 0x4da   : > { %4004 = vmatprep.subr.bf16.mxu0 %v5862_v7  ;;  %v5925_v7 = vld [vmem:[#allocation5 + $0x4ec] ss:$16 sps:$4 sm:$0xff]  }
 0x4dc   : > { %4087 = vmatpush1.bf16.msra.mxu1 %v5863_v10  ;;  %v5923_v10 = vld [vmem:[#allocation5 + $0x4e8] ss:$16 sps:$4 sm:$0xff]  }
 0x4dd   : > { %4005 = vmatpush1.bf16.msra.mxu0 %v5860_v20  ;;  %4088 = vmatprep.subr.bf16.mxu1 %v5871_v21  ;;  %v6021_v20 = vld [vmem:[#allocation7 + $0x74] ss:$8 sps:$4 sm:$0xff]   ;;  %v6019_v21 = vld [vmem:[#allocation7 + $0x70] ss:$8 sps:$4 sm:$0xff]  }
 0x4de   : > { %4006 = vmatprep.subr.bf16.mxu0 %v5868_v50  ;;  %v5928_v50 = vld [vmem:[#allocation5 + $0x50c] ss:$16 sps:$4 sm:$0xff]  }
 0x4e0   : > { %4089 = vmatpush1.bf16.msra.mxu1 %v5869_v25  ;;  %v5926_v25 = vld [vmem:[#allocation5 + $0x508] ss:$16 sps:$4 sm:$0xff]  }
 0x4e1   : > { %4007 = vmatpush1.bf16.msra.mxu0 %v5866_v23  ;;  %4090 = vmatprep.subr.bf16.mxu1 %v5877_v28  ;;  %v6024_v23 = vld [vmem:[#allocation7 + $0x84] ss:$8 sps:$4 sm:$0xff]   ;;  %v6022_v28 = vld [vmem:[#allocation7 + $0x80] ss:$8 sps:$4 sm:$0xff]  }
 0x4e2   : > { %4008 = vmatprep.subr.bf16.mxu0 %v5874_v26  ;;  %v5931_v26 = vld [vmem:[#allocation5 + $0x52c] ss:$16 sps:$4 sm:$0xff]  }
 0x4e4   : > { %4091 = vmatpush1.bf16.msra.mxu1 %v5875_v29  ;;  %v5929_v29 = vld [vmem:[#allocation5 + $0x528] ss:$16 sps:$4 sm:$0xff]  }
 0x4e5   : > { %4009 = vmatpush1.bf16.msra.mxu0 %v5872_v63  ;;  %4092 = vmatprep.subr.bf16.mxu1 %v5883_v31  ;;  %v6027_v63 = vld [vmem:[#allocation7 + $0x94] ss:$8 sps:$4 sm:$0xff]   ;;  %v6025_v31 = vld [vmem:[#allocation7 + $0x90] ss:$8 sps:$4 sm:$0xff]  }
 0x4e6   : > { %4010 = vmatprep.subr.bf16.mxu0 %v5880_v30  ;;  %v5934_v30 = vld [vmem:[#allocation5 + $0x54c] ss:$16 sps:$4 sm:$0xff]  }
 0x4e8   : > { %4093 = vmatpush1.bf16.msra.mxu1 %v5881_v33  ;;  %v5932_v33 = vld [vmem:[#allocation5 + $0x548] ss:$16 sps:$4 sm:$0xff]  }
 0x4e9   : > { %4011 = vmatpush1.bf16.msra.mxu0 %v5878_v32  ;;  %4094 = vmatprep.subr.bf16.mxu1 %v5889_v35  ;;  %v6030_v32 = vld [vmem:[#allocation7 + $0xa4] ss:$8 sps:$4 sm:$0xff]   ;;  %v6028_v35 = vld [vmem:[#allocation7 + $0xa0] ss:$8 sps:$4 sm:$0xff]  }
 0x4ea   : > { %4012 = vmatprep.subr.bf16.mxu0 %v5886_v34  ;;  %v5937_v34 = vld [vmem:[#allocation5 + $0x56c] ss:$16 sps:$4 sm:$0xff]  }
 0x4ec   : > { %4095 = vmatpush1.bf16.msra.mxu1 %v5887_v39  ;;  %v5935_v39 = vld [vmem:[#allocation5 + $0x568] ss:$16 sps:$4 sm:$0xff]  }
 0x4ed   : > { %4013 = vmatpush1.bf16.msra.mxu0 %v5884_v38  ;;  %4096 = vmatprep.subr.bf16.mxu1 %v5895_v46  ;;  %v6033_v38 = vld [vmem:[#allocation7 + $0xb4] ss:$8 sps:$4 sm:$0xff]   ;;  %v6031_v46 = vld [vmem:[#allocation7 + $0xb0] ss:$8 sps:$4 sm:$0xff]  }
 0x4ee   : > { %4014 = vmatprep.subr.bf16.mxu0 %v5892_v40  ;;  %v5940_v40 = vld [vmem:[#allocation5 + $0x58c] ss:$16 sps:$4 sm:$0xff]  }
 0x4f0   : > { %4097 = vmatpush1.bf16.msra.mxu1 %v5893_v47  ;;  %v5938_v47 = vld [vmem:[#allocation5 + $0x588] ss:$16 sps:$4 sm:$0xff]  }
 0x4f1   : > { %4015 = vmatpush1.bf16.msra.mxu0 %v5890_v57  ;;  %4098 = vmatprep.subr.bf16.mxu1 %v5901_v0  ;;  %v6036_v57 = vld [vmem:[#allocation7 + $0xc4] ss:$8 sps:$4 sm:$0xff]   ;;  %v6034_v0 = vld [vmem:[#allocation7 + $0xc0] ss:$8 sps:$4 sm:$0xff]  }
 0x4f2   : > { %4016 = vmatprep.subr.bf16.mxu0 %v5898_v49  ;;  %v5943_v49 = vld [vmem:[#allocation5 + $0x5ac] ss:$16 sps:$4 sm:$0xff]  }
 0x4f4   : > { %4099 = vmatpush1.bf16.msra.mxu1 %v5899_v52  ;;  %v6037_v52 = vld [vmem:[#allocation7 + $0xd0] ss:$8 sps:$4 sm:$0xff]  }
 0x4f5   : > { %4017 = vmatpush1.bf16.msra.mxu0 %v5896_v53  ;;  %4109 = vmatprep.subr.bf16.mxu1 %v5904_v37  ;;  %v6039_v53 = vld [vmem:[#allocation7 + $0xd4] ss:$8 sps:$4 sm:$0xff]   ;;  %v5944_v37 = vld [vmem:[#allocation5 + $0x5c8] ss:$16 sps:$4 sm:$0xff]  }
 0x4f6   : > { %4595 = vmatprep.subr.bf16.mxu0 %v6000_v41  ;;  %v5950_v41 = vld [vmem:[#allocation5 + $0x608] ss:$16 sps:$4 sm:$0xff]  }
 0x4f7   : > { %4101 = vmatmul.mubr.bf16.vlgmr.msra.gmra.mrb[4].mxu1 %v6828_v22  ;;  %v6004_v22 = vld [vmem:[#allocation7 + $0x20] ss:$8 sps:$4 sm:$0xff]  }
 0x4f8   : > { %4019 = vmatmul.mubr.bf16.vlgmr.msra.gmra.mrb[0].mxu0 %v6851_v54  ;;  %4110 = vmatpush1.bf16.msra.mxu1 %v5902_v11  ;;  %v5949_v11 = vld [vmem:[#allocation5 + $0x5ec] ss:$16 sps:$4 sm:$0xff]  }
 0x4f9   : > { %4141 = vmatprep.mubr.bf16.mxu1 %v6830_v27  ;;  %4111 = vmatprep.subr.bf16.mxu1 %v5907_v55  ;;  %v6007_v27 = vld [vmem:[#allocation7 + $0x30] ss:$8 sps:$4 sm:$0xff]  }
 0x4fa   : > { %4596 = vmatpush1.bf16.msra.mxu0 %v5998_v56  ;;  %v5947_v55 = vld [vmem:[#allocation5 + $0x5e8] ss:$16 sps:$4 sm:$0xff]   ;;  %v5952_v56 = vld [vmem:[#allocation5 + $0x60c] ss:$16 sps:$4 sm:$0xff]  }
 0x4fb   : > { %4597 = vmatprep.subr.bf16.mxu0 %v6003_v59  ;;  %v5953_v59 = vld [vmem:[#allocation5 + $0x628] ss:$16 sps:$4 sm:$0xff]  }
 0x4fc   : > { %4112 = vmatpush1.bf16.msra.mxu1 %v5905_v58  ;;  %v5955_v58 = vld [vmem:[#allocation5 + $0x62c] ss:$16 sps:$4 sm:$0xff]  }
 0x4fd   : > { %4113 = vmatprep.subr.bf16.mxu1 %v5910_v44  ;;  %v5958_v44 = vld [vmem:[#allocation5 + $0x64c] ss:$16 sps:$4 sm:$0xff]  }
 0x4fe   : > { %4598 = vmatpush1.bf16.msra.mxu0 %v6001_v61  ;;  %v5956_v61 = vld [vmem:[#allocation5 + $0x648] ss:$16 sps:$4 sm:$0xff]  }
 0x4ff   : > { %4599 = vmatprep.subr.bf16.mxu0 %v6006_v60  ;;  %v5961_v60 = vld [vmem:[#allocation5 + $0x66c] ss:$16 sps:$4 sm:$0xff]  }
 0x500   : > { %4114 = vmatpush1.bf16.msra.mxu1 %v5908_v45  ;;  %v5959_v45 = vld [vmem:[#allocation5 + $0x668] ss:$16 sps:$4 sm:$0xff]  }
 0x501   : > { %4115 = vmatprep.subr.bf16.mxu1 %v5913_v9  ;;  %v5964_v9 = vld [vmem:[#allocation5 + $0x68c] ss:$16 sps:$4 sm:$0xff]  }
 0x502   : > { %4600 = vmatpush1.bf16.msra.mxu0 %v6004_v22  ;;  %v5962_v22 = vld [vmem:[#allocation5 + $0x688] ss:$16 sps:$4 sm:$0xff]  }
 0x503   : > { %4601 = vmatprep.subr.bf16.mxu0 %v6009_v24  ;;  %v6042_v24 = vld [vmem:[#allocation7 + $0xe4] ss:$8 sps:$4 sm:$0xff]  }
 0x504   : > { %4116 = vmatpush1.bf16.msra.mxu1 %v5911_v19  ;;  %v5967_v19 = vld [vmem:[#allocation5 + $0x6ac] ss:$16 sps:$4 sm:$0xff]  }
 0x505   : > { %4117 = vmatprep.subr.bf16.mxu1 %v5916_v12  ;;  %v5970_v12 = vld [vmem:[#allocation5 + $0x6cc] ss:$16 sps:$4 sm:$0xff]  }
 0x506   : > { %4602 = vmatpush1.bf16.msra.mxu0 %v6007_v27  ;;  %v6040_v27 = vld [vmem:[#allocation7 + $0xe0] ss:$8 sps:$4 sm:$0xff]  }
 0x507   : > { %4603 = vmatprep.subr.bf16.mxu0 %v6012_v62 }
 0x508   : > { %4118 = vmatpush1.bf16.msra.mxu1 %v5914_v14 }
 0x509   : > { %4119 = vmatprep.subr.bf16.mxu1 %v5919_v1  ;;  %v5968_v1 = vld [vmem:[#allocation5 + $0x6c8] ss:$16 sps:$4 sm:$0xff]  }
 0x50a   : > { %4604 = vmatpush1.bf16.msra.mxu0 %v6010_v2 }
 0x50b   : > { %4605 = vmatprep.subr.bf16.mxu0 %v6015_v3  ;;  %v5973_v3 = vld [vmem:[#allocation5 + $0x6ec] ss:$16 sps:$4 sm:$0xff]  }
 0x50c   : > { %4120 = vmatpush1.bf16.msra.mxu1 %v5917_v4  ;;  %v6045_v4 = vld [vmem:[#allocation7 + $0xf4] ss:$8 sps:$4 sm:$0xff]  }
 0x50d   : > { %4121 = vmatprep.subr.bf16.mxu1 %v5922_v16  ;;  %v6043_v16 = vld [vmem:[#allocation7 + $0xf0] ss:$8 sps:$4 sm:$0xff]  }
 0x50e   : > { %4606 = vmatpush1.bf16.msra.mxu0 %v6013_v5  ;;  %v5971_v5 = vld [vmem:[#allocation5 + $0x6e8] ss:$16 sps:$4 sm:$0xff]  }
 0x50f   : > { %4607 = vmatprep.subr.bf16.mxu0 %v6018_v17  ;;  %v5976_v17 = vld [vmem:[#allocation5 + $0x70c] ss:$16 sps:$4 sm:$0xff]  }
 0x510   : > { %4122 = vmatpush1.bf16.msra.mxu1 %v5920_v6  ;;  %v6048_v6 = vld [vmem:[#allocation7 + $0x104] ss:$8 sps:$4 sm:$0xff]  }
 0x511   : > { %4123 = vmatprep.subr.bf16.mxu1 %v5925_v7  ;;  %v5974_v7 = vld [vmem:[#allocation5 + $0x708] ss:$16 sps:$4 sm:$0xff]  }
 0x512   : > { %4608 = vmatpush1.bf16.msra.mxu0 %v6016_v8  ;;  %v5979_v8 = vld [vmem:[#allocation5 + $0x72c] ss:$16 sps:$4 sm:$0xff]  }
 0x513   : > { %4609 = vmatprep.subr.bf16.mxu0 %v6021_v20  ;;  %v5977_v20 = vld [vmem:[#allocation5 + $0x728] ss:$16 sps:$4 sm:$0xff]  }
 0x514   : > { %4124 = vmatpush1.bf16.msra.mxu1 %v5923_v10  ;;  %v5982_v10 = vld [vmem:[#allocation5 + $0x74c] ss:$16 sps:$4 sm:$0xff]  }
 0x515   : > { %4125 = vmatprep.subr.bf16.mxu1 %v5928_v50  ;;  %v5980_v50 = vld [vmem:[#allocation5 + $0x748] ss:$16 sps:$4 sm:$0xff]  }
 0x516   : > { %4610 = vmatpush1.bf16.msra.mxu0 %v6019_v21  ;;  %v5985_v21 = vld [vmem:[#allocation5 + $0x76c] ss:$16 sps:$4 sm:$0xff]  }
 0x517   : > { %4611 = vmatprep.subr.bf16.mxu0 %v6024_v23  ;;  %v5983_v23 = vld [vmem:[#allocation5 + $0x768] ss:$16 sps:$4 sm:$0xff]  }
 0x518   : > { %4126 = vmatpush1.bf16.msra.mxu1 %v5926_v25  ;;  %v5988_v25 = vld [vmem:[#allocation5 + $0x78c] ss:$16 sps:$4 sm:$0xff]  }
 0x519   : > { %4127 = vmatprep.subr.bf16.mxu1 %v5931_v26  ;;  %v5986_v26 = vld [vmem:[#allocation5 + $0x788] ss:$16 sps:$4 sm:$0xff]  }
 0x51a   : > { %4612 = vmatpush1.bf16.msra.mxu0 %v6022_v28  ;;  %v5991_v28 = vld [vmem:[#allocation5 + $0x7ac] ss:$16 sps:$4 sm:$0xff]  }
 0x51b   : > { %4613 = vmatprep.subr.bf16.mxu0 %v6027_v63  ;;  %v5989_v63 = vld [vmem:[#allocation5 + $0x7a8] ss:$16 sps:$4 sm:$0xff]  }
 0x51c   : > { %4128 = vmatpush1.bf16.msra.mxu1 %v5929_v29  ;;  %v5994_v29 = vld [vmem:[#allocation5 + $0x7cc] ss:$16 sps:$4 sm:$0xff]  }
 0x51d   : > { %4129 = vmatprep.subr.bf16.mxu1 %v5934_v30  ;;  %v5992_v30 = vld [vmem:[#allocation5 + $0x7c8] ss:$16 sps:$4 sm:$0xff]  }
 0x51e   : > { %4614 = vmatpush1.bf16.msra.mxu0 %v6025_v31  ;;  %v5997_v31 = vld [vmem:[#allocation5 + $0x7ec] ss:$16 sps:$4 sm:$0xff]  }
 0x51f   : > { %4615 = vmatprep.subr.bf16.mxu0 %v6030_v32  ;;  %v5995_v32 = vld [vmem:[#allocation5 + $0x7e8] ss:$16 sps:$4 sm:$0xff]  }
 0x520   : > { %4130 = vmatpush1.bf16.msra.mxu1 %v5932_v33  ;;  %v6862_v33 = vld [vmem:[%s6983_s19] sm:$0xf] }
 0x521   : > { %4131 = vmatprep.subr.bf16.mxu1 %v5937_v34  ;;  %v3846_v34 = vrot.slane %v6862_v33, %v6605_v42 }
 0x522   : > { %4616 = vmatpush1.bf16.msra.mxu0 %v6028_v35  ;;  %v3850_v35 = vrot.slane %v6862_v33, %v6616_v15 }
 0x523   : > { %4617 = vmatprep.subr.bf16.mxu0 %v6033_v38 }
 0x524   : > { %4132 = vmatpush1.bf16.msra.mxu1 %v5935_v39 }
 0x525   : > { %4133 = vmatprep.subr.bf16.mxu1 %v5940_v40 }
 0x526   : > { %4618 = vmatpush1.bf16.msra.mxu0 %v6031_v46 }
 0x527   : > { %4619 = vmatprep.subr.bf16.mxu0 %v6036_v57 }
 0x528   : > { %4134 = vmatpush1.bf16.msra.mxu1 %v5938_v47 }
 0x529   : > { %4135 = vmatprep.subr.bf16.mxu1 %v5943_v49 }
 0x52a   : > { %4620 = vmatpush1.bf16.msra.mxu0 %v6034_v0 }
 0x52b   : > { %4621 = vmatprep.subr.bf16.mxu0 %v6039_v53 }
 0x52c   : > { %4136 = vmatpush1.bf16.msra.mxu1 %v5941_v51 }
 0x52d   : > { %4137 = vmatprep.subr.bf16.mxu1 %v5946_v36  ;;  %v6046_v36 = vld [vmem:[#allocation7 + $0x100] ss:$8 sps:$4 sm:$0xff]  }
 0x52e   : > { %4622 = vmatpush1.bf16.msra.mxu0 %v6037_v52 }
 0x52f   : > { %4623 = vmatprep.subr.bf16.mxu0 %v6042_v24  ;;  %v6058_v24 = vld [vmem:[#allocation7 + $0x140] ss:$8 sps:$4 sm:$0xff]  }
 0x530   : > { %4138 = vmatpush1.bf16.msra.mxu1 %v5944_v37  ;;  %v6051_v37 = vld [vmem:[#allocation7 + $0x114] ss:$8 sps:$4 sm:$0xff]  }
 0x531   : > { %4139 = vmatprep.subr.bf16.mxu1 %v5949_v11  ;;  %v6094_v11 = vld [vmem:[%s6984_s11 + $0x40] sm:$0xff]  }
 0x532   : > { %4624 = vmatpush1.bf16.msra.mxu0 %v6040_v27  ;;  %v6103_v27 = vld [vmem:[%s6984_s11 + $0x20] sm:$0xff]  }
 0x533   : > { %4625 = vmatprep.subr.bf16.mxu0 %v6045_v4  ;;  %v6069_v4 = vld [vmem:[#allocation7 + $0x174] ss:$8 sps:$4 sm:$0xff]  }
 0x534   : > { %4140 = vmatpush1.bf16.msra.mxu1 %v5947_v55  ;;  %v6095_v55 = vld [vmem:[%s6984_s11] sm:$0xff]  }
 0x535   : > { %4150 = vmatprep.subr.bf16.mxu1 %v5952_v56  ;;  %v6096_v56 = vld [vmem:[%s6984_s11 + $0x48] sm:$0xff]  }
 0x536   : > { %4626 = vmatpush1.bf16.msra.mxu0 %v6043_v16  ;;  %v6067_v16 = vld [vmem:[#allocation7 + $0x170] ss:$8 sps:$4 sm:$0xff]  }
 0x537   : > { %4142 = vmatmul.mubr.bf16.vlgmr.msra.gmra.mrb[4].mxu1 %v6841_v43  ;;  %v5965_v43 = vld [vmem:[#allocation5 + $0x6a8] ss:$16 sps:$4 sm:$0xff]   ;;  %4636 = vmatprep.subr.bf16.mxu0 %v6048_v6  ;;  %v6075_v6 = vld [vmem:[#allocation7 + $0x194] ss:$8 sps:$4 sm:$0xff]  }
 0x538   : > { %4151 = vmatpush1.bf16.msra.mxu1 %v5950_v41  ;;  %4182 = vmatprep.mubr.bf16.mxu1 %v6843_v48  ;;  %v6049_v41 = vld [vmem:[#allocation7 + $0x110] ss:$8 sps:$4 sm:$0xff]  }
 0x539   : > { %4152 = vmatprep.subr.bf16.mxu1 %v5955_v58  ;;  %v6054_v58 = vld [vmem:[#allocation7 + $0x124] ss:$8 sps:$4 sm:$0xff]  }
 0x53c   : > { %4153 = vmatpush1.bf16.msra.mxu1 %v5953_v59  ;;  %v6097_v59 = vld [vmem:[%s6984_s11 + $0x8] sm:$0xff]  }
 0x53d   : > { %4154 = vmatprep.subr.bf16.mxu1 %v5958_v44  ;;  %v6098_v44 = vld [vmem:[%s6984_s11 + $0x50] sm:$0xff]  }
 0x540   : > { %4155 = vmatpush1.bf16.msra.mxu1 %v5956_v61  ;;  %v6052_v61 = vld [vmem:[#allocation7 + $0x120] ss:$8 sps:$4 sm:$0xff]  }
 0x541   : > { %4156 = vmatprep.subr.bf16.mxu1 %v5961_v60  ;;  %v6057_v60 = vld [vmem:[#allocation7 + $0x134] ss:$8 sps:$4 sm:$0xff]  }
 0x544   : > { %4157 = vmatpush1.bf16.msra.mxu1 %v5959_v45  ;;  %v6099_v45 = vld [vmem:[%s6984_s11 + $0x10] sm:$0xff]  }
 0x545   : > { %4158 = vmatprep.subr.bf16.mxu1 %v5964_v9  ;;  %v6100_v9 = vld [vmem:[%s6984_s11 + $0x58] sm:$0xff]  }
 0x548   : > { %4159 = vmatpush1.bf16.msra.mxu1 %v5962_v22  ;;  %v6055_v22 = vld [vmem:[#allocation7 + $0x130] ss:$8 sps:$4 sm:$0xff]  }
 0x549   : > { %4160 = vmatprep.subr.bf16.mxu1 %v5967_v19  ;;  %v6060_v19 = vld [vmem:[#allocation7 + $0x144] ss:$8 sps:$4 sm:$0xff]  }
 0x54a   : > { %v3897_v48 = vpop.f32.mrb[0].mxu1 }
 0x54b   : > { %v3899_v62 = vpop.f32.mrb[1].mxu1  ;;  %v3898_v38 = vadd.f32 %v3897_v48, %v3846_v34  ;;  %v6063_v48 = vld [vmem:[#allocation7 + $0x154] ss:$8 sps:$4 sm:$0xff]  }
 0x54c   : > { %v3901_v14 = vpop.f32.mrb[2].mxu1  ;;  %4161 = vmatpush1.bf16.msra.mxu1 %v5965_v43  ;;  %v3900_v39 = vadd.f32 %v3899_v62, %v3850_v35  ;;  %v6101_v43 = vld [vmem:[%s6984_s11 + $0x18] sm:$0xff]   ;;  %v6104_v62 = vld [vmem:[%s6984_s11 + $0x68] sm:$0xff]  }
 0x54d   : > { %v3902_v2 = vpop.f32.mrb[3].mxu1  ;;  %4162 = vmatprep.subr.bf16.mxu1 %v5970_v12  ;;  %v6102_v12 = vld [vmem:[%s6984_s11 + $0x60] sm:$0xff]  }
 0x54e   : > { %v6061_v14 = vld [vmem:[#allocation7 + $0x150] ss:$8 sps:$4 sm:$0xff]   ;;  %v6105_v2 = vld [vmem:[%s6984_s11 + $0x28] sm:$0xff]  }
 0x550   : > { %4163 = vmatpush1.bf16.msra.mxu1 %v5968_v1  ;;  %v6066_v1 = vld [vmem:[#allocation7 + $0x164] ss:$8 sps:$4 sm:$0xff]  }
 0x551   : > { %4164 = vmatprep.subr.bf16.mxu1 %v5973_v3  ;;  %v6064_v3 = vld [vmem:[#allocation7 + $0x160] ss:$8 sps:$4 sm:$0xff]  }
 0x554   : > { %4165 = vmatpush1.bf16.msra.mxu1 %v5971_v5  ;;  %v6072_v5 = vld [vmem:[#allocation7 + $0x184] ss:$8 sps:$4 sm:$0xff]  }
 0x555   : > { %4166 = vmatprep.subr.bf16.mxu1 %v5976_v17  ;;  %v6070_v17 = vld [vmem:[#allocation7 + $0x180] ss:$8 sps:$4 sm:$0xff]  }
 0x558   : > { %4167 = vmatpush1.bf16.msra.mxu1 %v5974_v7  ;;  %v6073_v7 = vld [vmem:[#allocation7 + $0x190] ss:$8 sps:$4 sm:$0xff]  }
 0x559   : > { %4168 = vmatprep.subr.bf16.mxu1 %v5979_v8  ;;  %v6078_v8 = vld [vmem:[#allocation7 + $0x1a4] ss:$8 sps:$4 sm:$0xff]  }
 0x55c   : > { %4169 = vmatpush1.bf16.msra.mxu1 %v5977_v20  ;;  %v6076_v20 = vld [vmem:[#allocation7 + $0x1a0] ss:$8 sps:$4 sm:$0xff]  }
 0x55d   : > { %4170 = vmatprep.subr.bf16.mxu1 %v5982_v10  ;;  %v6081_v10 = vld [vmem:[#allocation7 + $0x1b4] ss:$8 sps:$4 sm:$0xff]  }
 0x560   : > { %4171 = vmatpush1.bf16.msra.mxu1 %v5980_v50  ;;  %v6079_v50 = vld [vmem:[#allocation7 + $0x1b0] ss:$8 sps:$4 sm:$0xff]  }
 0x561   : > { %4172 = vmatprep.subr.bf16.mxu1 %v5985_v21  ;;  %v6084_v21 = vld [vmem:[#allocation7 + $0x1c4] ss:$8 sps:$4 sm:$0xff]  }
 0x564   : > { %4173 = vmatpush1.bf16.msra.mxu1 %v5983_v23  ;;  %v6082_v23 = vld [vmem:[#allocation7 + $0x1c0] ss:$8 sps:$4 sm:$0xff]  }
 0x565   : > { %4174 = vmatprep.subr.bf16.mxu1 %v5988_v25  ;;  %v6087_v25 = vld [vmem:[#allocation7 + $0x1d4] ss:$8 sps:$4 sm:$0xff]  }
 0x568   : > { %4175 = vmatpush1.bf16.msra.mxu1 %v5986_v26  ;;  %v6085_v26 = vld [vmem:[#allocation7 + $0x1d0] ss:$8 sps:$4 sm:$0xff]  }
 0x569   : > { %4176 = vmatprep.subr.bf16.mxu1 %v5991_v28  ;;  %v6090_v28 = vld [vmem:[#allocation7 + $0x1e4] ss:$8 sps:$4 sm:$0xff]  }
 0x56c   : > { %4177 = vmatpush1.bf16.msra.mxu1 %v5989_v63  ;;  %v6088_v63 = vld [vmem:[#allocation7 + $0x1e0] ss:$8 sps:$4 sm:$0xff]  }
 0x56d   : > { %4178 = vmatprep.subr.bf16.mxu1 %v5994_v29  ;;  %v6093_v29 = vld [vmem:[#allocation7 + $0x1f4] ss:$8 sps:$4 sm:$0xff]  }
 0x570   : > { %4179 = vmatpush1.bf16.msra.mxu1 %v5992_v30  ;;  %v6091_v30 = vld [vmem:[#allocation7 + $0x1f0] ss:$8 sps:$4 sm:$0xff]  }
 0x571   : > { %4180 = vmatprep.subr.bf16.mxu1 %v5997_v31  ;;  %v3854_v31 = vrot.slane %v6862_v33, %v6608_v13  ;;  %v6107_v13 = vld [vmem:[%s6984_s11 + $0x30] sm:$0xff]  }
 0x574   : > { %4181 = vmatpush1.bf16.msra.mxu1 %v5995_v32  ;;  %v3858_v32 = vrot.slane %v6862_v33, %v6619_v18  ;;  %v6108_v18 = vld [vmem:[%s6984_s11 + $0x78] sm:$0xff]  }
 0x575   : > { %5424 = vmatprep.subr.bf16.mxu1 %v6094_v11  ;;  %v6109_v33 = vld [vmem:[%s6984_s11 + $0x38] sm:$0xff]  }
 0x577   : > { %4183 = vmatmul.mubr.bf16.vlgmr.msra.gmra.mrb[4].mxu1 %v6851_v54 }
 0x578   : > { %5425 = vmatpush3.bf16.msra.mxu1 %v6095_v55 }
 0x579   : > { %5426 = vmatprep.subr.bf16.mxu1 %v6096_v56 }
 0x57c   : > { %5427 = vmatpush3.bf16.msra.mxu1 %v6097_v59 }
 0x57d   : > { %5428 = vmatprep.subr.bf16.mxu1 %v6098_v44 }
 0x580   : > { %5429 = vmatpush3.bf16.msra.mxu1 %v6099_v45 }
 0x581   : > { %5430 = vmatprep.subr.bf16.mxu1 %v6100_v9 }
 0x584   : > { %5431 = vmatpush3.bf16.msra.mxu1 %v6101_v43 }
 0x585   : > { %5432 = vmatprep.subr.bf16.mxu1 %v6102_v12 }
 0x588   : > { %5433 = vmatpush3.bf16.msra.mxu1 %v6103_v27 }
 0x589   : > { %5434 = vmatprep.subr.bf16.mxu1 %v6104_v62 }
 0x58c   : > { %5435 = vmatpush3.bf16.msra.mxu1 %v6105_v2 }
 0x5cb   : > { %v4020_v40 = vpop.f32.mrb[0].mxu0 }
 0x5cc   : > { %v5497_v46 = vadd.f32 %v4020_v40, %v3898_v38  ;;  %v4022_v57 = vpop.f32.mrb[1].mxu0 }
 0x5cd   : > { %v5499_v47 = vadd.f32 %v4022_v57, %v3900_v39  ;;  %v4024_v49 = vpop.f32.mrb[2].mxu0 }
 0x5ce   : > { %v4191_v0 = vmax.f32 %v5497_v46, 0.0  ;;  %v4025_v54 = vpop.f32.mrb[3].mxu0 }
 0x5cf   : > { %v4192_v53 = vmax.f32 %v5499_v47, 0.0  ;;  %v6106_v54 = vld [vmem:[%s6984_s11 + $0x70] sm:$0xff]  }
 0x5d0   : > { %v4195_v52 = vpack.c.bf16 %v4191_v0, %v4191_v0  ;;  %5436 = vmatprep.subr.bf16.mxu1 %v6106_v54 }
 0x5d1   : > { %v4196_v51 = vpack.c.bf16 %v4192_v53, %v4192_v53  ;;  %5437 = vmatpush3.bf16.msra.mxu1 %v6107_v13  ;;  %v4263_v53 = vld [vmem:[%s6985_s7] sm:$0x3] }
 0x5d2   : > { %5438 = vmatprep.subr.bf16.mxu1 %v6108_v18 }
 0x5d3   : > { %4627 = vmatprep.mubr.bf16.mxu0 %v4196_v51  ;;  %v4588_v51 = vrot.slane %v4263_v53, %v6605_v42  ;;  %v4713_v42 = vld [vmem:[%s6986_s24] sm:$0x1] }
 0x5d4   : > { %4628 = vmatmul.mubr.bf16.vlgmr.msra.gmra.mrb[4].mxu0 %v4195_v52 }
 0x5d5   : > { %4637 = vmatpush1.bf16.msra.mxu0 %v6046_v36  ;;  %5439 = vmatpush3.bf16.msra.mxu1 %v6109_v33  ;;  %v4592_v36 = vrot.slane %v4263_v53, %v6616_v15 }
 0x5d6   : > { %4638 = vmatprep.subr.bf16.mxu0 %v6051_v37 }
 0x5d9   : > { %4639 = vmatpush1.bf16.msra.mxu0 %v6049_v41 }
 0x5da   : > { %4640 = vmatprep.subr.bf16.mxu0 %v6054_v58 }
 0x5dd   : > { %4641 = vmatpush1.bf16.msra.mxu0 %v6052_v61 }
 0x5de   : > { %4642 = vmatprep.subr.bf16.mxu0 %v6057_v60 }
 0x5e1   : > { %4643 = vmatpush1.bf16.msra.mxu0 %v6055_v22 }
 0x5e2   : > { %4644 = vmatprep.subr.bf16.mxu0 %v6060_v19 }
 0x5e5   : > { %4645 = vmatpush1.bf16.msra.mxu0 %v6058_v24 }
 0x5e6   : > { %4646 = vmatprep.subr.bf16.mxu0 %v6063_v48 }
 0x5e9   : > { %4647 = vmatpush1.bf16.msra.mxu0 %v6061_v14 }
 0x5ea   : > { %4648 = vmatprep.subr.bf16.mxu0 %v6066_v1 }
 0x5ed   : > { %4649 = vmatpush1.bf16.msra.mxu0 %v6064_v3 }
 0x5ee   : > { %4650 = vmatprep.subr.bf16.mxu0 %v6069_v4 }
 0x5f1   : > { %4651 = vmatpush1.bf16.msra.mxu0 %v6067_v16 }
 0x5f2   : > { %4652 = vmatprep.subr.bf16.mxu0 %v6072_v5 }
 0x5f5   : > { %4653 = vmatpush1.bf16.msra.mxu0 %v6070_v17 }
 0x5f6   : > { %4654 = vmatprep.subr.bf16.mxu0 %v6075_v6 }
 0x5f9   : > { %4655 = vmatpush1.bf16.msra.mxu0 %v6073_v7 }
 0x5fa   : > { %4656 = vmatprep.subr.bf16.mxu0 %v6078_v8 }
 0x5fd   : > { %4657 = vmatpush1.bf16.msra.mxu0 %v6076_v20 }
 0x5fe   : > { %4658 = vmatprep.subr.bf16.mxu0 %v6081_v10 }
 0x601   : > { %4659 = vmatpush1.bf16.msra.mxu0 %v6079_v50 }
 0x602   : > { %4660 = vmatprep.subr.bf16.mxu0 %v6084_v21 }
 0x605   : > { %4661 = vmatpush1.bf16.msra.mxu0 %v6082_v23 }
 0x606   : > { %4662 = vmatprep.subr.bf16.mxu0 %v6087_v25 }
 0x609   : > { %4663 = vmatpush1.bf16.msra.mxu0 %v6085_v26 }
 0x60a   : > { %4664 = vmatprep.subr.bf16.mxu0 %v6090_v28 }
 0x60d   : > { %4665 = vmatpush1.bf16.msra.mxu0 %v6088_v63 }
 0x60e   : > { %4666 = vmatprep.subr.bf16.mxu0 %v6093_v29 }
 0x611   : > { %4667 = vmatpush1.bf16.msra.mxu0 %v6091_v30 }
 0x64a   : > { %v4184_v34 = vpop.f32.mrb[4].mxu1 }
 0x64b   : > { %v5500_v35 = vadd.f32 %v4184_v34, %v3854_v31  ;;  %v4186_v38 = vpop.f32.mrb[5].mxu1 }
 0x64c   : > { %v5501_v39 = vadd.f32 %v4186_v38, %v3858_v32  ;;  %v4188_v40 = vpop.f32.mrb[6].mxu1 }
 0x64d   : > { %v4193_v46 = vmax.f32 %v5500_v35, 0.0  ;;  %v4189_v57 = vpop.f32.mrb[7].mxu1 }
 0x64e   : > { %v4194_v47 = vmax.f32 %v5501_v39, 0.0 }
 0x64f   : > { %v4197_v0 = vpack.c.bf16 %v4193_v46, %v4193_v46 }
 0x650   : > { %v4198_v49 = vpack.c.bf16 %v4194_v47, %v4194_v47 }
 0x652   : > { %4668 = vmatprep.mubr.bf16.mxu0 %v4198_v49 }
 0x653   : > { %4669 = vmatmul.mubr.bf16.vlgmr.msra.gmra.mrb[4].mxu0 %v4197_v0 }
 0x726   : > { %v4670_v52 = vpop.f32.mrb[4].mxu0 }
 0x727   : > { %v5502_v37 = vadd.f32 %v4670_v52, %v4588_v51  ;;  %v4672_v11 = vpop.f32.mrb[5].mxu0 }
 0x728   : > { %v5503_v55 = vadd.f32 %v4672_v11, %v4592_v36  ;;  %v4674_v56 = vpop.f32.mrb[6].mxu0 }
 0x729   : > { %v4677_v41 = vmax.f32 %v5502_v37, 0.0  ;;  %v4675_v58 = vpop.f32.mrb[7].mxu0 }
 0x72a   : > { %v4678_v59 = vmax.f32 %v5503_v55, 0.0 }
 0x72b   : > { %v4679_v61 = vpack.c.bf16 %v4677_v41, %v4677_v41 }
 0x72c   : > { %v4680_v44 = vpack.c.bf16 %v4678_v59, %v4678_v59 }
 0x72e   : > { %4842 = vmatprep.mubr.bf16.mxu1 %v4680_v44 }
 0x72f   : > { %4843 = vmatmul.mubr.bf16.vlgmr.msra.gmra.mrb[8].mxu1 %v4679_v61 }
 0x802   : > { %v5440_v60 = vpop.f32.mrb[8].mxu1 }
 0x803   : > { %v5441_v45 = vpop.f32.mrb[9].mxu1 }
 0x804   : > { %v5442_v15 = vadd.f32 %v5441_v45, %v5440_v60  ;;  %v5443_v9 = vpop.f32.mrb[10].mxu1 }
 0x805   : > { %v5444_v22 = vpop.f32.mrb[11].mxu1 }
 0x806   : > { %v4845_v19 = vadd.f32 %v5442_v15, %v4713_v42 }
 0x808   : > { %4851 = vst.msk [vmem:[%s503_s21] sm:$0x1] %vm4850_vm2, %v4845_v19 }
 0x809 PF: > { %s6987_s23 = sld [smem:[#allocation10_spill]]  ;;  %s6988_s25 = smov %s6233_s27 }
 0x80a   : > { %s6989_s26 = smov %s6237_s28  ;;  %s6990_s27 = smov %s6993_s30 }
 0x80b   : > { %s6991_s28 = smov %s6997_s15 }
 0x80f   : > { %s25_s29 = sadd.s32 1, %s6987_s23  }
 0x810   : > { %p22_p12 = scmp.ge.s32.totalorder %s25_s29, 8  }
 0x812   :  { %24 = sbr.rel (!%p22_p12) target bundleno = 11 (0xb), region = 127 }
 0x819   :  { %4869 = vsyncpa [#allocation4], 1 }
 0x81a   :  { %4871 = vsyncpa [#allocation4 + $0x1], 1 }
 0x81b   :  { %4872 = vsyncpa [#allocation6], 1 }

</bundles_post_ra>
